<compile_context>
chip_gen: v6e
topology: v6e:2x2x1
jax: 0.10.0
libtpu: 0.0.40
codegen_flags: <defaults>
</compile_context>

<pallas_src>
import jax
import jax.numpy as jnp
from jax.experimental import pallas as pl
from jax.experimental.pallas import tpu as pltpu

OUT_PAD = 128  # lane-dense output width; real Q-value lives in column 0


def _round_up(x, m):
    return ((x + m - 1) // m) * m


def critic_kernel(s_ref, a_ref,
                  w1_ref, b1_ref,
                  w2s_ref, w2a_ref, b2_ref,
                  w3_ref, b3_ref,
                  out_ref):
    wdt = w1_ref.dtype  # bf16 (or f32); accumulation is always f32

    s = s_ref[...].astype(wdt)
    a = a_ref[...].astype(wdt)

    # Layer 1: state -> hidden0, ReLU
    h0 = jnp.dot(s, w1_ref[...], preferred_element_type=jnp.float32) + b1_ref[...]
    h0 = jnp.maximum(h0, 0.0).astype(wdt)

    # Layer 2: concat([h0, action]) -> hidden1 (padded to 512), ReLU
    h1 = (jnp.dot(h0, w2s_ref[...], preferred_element_type=jnp.float32)
          + jnp.dot(a, w2a_ref[...], preferred_element_type=jnp.float32)
          + b2_ref[...])
    h1 = jnp.maximum(h1, 0.0).astype(wdt)

    # Output layer: hidden1 -> 128 padded lanes (only column 0 is the Q-value)
    q = jnp.dot(h1, w3_ref[...], preferred_element_type=jnp.float32) + b3_ref[...]
    out_ref[...] = q.astype(out_ref.dtype)


def critic_forward(state, action, params, *, block_b=256):
    """state: (B, S), action: (B, A) -> (B, 1) f32 Q-values."""
    w1, b1, w2s, w2a, b2, w3, b3 = params

    if state.ndim == 1:  # mirror the PyTorch unsqueeze(0) path
        state = state[None, :]
        action = action[None, :]
    state = state.astype(jnp.float32)
    action = action.astype(jnp.float32)

    B, S = state.shape
    A = action.shape[1]
    H0 = w1.shape[1]
    H1P = w2s.shape[1]
    NP = w3.shape[1]

    # Batch tile: multiple of 8 sublanes, capped at block_b; pad B to a multiple.
    TB = min(block_b, _round_up(B, 8))
    B_pad = _round_up(B, TB)
    if B_pad != B:
        state = jnp.pad(state, ((0, B_pad - B), (0, 0)))
        action = jnp.pad(action, ((0, B_pad - B), (0, 0)))

    grid = (B_pad // TB,)

    weight_bytes = sum(int(x.size) * x.dtype.itemsize
                       for x in (w1, b1, w2s, w2a, b2, w3, b3))
    act_bytes = (int(state.size) + int(action.size)) * 4 + B_pad * NP * 4
    flops = 2 * B_pad * (S * H0 + (H0 + A) * H1P + H1P * NP)
    cost = pl.CostEstimate(flops=flops, transcendentals=0,
                           bytes_accessed=weight_bytes + act_bytes)

    def resident(shape):
        # Weights / biases: same block every grid step -> stay in VMEM.
        return pl.BlockSpec(shape, lambda i: (0, 0))

    out = pl.pallas_call(
        critic_kernel,
        out_shape=jax.ShapeDtypeStruct((B_pad, NP), jnp.float32),
        grid=grid,
        in_specs=[
            pl.BlockSpec((TB, S), lambda i: (i, 0)),   # state tile
            pl.BlockSpec((TB, A), lambda i: (i, 0)),   # action tile
            resident(w1.shape), resident(b1.shape),
            resident(w2s.shape), resident(w2a.shape), resident(b2.shape),
            resident(w3.shape), resident(b3.shape),
        ],
        out_specs=pl.BlockSpec((TB, NP), lambda i: (i, 0)),  # lane-dense output
        compiler_params=pltpu.CompilerParams(
            dimension_semantics=("parallel",),
            vmem_limit_bytes=32 * 1024 * 1024,
        ),
        cost_estimate=cost,
    )(state, action, w1, b1, w2s, w2a, b2, w3, b3)

    return out[:B, :1]


def xavier_uniform_t(key, fan_in, fan_out, dtype=jnp.float32):
    # Matches nn.init.xavier_uniform_ on a (fan_out, fan_in) weight; returned
    # already transposed to (fan_in, fan_out) for `x @ W`.
    bound = (6.0 / (fan_in + fan_out)) ** 0.5
    return jax.random.uniform(key, (fan_in, fan_out), dtype, -bound, bound)


def init_critic_params(key, state_dim, action_dim, hidden_dims=(256, 400),
                       *, weight_dtype=jnp.bfloat16):
    h0, h1 = hidden_dims[0], hidden_dims[1]
    h1p = _round_up(h1, 128)  # 400 -> 512: lane-aligned hidden width
    k1, k2, k3 = jax.random.split(key, 3)

    w1 = xavier_uniform_t(k1, state_dim, h0)                     # (S, H0)
    b1 = jnp.zeros((1, h0), jnp.float32)

    w2 = xavier_uniform_t(k2, h0 + action_dim, h1)               # (H0+A, H1)
    w2 = jnp.pad(w2, ((0, 0), (0, h1p - h1)))                    # zero-pad cols
    w2s, w2a = w2[:h0], w2[h0:]                                  # fold the concat
    b2 = jnp.zeros((1, h1p), jnp.float32)

    w3 = xavier_uniform_t(k3, h1, 1)                             # (H1, 1)
    w3 = jnp.pad(w3, ((0, h1p - h1), (0, OUT_PAD - 1)))          # (H1P, 128), zeros
    b3 = jnp.zeros((1, OUT_PAD), jnp.float32)

    return (w1.astype(weight_dtype), b1,
            w2s.astype(weight_dtype), w2a.astype(weight_dtype), b2,
            w3.astype(weight_dtype), b3)


def critic_reference(state, action, params):
    # Pure-JAX reference using the exact same (bf16) params / casting sequence.
    w1, b1, w2s, w2a, b2, w3, b3 = params
    if state.ndim == 1:
        state = state[None, :]
        action = action[None, :]
    wdt = w1.dtype
    s = state.astype(jnp.float32).astype(wdt)
    a = action.astype(jnp.float32).astype(wdt)
    h0 = jnp.maximum(jnp.dot(s, w1, preferred_element_type=jnp.float32) + b1, 0.0)
    h0 = h0.astype(wdt)
    h1 = jnp.maximum(jnp.dot(h0, w2s, preferred_element_type=jnp.float32)
                     + jnp.dot(a, w2a, preferred_element_type=jnp.float32)
                     + b2, 0.0).astype(wdt)
    q = jnp.dot(h1, w3, preferred_element_type=jnp.float32) + b3
    return q[:, :1]


if __name__ == "__main__":
    key = jax.random.PRNGKey(0)
    kp, ks, ka = jax.random.split(key, 3)

    # MuJoCo-ish dims; B=300 exercises both the batch grid and the padding path
    # (padded to 512 rows, two grid steps of 256).
    B, STATE_DIM, ACTION_DIM = 300, 17, 6
    HIDDEN_DIMS = (256, 400)

    params = init_critic_params(kp, STATE_DIM, ACTION_DIM, HIDDEN_DIMS)
    state = jax.random.normal(ks, (B, STATE_DIM), jnp.float32)
    action = jax.random.normal(ka, (B, ACTION_DIM), jnp.float32)

    q = critic_forward(state, action, params)
    q = jax.block_until_ready(q)

    q_ref = critic_reference(state, action, params)
    assert q.shape == (B, 1), q.shape
    err = float(jnp.max(jnp.abs(q - q_ref)))
    assert jnp.allclose(q, q_ref, atol=5e-3, rtol=5e-3), f"mismatch vs reference: {err}"

    print("KERNEL_OK")
</pallas_src>

<mosaic_0001>
module attributes {stable_mosaic.version = 11 : i64} {
  func.func @critic_kernel(%arg0: i32, %arg1: memref<256x17xf32, #tpu.memory_space<vmem>>, %arg2: memref<256x6xf32, #tpu.memory_space<vmem>>, %arg3: memref<17x256xbf16, #tpu.memory_space<vmem>>, %arg4: memref<1x256xf32, #tpu.memory_space<vmem>>, %arg5: memref<256x512xbf16, #tpu.memory_space<vmem>>, %arg6: memref<6x512xbf16, #tpu.memory_space<vmem>>, %arg7: memref<1x512xf32, #tpu.memory_space<vmem>>, %arg8: memref<512x128xbf16, #tpu.memory_space<vmem>>, %arg9: memref<1x128xf32, #tpu.memory_space<vmem>>, %arg10: memref<256x128xf32, #tpu.memory_space<vmem>>) attributes {dimension_semantics = [#tpu.dimension_semantics<parallel>], iteration_bounds = array<i64: 2>, scalar_prefetch = 0 : i64, scratch_operands = 0 : i64, tpu.core_type = #tpu.core_type<tc>, window_params = [{transform_indices = @transform_0, window_bounds = array<i64: 256, 17>}, {transform_indices = @transform_1, window_bounds = array<i64: 256, 6>}, {pipeline_mode = #tpu.pipeline_mode<synchronous>, transform_indices = @transform_2, window_bounds = array<i64: 17, 256>}, {pipeline_mode = #tpu.pipeline_mode<synchronous>, transform_indices = @transform_3, window_bounds = array<i64: 1, 256>}, {pipeline_mode = #tpu.pipeline_mode<synchronous>, transform_indices = @transform_4, window_bounds = array<i64: 256, 512>}, {pipeline_mode = #tpu.pipeline_mode<synchronous>, transform_indices = @transform_5, window_bounds = array<i64: 6, 512>}, {pipeline_mode = #tpu.pipeline_mode<synchronous>, transform_indices = @transform_6, window_bounds = array<i64: 1, 512>}, {pipeline_mode = #tpu.pipeline_mode<synchronous>, transform_indices = @transform_7, window_bounds = array<i64: 512, 128>}, {pipeline_mode = #tpu.pipeline_mode<synchronous>, transform_indices = @transform_8, window_bounds = array<i64: 1, 128>}, {transform_indices = @transform_9, window_bounds = array<i64: 256, 128>}]} {
    %c0 = arith.constant 0 : index
    %c0_0 = arith.constant 0 : index
    %0 = vector.load %arg1[%c0, %c0_0] : memref<256x17xf32, #tpu.memory_space<vmem>>, vector<256x17xf32>
    %1 = arith.truncf %0 : vector<256x17xf32> to vector<256x17xbf16>
    %c0_1 = arith.constant 0 : index
    %c0_2 = arith.constant 0 : index
    %2 = vector.load %arg2[%c0_1, %c0_2] : memref<256x6xf32, #tpu.memory_space<vmem>>, vector<256x6xf32>
    %3 = arith.truncf %2 : vector<256x6xf32> to vector<256x6xbf16>
    %c0_3 = arith.constant 0 : index
    %c0_4 = arith.constant 0 : index
    %4 = vector.load %arg3[%c0_3, %c0_4] : memref<17x256xbf16, #tpu.memory_space<vmem>>, vector<17x256xbf16>
    %cst = arith.constant dense<0.000000e+00> : vector<256x256xf32>
    %5 = tpu.matmul %1, %4, %cst {dimension_numbers = #tpu.dot_dimension_numbers<[1], [0], [0], [1], [0, 0, 1, 1], [], []>} : vector<256x17xbf16>, vector<17x256xbf16>, vector<256x256xf32> -> vector<256x256xf32>
    %c0_5 = arith.constant 0 : index
    %c0_6 = arith.constant 0 : index
    %6 = vector.load %arg4[%c0_5, %c0_6] : memref<1x256xf32, #tpu.memory_space<vmem>>, vector<1x256xf32>
    %7 = vector.broadcast %6 : vector<1x256xf32> to vector<256x256xf32>
    %8 = arith.addf %5, %7 : vector<256x256xf32>
    %cst_7 = arith.constant 0.000000e+00 : f32
    %9 = vector.broadcast %cst_7 : f32 to vector<256x256xf32>
    %10 = arith.maximumf %8, %9 : vector<256x256xf32>
    %11 = arith.truncf %10 : vector<256x256xf32> to vector<256x256xbf16>
    %c0_8 = arith.constant 0 : index
    %c0_9 = arith.constant 0 : index
    %12 = vector.load %arg5[%c0_8, %c0_9] : memref<256x512xbf16, #tpu.memory_space<vmem>>, vector<256x512xbf16>
    %cst_10 = arith.constant dense<0.000000e+00> : vector<256x512xf32>
    %13 = tpu.matmul %11, %12, %cst_10 {dimension_numbers = #tpu.dot_dimension_numbers<[1], [0], [0], [1], [0, 0, 1, 1], [], []>} : vector<256x256xbf16>, vector<256x512xbf16>, vector<256x512xf32> -> vector<256x512xf32>
    %c0_11 = arith.constant 0 : index
    %c0_12 = arith.constant 0 : index
    %14 = vector.load %arg6[%c0_11, %c0_12] : memref<6x512xbf16, #tpu.memory_space<vmem>>, vector<6x512xbf16>
    %cst_13 = arith.constant dense<0.000000e+00> : vector<256x512xf32>
    %15 = tpu.matmul %3, %14, %cst_13 {dimension_numbers = #tpu.dot_dimension_numbers<[1], [0], [0], [1], [0, 0, 1, 1], [], []>} : vector<256x6xbf16>, vector<6x512xbf16>, vector<256x512xf32> -> vector<256x512xf32>
    %16 = arith.addf %13, %15 : vector<256x512xf32>
    %c0_14 = arith.constant 0 : index
    %c0_15 = arith.constant 0 : index
    %17 = vector.load %arg7[%c0_14, %c0_15] : memref<1x512xf32, #tpu.memory_space<vmem>>, vector<1x512xf32>
    %18 = vector.broadcast %17 : vector<1x512xf32> to vector<256x512xf32>
    %19 = arith.addf %16, %18 : vector<256x512xf32>
    %cst_16 = arith.constant 0.000000e+00 : f32
    %20 = vector.broadcast %cst_16 : f32 to vector<256x512xf32>
    %21 = arith.maximumf %19, %20 : vector<256x512xf32>
    %22 = arith.truncf %21 : vector<256x512xf32> to vector<256x512xbf16>
    %c0_17 = arith.constant 0 : index
    %c0_18 = arith.constant 0 : index
    %23 = vector.load %arg8[%c0_17, %c0_18] : memref<512x128xbf16, #tpu.memory_space<vmem>>, vector<512x128xbf16>
    %cst_19 = arith.constant dense<0.000000e+00> : vector<256x128xf32>
    %24 = tpu.matmul %22, %23, %cst_19 {dimension_numbers = #tpu.dot_dimension_numbers<[1], [0], [0], [1], [0, 0, 1, 1], [], []>} : vector<256x512xbf16>, vector<512x128xbf16>, vector<256x128xf32> -> vector<256x128xf32>
    %c0_20 = arith.constant 0 : index
    %c0_21 = arith.constant 0 : index
    %25 = vector.load %arg9[%c0_20, %c0_21] : memref<1x128xf32, #tpu.memory_space<vmem>>, vector<1x128xf32>
    %26 = vector.broadcast %25 : vector<1x128xf32> to vector<256x128xf32>
    %27 = arith.addf %24, %26 : vector<256x128xf32>
    %c0_22 = arith.constant 0 : index
    %c0_23 = arith.constant 0 : index
    %28 = vector.load %arg10[%c0_22, %c0_23] : memref<256x128xf32, #tpu.memory_space<vmem>>, vector<256x128xf32>
    tpu.vector_store %arg10[%c0_22, %c0_23], %27 {strides = array<i32>} : memref<256x128xf32, #tpu.memory_space<vmem>>, vector<256x128xf32>,
    return
  }
  func.func @transform_0(%arg0: i32) -> (i32, i32) {
    %c0_i32 = arith.constant 0 : i32
    %c0_i32_0 = arith.constant 0 : i32
    return %arg0, %c0_i32 : i32, i32
  }
  func.func @transform_1(%arg0: i32) -> (i32, i32) {
    %c0_i32 = arith.constant 0 : i32
    %c0_i32_0 = arith.constant 0 : i32
    return %arg0, %c0_i32 : i32, i32
  }
  func.func @transform_2(%arg0: i32) -> (i32, i32) {
    %c0_i32 = arith.constant 0 : i32
    %c0_i32_0 = arith.constant 0 : i32
    %c0_i32_1 = arith.constant 0 : i32
    return %c0_i32, %c0_i32_0 : i32, i32
  }
  func.func @transform_3(%arg0: i32) -> (i32, i32) {
    %c0_i32 = arith.constant 0 : i32
    %c0_i32_0 = arith.constant 0 : i32
    %c0_i32_1 = arith.constant 0 : i32
    return %c0_i32, %c0_i32_0 : i32, i32
  }
  func.func @transform_4(%arg0: i32) -> (i32, i32) {
    %c0_i32 = arith.constant 0 : i32
    %c0_i32_0 = arith.constant 0 : i32
    %c0_i32_1 = arith.constant 0 : i32
    return %c0_i32, %c0_i32_0 : i32, i32
  }
  func.func @transform_5(%arg0: i32) -> (i32, i32) {
    %c0_i32 = arith.constant 0 : i32
    %c0_i32_0 = arith.constant 0 : i32
    %c0_i32_1 = arith.constant 0 : i32
    return %c0_i32, %c0_i32_0 : i32, i32
  }
  func.func @transform_6(%arg0: i32) -> (i32, i32) {
    %c0_i32 = arith.constant 0 : i32
    %c0_i32_0 = arith.constant 0 : i32
    %c0_i32_1 = arith.constant 0 : i32
    return %c0_i32, %c0_i32_0 : i32, i32
  }
  func.func @transform_7(%arg0: i32) -> (i32, i32) {
    %c0_i32 = arith.constant 0 : i32
    %c0_i32_0 = arith.constant 0 : i32
    %c0_i32_1 = arith.constant 0 : i32
    return %c0_i32, %c0_i32_0 : i32, i32
  }
  func.func @transform_8(%arg0: i32) -> (i32, i32) {
    %c0_i32 = arith.constant 0 : i32
    %c0_i32_0 = arith.constant 0 : i32
    %c0_i32_1 = arith.constant 0 : i32
    return %c0_i32, %c0_i32_0 : i32, i32
  }
  func.func @transform_9(%arg0: i32) -> (i32, i32) {
    %c0_i32 = arith.constant 0 : i32
    %c0_i32_0 = arith.constant 0 : i32
    return %arg0, %c0_i32 : i32, i32
  }
}

</mosaic_0001>

<bundles_post_ra>
// kernel: tpu_custom_call.1
= control target key start
LH: loop header
LB: loop body
LE: loop exit
PB: predicated region body
PF: predicated region fallthrough
CT: control target
= control target key end

     0   :  { %14 = vsyncpa [#allocation3], 0  ;;  %s5123_s0 = inlined_call_operand.vmem [shape: f32[512,17], index: 0, kind: input, shape index: {}]   ;;  %s5124_s1 = inlined_call_operand.vmem [shape: f32[512,6], index: 1, kind: input, shape index: {}]   ;;  %s5125_s2 = inlined_call_operand.vmem [shape: bf16[17,256], index: 2, kind: input, shape index: {}]   ;;  %s5126_s3 = inlined_call_operand.vmem [shape: f32[1,256], index: 3, kind: input, shape index: {}]   ;;  %s5127_s4 = inlined_call_operand.vmem [shape: bf16[256,512], index: 4, kind: input, shape index: {}]   ;;  %s5128_s5 = inlined_call_operand.vmem [shape: bf16[6,512], index: 5, kind: input, shape index: {}]   ;;  %s5129_s6 = inlined_call_operand.vmem [shape: f32[1,512], index: 6, kind: input, shape index: {}]   ;;  %s5130_s7 = inlined_call_operand.vmem [shape: bf16[512,128], index: 7, kind: input, shape index: {}]   ;;  %s5131_s8 = inlined_call_operand.vmem [shape: f32[1,128], index: 8, kind: input, shape index: {}]   ;;  %s5132_s9 = inlined_call_operand.hbm [shape: f32[512,128], index: 9, kind: output, shape index: {}]  }
   0x1   :  { %16 = vsyncpa [#allocation3 + $0x1], 0  ;;  %s3798_s30 = smov 0   ;;  %s3800_s10 = smov 0  }
   0x2   :  { %s3802_s11 = smov 0   ;;  %s3804_s12 = smov 0  }
   0x3 LB: > { %s3819_s13 = sadd.s32 4294967295, %s3742_s12   ;;  %s3107_s14 = sadd.s32 4294967294, %s3742_s12   ;;  %s3742_s12 = sphi %s3804_s12, %s5312_s12   ;;  %s3738_s11 = sphi %s3802_s11, %s5311_s11   ;;  %s3734_s10 = sphi %s3800_s10, %s5310_s10   ;;  %s3730_s30 = sphi %s3798_s30, %s5309_s30  }
   0x4   : > { %s3823_s15 = sadd.s32 1, %s3742_s12   ;;  %s228_s16 = sadd.s32 1, %s3738_s11 }
   0x5   : > { %s225_s17 = ssub.s32 %s3742_s12, %s3823_s15  ;;  %p238_p0 = scmp.ne.s32.totalorder %s3738_s11, %s3734_s10 }
   0x6   : > { %p226_p1 = scmp.eq.s32.totalorder %s225_s17, 0  ;;  %p239_p2 = scmp.eq.s32.totalorder %s3819_s13, 1 }
   0x7   : > { %p244_p3 = scmp.ne.s32.totalorder %s3734_s10, %s3730_s30  ;;  %p245_p4 = scmp.eq.s32.totalorder %s3107_s14, 1 }
   0x8   : > { %s3834_s18 = scalar_select %p226_p1, %s3738_s11, %s228_s16  }
   0x9   : > { %p3836_p5 = por %p239_p2, %p238_p0  ;;  %p3840_p6 = por %p245_p4, %p244_p3 }
   0xa   : > { %p3110_p7 = scmp.ge.s32.totalorder %s3742_s12, 1  ;;  %p302_p8 = scmp.lt.s32.totalorder %s3742_s12, 3 }
   0xc   : > { %p303_p9 = pnand %p3110_p7, %p302_p8 }
   0xe   : > { %306 = sbr.rel (%p303_p9) target bundleno = 785 (0x311), region = 56 }
  0x13   : > { %v455_v0 = vld [vmem:[%s5125_s2 + $0x10] sm:$0x11]  ;;  %vm532_vm0 = vcmask 1040384   ;;  %v3744_v2 = vmov 0   ;;  %s3112_s23 = sshll.u32 %s3819_s13, 5  ;;  %vm955_vm1 = vcmask 1042432  }
  0x14   : > { %v3119_v1 = vcombine.high %v455_v0, %v455_v0  ;;  %v534_v3 = vsel %vm532_vm0, 65535, %v3744_v2  ;;  %v3118_v4 = vcombine.low %v455_v0, %v455_v0  ;;  %573 = vmatprep.mubr.bf16.mxu0 %v3744_v2  ;;  %1000 = vmatprep.mubr.bf16.mxu1 %v3744_v2  ;;  %v3547_v5 = vld [vmem:[%s5125_s2 + $0x4] ss:$8 sps:$4 sm:$0xff]   ;;  %p344_p10 = scmp.lt.s32.totalorder %s3112_s23, 63  ;;  %v3549_v12 = vld [vmem:[%s5125_s2] ss:$8 sps:$4 sm:$0xff]  }
  0x15   : > { %v894_v6 = vld [vmem:[%s5128_s5] sm:$0x77]  ;;  %v895_v11 = vld [vmem:[%s5128_s5 + $0x8] sm:$0x77]  ;;  %vm906_vm2 = vcmask 48128   ;;  %vm483_vm3 = vcmask 138240  }
  0x16   : > { %v539_v7 = vand.u32 %v3119_v1, %v534_v3  ;;  %v536_v8 = vand.u32 %v3118_v4, %v534_v3  ;;  %v3137_v9 = vcombine.high %v894_v6, %v894_v6  ;;  %v3136_v10 = vcombine.low %v894_v6, %v894_v6  ;;  %s5314_s23 = smov (!%p344_p10, %s3112_s23), 63  ;;  %v3556_v37 = vld [vmem:[%s5127_s4 + $0xe4] ss:$16 sps:$4 sm:$0xff]   ;;  %v3559_v40 = vld [vmem:[%s5127_s4 + $0xec] ss:$16 sps:$4 sm:$0xff]   ;;  %s340_s16 = sand.u32 1, %s3734_s10  }
  0x17   : > { %v3139_v14 = vcombine.high %v895_v11, %v895_v11  ;;  %s3113_s17 = sshll.u32 %s5314_s23, 3  ;;  %v3138_v15 = vcombine.low %v895_v11, %v895_v11  ;;  %s3111_s22 = sshll.u32 %s340_s16, 8 }
  0x18   : > { %553 = vmatprep.subr.bf16.mxu0 %v539_v7  ;;  %3140 = vmatprep.subr.msk.bf16.mxu1 %vm955_vm1, %v3137_v9  ;;  %v957_v13 = vsel %vm955_vm1, %v3136_v10, 0  ;;  %s3870_s24 = scalar_lea.vmem %s5123_s0, %s3113_s17  ;;  %s3875_s27 = scalar_lea.vmem %s5124_s1, %s3113_s17 }
  0x19   : > { %554 = vmatpush1.bf16.msra.mxu0 %v536_v8  ;;  %983 = vmatpush1.bf16.msra.mxu1 %v957_v13  ;;  %v357_v16 = vld [vmem:[%s3870_s24] sm:$0xff]  ;;  %v358_v17 = vld [vmem:[%s3870_s24 + $0x8] sm:$0xff]  ;;  %v963_v22 = vsel %vm955_vm1, %v3138_v15, 0  ;;  %v407_v23 = vld [vmem:[%s3875_s27 + $0x10] sm:$0xff]  ;;  %s3276_s25 = sshll.u32 %s3819_s13, 12  ;;  %s5083_s29 = scalar_lea.sflag [#allocation3], %s340_s16 }
  0x1a   : > { %555 = vmatprep.subr.bf16.mxu0 %v3547_v5  ;;  %3501 = vmatprep.subr.msk.bf16.mxu1 %vm955_vm1, %v3139_v14  ;;  %v389_v18 = vpack.c.bf16 %v358_v17, %v357_v16  ;;  %v405_v19 = vld [vmem:[%s3875_s27] sm:$0xff]  ;;  %v406_v20 = vld [vmem:[%s3875_s27 + $0x8] sm:$0xff]  ;;  %v408_v24 = vld [vmem:[%s3875_s27 + $0x18] sm:$0xff]  ;;  %s5076_s28 = scalar_lea.hbm %s5132_s9, %s3276_s25  ;;  %s3745_s14 = smov [#allocation2]  }
  0x1b   : > { %v3882_v21 = vpack.c.bf16 %v406_v20, %v405_v19  ;;  %v359_v25 = vld [vmem:[%s3870_s24 + $0x10] sm:$0xff]  ;;  %v360_v26 = vld [vmem:[%s3870_s24 + $0x18] sm:$0xff]  ;;  %v3895_v27 = vpack.c.bf16 %v408_v24, %v407_v23  ;;  %v409_v29 = vld [vmem:[%s3875_s27 + $0x20] sm:$0xff]  ;;  %s3686_s17 = sshll.u32 %s3745_s14, 4  ;;  %s3687_s17 = int_to_ptr.vmem [resolvable:$false] %s3686_s17 }
  0x1c   : > { %v390_v28 = vpack.c.bf16 %v360_v26, %v359_v25  ;;  %v410_v30 = vld [vmem:[%s3875_s27 + $0x28] sm:$0xff]  ;;  %v361_v31 = vld [vmem:[%s3870_s24 + $0x20] sm:$0xff]  ;;  %v411_v35 = vld [vmem:[%s3875_s27 + $0x30] sm:$0xff]  ;;  %s3688_s21 = scalar_lea.vmem %s3687_s17, 8192 }
  0x1d   : > { %556 = vmatpush1.bf16.msra.mxu0 %v3549_v12  ;;  %3141 = vmatmul.mubr.msk.bf16.vlgmr.msra.gmra.mxu1 %vm906_vm2, %v3882_v21  ;;  %v362_v32 = vld [vmem:[%s3870_s24 + $0x28] sm:$0xff]  ;;  %v3906_v33 = vpack.c.bf16 %v410_v30, %v409_v29  ;;  %v412_v36 = vld [vmem:[%s3875_s27 + $0x38] sm:$0xff]  ;;  %v363_v38 = vld [vmem:[%s3870_s24 + $0x30] sm:$0xff] }
  0x1e   : > { %3157 = vmatprep.subr.msk.bf16.mxu0 %vm955_vm1, %v3139_v14  ;;  %3502 = vmatpush1.bf16.msra.mxu1 %v963_v22  ;;  %v391_v34 = vpack.c.bf16 %v362_v32, %v361_v31  ;;  %v364_v39 = vld [vmem:[%s3870_s24 + $0x38] sm:$0xff]  ;;  %v3923_v41 = vpack.c.bf16 %v412_v36, %v411_v35  ;;  %v365_v43 = vld [vmem:[%s3870_s24 + $0x40] sm:$0xff]  ;;  %v414_v45 = vld [vmem:[%s3875_s27 + $0x48] sm:$0xff] }
  0x1f   : > { %1010 = vmatprep.mubr.bf16.mxu1 %v3744_v2  ;;  %1867 = vmatprep.subr.bf16.mxu1 %v3559_v40  ;;  %v392_v42 = vpack.c.bf16 %v364_v39, %v363_v38  ;;  %v413_v44 = vld [vmem:[%s3875_s27 + $0x40] sm:$0xff]  ;;  %v366_v46 = vld [vmem:[%s3870_s24 + $0x48] sm:$0xff]  ;;  %v415_v49 = vld [vmem:[%s3875_s27 + $0x50] sm:$0xff] }
  0x20   : > { %3120 = vmatmul.mubr.msk.bf16.vlgmr.msra.gmra.mxu0 %vm483_vm3, %v389_v18  ;;  %v3934_v47 = vpack.c.bf16 %v414_v45, %v413_v44  ;;  %v393_v48 = vpack.c.bf16 %v366_v46, %v365_v43  ;;  %v416_v50 = vld [vmem:[%s3875_s27 + $0x58] sm:$0xff]  ;;  %v367_v51 = vld [vmem:[%s3870_s24 + $0x50] sm:$0xff]  ;;  %v417_v55 = vld [vmem:[%s3875_s27 + $0x60] sm:$0xff] }
  0x21   : > { %583 = vmatprep.mubr.bf16.mxu0 %v3744_v2  ;;  %1176 = vmatpush1.bf16.msra.mxu0 %v963_v22  ;;  %v368_v52 = vld [vmem:[%s3870_s24 + $0x58] sm:$0xff]  ;;  %v3945_v53 = vpack.c.bf16 %v416_v50, %v415_v49  ;;  %v418_v56 = vld [vmem:[%s3875_s27 + $0x68] sm:$0xff]  ;;  %v369_v57 = vld [vmem:[%s3870_s24 + $0x60] sm:$0xff] }
  0x22   : > { %1674 = vmatprep.subr.bf16.mxu0 %v3556_v37  ;;  %v394_v54 = vpack.c.bf16 %v368_v52, %v367_v51  ;;  %v370_v58 = vld [vmem:[%s3870_s24 + $0x68] sm:$0xff]  ;;  %v3956_v59 = vpack.c.bf16 %v418_v56, %v417_v55  ;;  %v419_v61 = vld [vmem:[%s3875_s27 + $0x70] sm:$0xff]  ;;  %v420_v62 = vld [vmem:[%s3875_s27 + $0x78] sm:$0xff] }
  0x23   : > { %v395_v60 = vpack.c.bf16 %v370_v58, %v369_v57  ;;  %v371_v63 = vld [vmem:[%s3870_s24 + $0x70] sm:$0xff]  ;;  %v372_v0 = vld [vmem:[%s3870_s24 + $0x78] sm:$0xff]  ;;  %v3967_v1 = vpack.c.bf16 %v420_v62, %v419_v61  ;;  %v421_v4 = vld [vmem:[%s3875_s27 + $0x80] sm:$0xff] }
  0x24   : > { %v396_v3 = vpack.c.bf16 %v372_v0, %v371_v63  ;;  %v422_v5 = vld [vmem:[%s3875_s27 + $0x88] sm:$0xff]  ;;  %v373_v6 = vld [vmem:[%s3870_s24 + $0x80] sm:$0xff]  ;;  %v423_v10 = vld [vmem:[%s3875_s27 + $0x90] sm:$0xff] }
  0x25   : > { %3142 = vmatmul.mubr.msk.bf16.gmra.mxu1 %vm906_vm2, %v3895_v27  ;;  %v374_v7 = vld [vmem:[%s3870_s24 + $0x88] sm:$0xff]  ;;  %v3978_v8 = vpack.c.bf16 %v422_v5, %v421_v4  ;;  %v424_v11 = vld [vmem:[%s3875_s27 + $0x98] sm:$0xff]  ;;  %v375_v12 = vld [vmem:[%s3870_s24 + $0x90] sm:$0xff] }
  0x26   : > { %1020 = vmatprep.mubr.bf16.mxu1 %v3744_v2  ;;  %v397_v9 = vpack.c.bf16 %v374_v7, %v373_v6  ;;  %v376_v13 = vld [vmem:[%s3870_s24 + $0x98] sm:$0xff]  ;;  %v3989_v14 = vpack.c.bf16 %v424_v11, %v423_v10  ;;  %v425_v16 = vld [vmem:[%s3875_s27 + $0xa0] sm:$0xff]  ;;  %v426_v17 = vld [vmem:[%s3875_s27 + $0xa8] sm:$0xff] }
  0x27   : > { %v398_v15 = vpack.c.bf16 %v376_v13, %v375_v12  ;;  %v377_v18 = vld [vmem:[%s3870_s24 + $0xa0] sm:$0xff]  ;;  %v378_v19 = vld [vmem:[%s3870_s24 + $0xa8] sm:$0xff]  ;;  %v4000_v20 = vpack.c.bf16 %v426_v17, %v425_v16  ;;  %v427_v23 = vld [vmem:[%s3875_s27 + $0xb0] sm:$0xff] }
  0x28   : > { %3121 = vmatmul.mubr.msk.bf16.gmra.mxu0 %vm483_vm3, %v390_v28  ;;  %v399_v22 = vpack.c.bf16 %v378_v19, %v377_v18  ;;  %v428_v24 = vld [vmem:[%s3875_s27 + $0xb8] sm:$0xff]  ;;  %v379_v25 = vld [vmem:[%s3870_s24 + $0xb0] sm:$0xff]  ;;  %v429_v30 = vld [vmem:[%s3875_s27 + $0xc0] sm:$0xff] }
  0x29   : > { %593 = vmatprep.mubr.bf16.mxu0 %v3744_v2  ;;  %v380_v26 = vld [vmem:[%s3870_s24 + $0xb8] sm:$0xff]  ;;  %v4011_v28 = vpack.c.bf16 %v428_v24, %v427_v23  ;;  %v430_v31 = vld [vmem:[%s3875_s27 + $0xc8] sm:$0xff]  ;;  %v381_v32 = vld [vmem:[%s3870_s24 + $0xc0] sm:$0xff] }
  0x2a   : > { %v400_v29 = vpack.c.bf16 %v380_v26, %v379_v25  ;;  %v4022_v35 = vpack.c.bf16 %v430_v31, %v429_v30  ;;  %v431_v37 = vld [vmem:[%s3875_s27 + $0xd0] sm:$0xff]  ;;  %v432_v38 = vld [vmem:[%s3875_s27 + $0xd8] sm:$0xff]  ;;  %v433_v44 = vld [vmem:[%s3875_s27 + $0xe0] sm:$0xff] }
  0x2b   : > { %v383_v39 = vld [vmem:[%s3870_s24 + $0xd0] sm:$0xff]  ;;  %v384_v40 = vld [vmem:[%s3870_s24 + $0xd8] sm:$0xff]  ;;  %v434_v45 = vld [vmem:[%s3875_s27 + $0xe8] sm:$0xff] }
  0x2c   : > { %v402_v43 = vpack.c.bf16 %v384_v40, %v383_v39  ;;  %v385_v46 = vld [vmem:[%s3870_s24 + $0xe0] sm:$0xff]  ;;  %v4044_v49 = vpack.c.bf16 %v434_v45, %v433_v44  ;;  %v435_v51 = vld [vmem:[%s3875_s27 + $0xf0] sm:$0xff]  ;;  %v436_v52 = vld [vmem:[%s3875_s27 + $0xf8] sm:$0xff] }
  0x2d   : > { %3143 = vmatmul.mubr.msk.bf16.gmra.mxu1 %vm906_vm2, %v3906_v33  ;;  %v388_v55 = vld [vmem:[%s3870_s24 + $0xf8] sm:$0xff]  ;;  %v4055_v56 = vpack.c.bf16 %v436_v52, %v435_v51  ;;  %v3562_v61 = vld [vmem:[%s5127_s4 + $0xc4] ss:$16 sps:$4 sm:$0xff]   ;;  %v3560_v0 = vld [vmem:[%s5127_s4 + $0xc0] ss:$16 sps:$4 sm:$0xff]  }
  0x2e   : > { %1030 = vmatprep.mubr.bf16.mxu1 %v3744_v2  ;;  %v3557_v58 = vld [vmem:[%s5127_s4 + $0xe8] ss:$16 sps:$4 sm:$0xff]   ;;  %v3565_v62 = vld [vmem:[%s5127_s4 + $0xcc] ss:$16 sps:$4 sm:$0xff]   ;;  %v3566_v5 = vld [vmem:[%s5127_s4 + $0xa0] ss:$16 sps:$4 sm:$0xff]  }
  0x2f   : > { %v3563_v63 = vld [vmem:[%s5127_s4 + $0xc8] ss:$16 sps:$4 sm:$0xff]   ;;  %v3574_v6 = vld [vmem:[%s5127_s4 + $0x84] ss:$16 sps:$4 sm:$0xff]   ;;  %v3577_v7 = vld [vmem:[%s5127_s4 + $0x8c] ss:$16 sps:$4 sm:$0xff]  }
  0x30   : > { %3122 = vmatmul.mubr.msk.bf16.gmra.mxu0 %vm483_vm3, %v391_v34  ;;  %v382_v34 = vld [vmem:[%s3870_s24 + $0xc8] sm:$0xff]  ;;  %v3578_v12 = vld [vmem:[%s5127_s4 + $0x60] ss:$16 sps:$4 sm:$0xff]   ;;  %v3586_v13 = vld [vmem:[%s5127_s4 + $0x44] ss:$16 sps:$4 sm:$0xff]  }
  0x31   : > { %603 = vmatprep.mubr.bf16.mxu0 %v3744_v2  ;;  %v401_v36 = vpack.c.bf16 %v382_v34, %v381_v32  ;;  %v3569_v4 = vld [vmem:[%s5127_s4 + $0xa8] ss:$16 sps:$4 sm:$0xff]   ;;  %v3583_v10 = vld [vmem:[%s5127_s4 + $0x6c] ss:$16 sps:$4 sm:$0xff]   ;;  %v3584_v16 = vld [vmem:[%s5127_s4 + $0x40] ss:$16 sps:$4 sm:$0xff]  }
  0x32   : > { %v3581_v11 = vld [vmem:[%s5127_s4 + $0x68] ss:$16 sps:$4 sm:$0xff]   ;;  %v3595_v17 = vld [vmem:[%s5127_s4 + $0x2c] ss:$16 sps:$4 sm:$0xff]   ;;  %v3590_v19 = vld [vmem:[%s5127_s4 + $0x20] ss:$16 sps:$4 sm:$0xff]  }
  0x33   : > { %v3593_v18 = vld [vmem:[%s5127_s4 + $0x28] ss:$16 sps:$4 sm:$0xff]   ;;  %v3596_v24 = vld [vmem:[%s5127_s4] ss:$16 sps:$4 sm:$0xff]   ;;  %v3607_v25 = vld [vmem:[%s5127_s4 + $0x1ec] ss:$16 sps:$4 sm:$0xff]  }
  0x34   : > { %v3599_v23 = vld [vmem:[%s5127_s4 + $0x8] ss:$16 sps:$4 sm:$0xff]   ;;  %v3613_v30 = vld [vmem:[%s5127_s4 + $0x1cc] ss:$16 sps:$4 sm:$0xff]   ;;  %v3608_v32 = vld [vmem:[%s5127_s4 + $0x1c0] ss:$16 sps:$4 sm:$0xff]  }
  0x35   : > { %3144 = vmatmul.mubr.msk.bf16.gmra.mxu1 %vm906_vm2, %v3923_v41  ;;  %v3605_v26 = vld [vmem:[%s5127_s4 + $0x1e8] ss:$16 sps:$4 sm:$0xff]   ;;  %v3619_v34 = vld [vmem:[%s5127_s4 + $0x1ac] ss:$16 sps:$4 sm:$0xff]   ;;  %v3620_v40 = vld [vmem:[%s5127_s4 + $0x180] ss:$16 sps:$4 sm:$0xff]  }
  0x36   : > { %1040 = vmatprep.mubr.bf16.mxu1 %v3744_v2  ;;  %v3611_v31 = vld [vmem:[%s5127_s4 + $0x1c8] ss:$16 sps:$4 sm:$0xff]   ;;  %v3626_v44 = vld [vmem:[%s5127_s4 + $0x160] ss:$16 sps:$4 sm:$0xff]   ;;  %v3634_v45 = vld [vmem:[%s5127_s4 + $0x144] ss:$16 sps:$4 sm:$0xff]  }
  0x37   : > { %v3623_v39 = vld [vmem:[%s5127_s4 + $0x188] ss:$16 sps:$4 sm:$0xff]   ;;  %v3638_v52 = vld [vmem:[%s5127_s4 + $0x120] ss:$16 sps:$4 sm:$0xff]  }
  0x38   : > { %3123 = vmatmul.mubr.msk.bf16.gmra.mxu0 %vm483_vm3, %v392_v42  ;;  %v4033_v42 = vpack.c.bf16 %v432_v38, %v431_v37  ;;  %v3622_v37 = vld [vmem:[%s5127_s4 + $0x184] ss:$16 sps:$4 sm:$0xff]   ;;  %v3625_v38 = vld [vmem:[%s5127_s4 + $0x18c] ss:$16 sps:$4 sm:$0xff]   ;;  %v3641_v51 = vld [vmem:[%s5127_s4 + $0x128] ss:$16 sps:$4 sm:$0xff]  }
  0x39   : > { %613 = vmatprep.mubr.bf16.mxu0 %v3744_v2 }
  0x3d   : > { %3145 = vmatmul.mubr.msk.bf16.gmra.mxu1 %vm906_vm2, %v3934_v47 }
  0x3e   : > { %1050 = vmatprep.mubr.bf16.mxu1 %v3744_v2 }
  0x40   : > { %3124 = vmatmul.mubr.msk.bf16.gmra.mxu0 %vm483_vm3, %v393_v48  ;;  %v386_v48 = vld [vmem:[%s3870_s24 + $0xe8] sm:$0xff] }
  0x41   : > { %623 = vmatprep.mubr.bf16.mxu0 %v3744_v2  ;;  %v403_v50 = vpack.c.bf16 %v386_v48, %v385_v46  ;;  %v3637_v46 = vld [vmem:[%s5127_s4 + $0x14c] ss:$16 sps:$4 sm:$0xff]   ;;  %v3635_v48 = vld [vmem:[%s5127_s4 + $0x148] ss:$16 sps:$4 sm:$0xff]  }
  0x45   : > { %3146 = vmatmul.mubr.msk.bf16.gmra.mxu1 %vm906_vm2, %v3945_v53 }
  0x46   : > { %1060 = vmatprep.mubr.bf16.mxu1 %v3744_v2 }
  0x48   : > { %3125 = vmatmul.mubr.msk.bf16.gmra.mxu0 %vm483_vm3, %v394_v54  ;;  %v387_v54 = vld [vmem:[%s3870_s24 + $0xf0] sm:$0xff]  ;;  %s5007_s24 = scalar_lea.vmem [#allocation2], %s3111_s22 }
  0x49   : > { %633 = vmatprep.mubr.bf16.mxu0 %v3744_v2  ;;  %v404_v57 = vpack.c.bf16 %v388_v55, %v387_v54  ;;  %v458_v54 = vlaneseq  ;;  %v3646_v55 = vld [vmem:[%s5127_s4 + $0x104] ss:$16 sps:$4 sm:$0xff]   ;;  %s3033_s26 = sshll.u32 %s5007_s24, 4  ;;  %s5078_s26 = int_to_ptr.vmem [resolvable:$true] %s3033_s26 }
  0x4a   : > { %s3682_s13 = scalar_lea.vmem %s5078_s26, 4096  ;;  %p3689_p0 = scmp.lt.s32.totalorder %s5078_s26, %s3687_s17 }
  0x4b   : > { %p3683_p11 = scmp.ne.s32.totalorder %s5078_s26, %s3682_s13  ;;  %p3690_p1 = scmp.lt.s32.totalorder %s3688_s21, %s3682_s13 }
  0x4d   : > { %3147 = vmatmul.mubr.msk.bf16.gmra.mxu1 %vm906_vm2, %v3956_v59  ;;  %p3684_p12 = pnand %p3683_p11, %p3836_p5  ;;  %p3691_p2 = por %p3690_p1, %p3689_p0 }
  0x4e   : > { %1070 = vmatprep.mubr.bf16.mxu1 %v3744_v2 }
  0x4f   : > { %p3685_p13 = pneg %p3684_p12 }
  0x50   : > { %3126 = vmatmul.mubr.msk.bf16.gmra.mxu0 %vm483_vm3, %v395_v60  ;;  %v3554_v60 = vld [vmem:[%s5127_s4 + $0xe0] ss:$16 sps:$4 sm:$0xff]  }
  0x51   : > { %643 = vmatprep.mubr.bf16.mxu0 %v3744_v2  ;;  %p3692_p3 = pnand %p3691_p2, %p3685_p13 }
  0x55   : > { %3148 = vmatmul.mubr.msk.bf16.gmra.mxu1 %vm906_vm2, %v3967_v1 }
  0x56   : > { %1080 = vmatprep.mubr.bf16.mxu1 %v3744_v2 }
  0x58   : > { %3127 = vmatmul.mubr.msk.bf16.gmra.mxu0 %vm483_vm3, %v396_v3  ;;  %v3571_v3 = vld [vmem:[%s5127_s4 + $0xac] ss:$16 sps:$4 sm:$0xff]  }
  0x59   : > { %653 = vmatprep.mubr.bf16.mxu0 %v3744_v2 }
  0x5d   : > { %3149 = vmatmul.mubr.msk.bf16.gmra.mxu1 %vm906_vm2, %v3978_v8 }
  0x5e   : > { %1090 = vmatprep.mubr.bf16.mxu1 %v3744_v2 }
  0x60   : > { %3128 = vmatmul.mubr.msk.bf16.gmra.mxu0 %vm483_vm3, %v397_v9  ;;  %v3572_v9 = vld [vmem:[%s5127_s4 + $0x80] ss:$16 sps:$4 sm:$0xff]  }
  0x61   : > { %663 = vmatprep.mubr.bf16.mxu0 %v3744_v2 }
  0x65   : > { %3150 = vmatmul.mubr.msk.bf16.gmra.mxu1 %vm906_vm2, %v3989_v14 }
  0x66   : > { %1100 = vmatprep.mubr.bf16.mxu1 %v3744_v2 }
  0x68   : > { %3129 = vmatmul.mubr.msk.bf16.gmra.mxu0 %vm483_vm3, %v398_v15  ;;  %v3587_v15 = vld [vmem:[%s5127_s4 + $0x48] ss:$16 sps:$4 sm:$0xff]  }
  0x69   : > { %673 = vmatprep.mubr.bf16.mxu0 %v3744_v2 }
  0x6d   : > { %3151 = vmatmul.mubr.msk.bf16.gmra.mxu1 %vm906_vm2, %v4000_v20 }
  0x6e   : > { %1110 = vmatprep.mubr.bf16.mxu1 %v3744_v2 }
  0x70   : > { %3130 = vmatmul.mubr.msk.bf16.gmra.mxu0 %vm483_vm3, %v399_v22  ;;  %v3601_v22 = vld [vmem:[%s5127_s4 + $0xc] ss:$16 sps:$4 sm:$0xff]  }
  0x71   : > { %683 = vmatprep.mubr.bf16.mxu0 %v3744_v2 }
  0x75   : > { %3152 = vmatmul.mubr.msk.bf16.gmra.mxu1 %vm906_vm2, %v4011_v28 }
  0x76   : > { %1120 = vmatprep.mubr.bf16.mxu1 %v3744_v2 }
  0x78   : > { %3131 = vmatmul.mubr.msk.bf16.gmra.mxu0 %vm483_vm3, %v400_v29  ;;  %v3610_v29 = vld [vmem:[%s5127_s4 + $0x1c4] ss:$16 sps:$4 sm:$0xff]  }
  0x79   : > { %693 = vmatprep.mubr.bf16.mxu0 %v3744_v2 }
  0x7d   : > { %3153 = vmatmul.mubr.msk.bf16.gmra.mxu1 %vm906_vm2, %v4022_v35 }
  0x7e   : > { %1130 = vmatprep.mubr.bf16.mxu1 %v3744_v2 }
  0x80   : > { %3132 = vmatmul.mubr.msk.bf16.gmra.mxu0 %vm483_vm3, %v401_v36  ;;  %v3614_v36 = vld [vmem:[%s5127_s4 + $0x1a0] ss:$16 sps:$4 sm:$0xff]  }
  0x81   : > { %703 = vmatprep.mubr.bf16.mxu0 %v3744_v2 }
  0x85   : > { %3154 = vmatmul.mubr.msk.bf16.gmra.mxu1 %vm906_vm2, %v4033_v42 }
  0x86   : > { %1140 = vmatprep.mubr.bf16.mxu1 %v3744_v2 }
  0x88   : > { %3133 = vmatmul.mubr.msk.bf16.gmra.mxu0 %vm483_vm3, %v402_v43  ;;  %v3629_v43 = vld [vmem:[%s5127_s4 + $0x168] ss:$16 sps:$4 sm:$0xff]  }
  0x89   : > { %713 = vmatprep.mubr.bf16.mxu0 %v3744_v2 }
  0x8d   : > { %3155 = vmatmul.mubr.msk.bf16.gmra.mxu1 %vm906_vm2, %v4044_v49 }
  0x8e   : > { %1150 = vmatprep.mubr.bf16.mxu1 %v3744_v2 }
  0x90   : > { %3134 = vmatmul.mubr.msk.bf16.gmra.mxu0 %vm483_vm3, %v403_v50  ;;  %v3632_v50 = vld [vmem:[%s5127_s4 + $0x140] ss:$16 sps:$4 sm:$0xff]  }
  0x91   : > { %723 = vmatprep.mubr.bf16.mxu0 %v3744_v2 }
  0x95   : > { %3156 = vmatmul.mubr.msk.bf16.gmra.mxu1 %vm906_vm2, %v4055_v56 }
  0x96   : > { %1273 = vmatprep.mubr.bf16.mxu1 %v3744_v2 }
  0x98   : > { %3135 = vmatmul.mubr.msk.bf16.gmra.mxu0 %vm483_vm3, %v404_v57  ;;  %v3647_v57 = vld [vmem:[%s5127_s4 + $0x108] ss:$16 sps:$4 sm:$0xff]  }
  0x99   : > { %1193 = vmatprep.mubr.bf16.mxu0 %v3744_v2 }
  0x9d   : > { %3166 = vmatmul.mubr.msk.bf16.vlgmr.msra.gmra.mxu1 %vm906_vm2, %v3978_v8  ;;  %v3575_v8 = vld [vmem:[%s5127_s4 + $0x88] ss:$16 sps:$4 sm:$0xff]  }
  0x9e   : > { %1868 = vmatpush1.bf16.msra.mxu1 %v3557_v58  ;;  %1283 = vmatprep.mubr.bf16.mxu1 %v3744_v2  ;;  %v3644_v58 = vld [vmem:[%s5127_s4 + $0x100] ss:$16 sps:$4 sm:$0xff]  }
  0x9f   : > { %1869 = vmatprep.subr.bf16.mxu1 %v3565_v62 }
  0xa0   : > { %3158 = vmatmul.mubr.msk.bf16.vlgmr.msra.gmra.mxu0 %vm906_vm2, %v3882_v21  ;;  %v3568_v21 = vld [vmem:[%s5127_s4 + $0xa4] ss:$16 sps:$4 sm:$0xff]  }
  0xa1   : > { %1675 = vmatpush1.bf16.msra.mxu0 %v3554_v60  ;;  %1203 = vmatprep.mubr.bf16.mxu0 %v3744_v2  ;;  %v3652_v60 = vld [vmem:[%s5130_s7 + $0xf8] sm:$0xff]  }
  0xa2   : > { %1676 = vmatprep.subr.bf16.mxu0 %v3562_v61  ;;  %1870 = vmatpush1.bf16.msra.mxu1 %v3563_v63  ;;  %v4297_v61 = vshrl.u32 %v458_v54, 7  ;;  %v456_v63 = vld [vmem:[%s5126_s3] sm:$0x3] }
  0xa3   : > { %1871 = vmatprep.subr.bf16.mxu1 %v3571_v3  ;;  %v3662_v54 = vld [vmem:[%s5130_s7 + $0x60] sm:$0xff]  }
  0xa4   : > { %v5134_v62 = vsub.s32 0, %v4297_v61 }
  0xa5   : > { %1677 = vmatpush1.bf16.msra.mxu0 %v3560_v0  ;;  %3167 = vmatmul.mubr.msk.bf16.gmra.mxu1 %vm906_vm2, %v3989_v14  ;;  %v3589_v14 = vld [vmem:[%s5127_s4 + $0x4c] ss:$16 sps:$4 sm:$0xff]  }
  0xa6   : > { %1678 = vmatprep.subr.bf16.mxu0 %v3568_v21  ;;  %1872 = vmatpush1.bf16.msra.mxu1 %v3569_v4 }
  0xa7   : > { %1293 = vmatprep.mubr.bf16.mxu1 %v3744_v2  ;;  %1873 = vmatprep.subr.bf16.mxu1 %v3577_v7 }
  0xa8   : > { %3159 = vmatmul.mubr.msk.bf16.gmra.mxu0 %vm906_vm2, %v3895_v27  ;;  %v3580_v27 = vld [vmem:[%s5127_s4 + $0x64] ss:$16 sps:$4 sm:$0xff]  }
  0xa9   : > { %1679 = vmatpush1.bf16.msra.mxu0 %v3566_v5  ;;  %1213 = vmatprep.mubr.bf16.mxu0 %v3744_v2  ;;  %v4317_v5 = vrot.slane %v456_v63, %v5134_v62 }
  0xaa   : > { %1680 = vmatprep.subr.bf16.mxu0 %v3574_v6  ;;  %1874 = vmatpush1.bf16.msra.mxu1 %v3575_v8 }
  0xab   : > { %1875 = vmatprep.subr.bf16.mxu1 %v3583_v10 }
  0xad   : > { %1681 = vmatpush1.bf16.msra.mxu0 %v3572_v9  ;;  %3168 = vmatmul.mubr.msk.bf16.gmra.mxu1 %vm906_vm2, %v4000_v20  ;;  %v3598_v20 = vld [vmem:[%s5127_s4 + $0x4] ss:$16 sps:$4 sm:$0xff]  }
  0xae   : > { %1682 = vmatprep.subr.bf16.mxu0 %v3580_v27  ;;  %1876 = vmatpush1.bf16.msra.mxu1 %v3581_v11 }
  0xaf   : > { %1303 = vmatprep.mubr.bf16.mxu1 %v3744_v2  ;;  %1877 = vmatprep.subr.bf16.mxu1 %v3589_v14 }
  0xb0   : > { %3160 = vmatmul.mubr.msk.bf16.gmra.mxu0 %vm906_vm2, %v3906_v33  ;;  %v3592_v33 = vld [vmem:[%s5127_s4 + $0x24] ss:$16 sps:$4 sm:$0xff]  }
  0xb1   : > { %1683 = vmatpush1.bf16.msra.mxu0 %v3578_v12  ;;  %1223 = vmatprep.mubr.bf16.mxu0 %v3744_v2 }
  0xb2   : > { %1684 = vmatprep.subr.bf16.mxu0 %v3586_v13  ;;  %1878 = vmatpush1.bf16.msra.mxu1 %v3587_v15 }
  0xb3   : > { %1879 = vmatprep.subr.bf16.mxu1 %v3595_v17 }
  0xb5   : > { %1685 = vmatpush1.bf16.msra.mxu0 %v3584_v16  ;;  %3169 = vmatmul.mubr.msk.bf16.gmra.mxu1 %vm906_vm2, %v4011_v28  ;;  %v3602_v28 = vld [vmem:[%s5127_s4 + $0x1e0] ss:$16 sps:$4 sm:$0xff]  }
  0xb6   : > { %1686 = vmatprep.subr.bf16.mxu0 %v3592_v33  ;;  %1880 = vmatpush1.bf16.msra.mxu1 %v3593_v18 }
  0xb7   : > { %1313 = vmatprep.mubr.bf16.mxu1 %v3744_v2  ;;  %1881 = vmatprep.subr.bf16.mxu1 %v3601_v22 }
  0xb8   : > { %3161 = vmatmul.mubr.msk.bf16.gmra.mxu0 %vm906_vm2, %v3923_v41  ;;  %v3604_v41 = vld [vmem:[%s5127_s4 + $0x1e4] ss:$16 sps:$4 sm:$0xff]  }
  0xb9   : > { %1687 = vmatpush1.bf16.msra.mxu0 %v3590_v19  ;;  %1233 = vmatprep.mubr.bf16.mxu0 %v3744_v2 }
  0xba   : > { %1688 = vmatprep.subr.bf16.mxu0 %v3598_v20  ;;  %1882 = vmatpush1.bf16.msra.mxu1 %v3599_v23 }
  0xbb   : > { %1883 = vmatprep.subr.bf16.mxu1 %v3607_v25  ;;  %v3653_v25 = vld [vmem:[%s5130_s7 + $0xb8] sm:$0xff]  }
  0xbd   : > { %1689 = vmatpush1.bf16.msra.mxu0 %v3596_v24  ;;  %3170 = vmatmul.mubr.msk.bf16.gmra.mxu1 %vm906_vm2, %v4022_v35  ;;  %v3617_v35 = vld [vmem:[%s5127_s4 + $0x1a8] ss:$16 sps:$4 sm:$0xff]  }
  0xbe   : > { %1690 = vmatprep.subr.bf16.mxu0 %v3604_v41  ;;  %1884 = vmatpush2.bf16.msra.mxu1 %v3605_v26  ;;  %v3651_v24 = vld [vmem:[%s5130_s7 + $0x38] sm:$0xff]  }
  0xbf   : > { %1323 = vmatprep.mubr.bf16.mxu1 %v3744_v2  ;;  %1885 = vmatprep.subr.bf16.mxu1 %v3613_v30 }
  0xc0   : > { %3162 = vmatmul.mubr.msk.bf16.gmra.mxu0 %vm906_vm2, %v3934_v47  ;;  %v3616_v47 = vld [vmem:[%s5127_s4 + $0x1a4] ss:$16 sps:$4 sm:$0xff]  }
  0xc1   : > { %1691 = vmatpush2.bf16.msra.mxu0 %v3602_v28  ;;  %1243 = vmatprep.mubr.bf16.mxu0 %v3744_v2  ;;  %v3654_v28 = vld [vmem:[%s5130_s7 + $0x70] sm:$0xff]  }
  0xc2   : > { %1692 = vmatprep.subr.bf16.mxu0 %v3610_v29  ;;  %1886 = vmatpush2.bf16.msra.mxu1 %v3611_v31  ;;  %v3656_v29 = vld [vmem:[%s5130_s7 + $0xf0] sm:$0xff]  }
  0xc3   : > { %1887 = vmatprep.subr.bf16.mxu1 %v3619_v34 }
  0xc5   : > { %1693 = vmatpush2.bf16.msra.mxu0 %v3608_v32  ;;  %3171 = vmatmul.mubr.msk.bf16.gmra.mxu1 %vm906_vm2, %v4033_v42  ;;  %v3631_v42 = vld [vmem:[%s5127_s4 + $0x16c] ss:$16 sps:$4 sm:$0xff]  }
  0xc6   : > { %1694 = vmatprep.subr.bf16.mxu0 %v3616_v47  ;;  %1888 = vmatpush2.bf16.msra.mxu1 %v3617_v35 }
  0xc7   : > { %1333 = vmatprep.mubr.bf16.mxu1 %v3744_v2  ;;  %1889 = vmatprep.subr.bf16.mxu1 %v3625_v38  ;;  %v3657_v38 = vld [vmem:[%s5130_s7 + $0xb0] sm:$0xff]  }
  0xc8   : > { %3163 = vmatmul.mubr.msk.bf16.gmra.mxu0 %vm906_vm2, %v3945_v53  ;;  %v3628_v53 = vld [vmem:[%s5127_s4 + $0x164] ss:$16 sps:$4 sm:$0xff]  }
  0xc9   : > { %1695 = vmatpush2.bf16.msra.mxu0 %v3614_v36  ;;  %1253 = vmatprep.mubr.bf16.mxu0 %v3744_v2 }
  0xca   : > { %1696 = vmatprep.subr.bf16.mxu0 %v3622_v37  ;;  %1890 = vmatpush2.bf16.msra.mxu1 %v3623_v39  ;;  %v3655_v37 = vld [vmem:[%s5130_s7 + $0x30] sm:$0xff]  }
  0xcb   : > { %1891 = vmatprep.subr.bf16.mxu1 %v3631_v42  ;;  %v3658_v42 = vld [vmem:[%s5130_s7 + $0x68] sm:$0xff]  }
  0xcd   : > { %1697 = vmatpush2.bf16.msra.mxu0 %v3620_v40  ;;  %3172 = vmatmul.mubr.msk.bf16.gmra.mxu1 %vm906_vm2, %v4044_v49  ;;  %v3643_v49 = vld [vmem:[%s5127_s4 + $0x12c] ss:$16 sps:$4 sm:$0xff]  }
  0xce   : > { %1698 = vmatprep.subr.bf16.mxu0 %v3628_v53  ;;  %1892 = vmatpush2.bf16.msra.mxu1 %v3629_v43  ;;  %v3660_v53 = vld [vmem:[%s5130_s7 + $0xe8] sm:$0xff]  }
  0xcf   : > { %1343 = vmatprep.mubr.bf16.mxu1 %v3744_v2  ;;  %1893 = vmatprep.subr.bf16.mxu1 %v3637_v46 }
  0xd0   : > { %3164 = vmatmul.mubr.msk.bf16.gmra.mxu0 %vm906_vm2, %v3956_v59  ;;  %v3640_v59 = vld [vmem:[%s5127_s4 + $0x124] ss:$16 sps:$4 sm:$0xff]  }
  0xd1   : > { %1699 = vmatpush2.bf16.msra.mxu0 %v3626_v44  ;;  %1263 = vmatprep.mubr.bf16.mxu0 %v3744_v2  ;;  %v3649_v2 = vld [vmem:[%s5127_s4 + $0x10c] ss:$16 sps:$4 sm:$0xff]  }
  0xd2   : > { %1700 = vmatprep.subr.bf16.mxu0 %v3634_v45  ;;  %1894 = vmatpush2.bf16.msra.mxu1 %v3635_v48 }
  0xd3   : > { %1895 = vmatprep.subr.bf16.mxu1 %v3643_v49 }
  0xd5   : > { %1701 = vmatpush2.bf16.msra.mxu0 %v3632_v50  ;;  %3173 = vmatmul.mubr.msk.bf16.gmra.mxu1 %vm906_vm2, %v4055_v56  ;;  %v5133_v56 = vsub.s32 1, %v4297_v61 }
  0xd6   : > { %1702 = vmatprep.subr.bf16.mxu0 %v3640_v59  ;;  %1896 = vmatpush2.bf16.msra.mxu1 %v3641_v51  ;;  %v3659_v59 = vld [vmem:[%s5130_s7 + $0x28] sm:$0xff]  }
  0xd7   : > { %1897 = vmatprep.subr.bf16.mxu1 %v3649_v2  ;;  %v4311_v21 = vrot.slane %v456_v63, %v5133_v56  ;;  %v3661_v51 = vld [vmem:[%s5130_s7 + $0xa8] sm:$0xff]  }
  0xd8   : > { %3165 = vmatmul.mubr.msk.bf16.gmra.mxu0 %vm906_vm2, %v3967_v1  ;;  %v3650_v1 = vld [vmem:[%s5130_s7 + $0x78] sm:$0xff]  }
  0xd9   : > { %1703 = vmatpush2.bf16.msra.mxu0 %v3638_v52 }
  0xda   : > { %1704 = vmatprep.subr.bf16.mxu0 %v3646_v55  ;;  %1898 = vmatpush2.bf16.msra.mxu1 %v3647_v57  ;;  %v3664_v55 = vld [vmem:[%s5130_s7 + $0xe0] sm:$0xff]  }
  0xdb   : > { %3389 = vmatprep.subr.bf16.mxu1 %v3652_v60 }
  0xdd   : > { %1705 = vmatpush2.bf16.msra.mxu0 %v3644_v58  ;;  %v4307_v0 = vpop.f32.mrf.mxu1 }
  0xde   : > { %3277 = vmatprep.subr.bf16.mxu0 %v3650_v1 }
  0xdf   : > { %v4313_v4 = vpop.f32.mrf.mxu1 }
  0xe0   : > { %v575_v3 = vpop.f32.mrf.mxu0 }
  0xe1   : > { %v4319_v7 = vpop.f32.mrf.mxu1  ;;  %v576_v11 = vadd.f32 %v575_v3, %v4317_v5 }
  0xe2   : > { %v577_v6 = vpop.f32.mrf.mxu0 }
  0xe3   : > { %v578_v9 = vadd.f32 %v577_v6, %v4311_v21  ;;  %v4323_v27 = vpop.f32.mrf.mxu1  ;;  %v734_v19 = vmax.f32 %v576_v11, 0.0 }
  0xe4   : > { %v579_v8 = vpop.f32.mrf.mxu0 }
  0xe5   : > { %v580_v10 = vadd.f32 %v579_v8, %v4317_v5  ;;  %v4327_v14 = vpop.f32.mrf.mxu1  ;;  %v735_v17 = vmax.f32 %v578_v9, 0.0  ;;  %v3663_v8 = vld [vmem:[%s5130_s7 + $0x20] sm:$0xff]  }
  0xe6   : > { %v581_v12 = vpop.f32.mrf.mxu0  ;;  %v3665_v9 = vld [vmem:[%s5130_s7 + $0xa0] sm:$0xff]  }
  0xe7   : > { %v582_v13 = vadd.f32 %v581_v12, %v4311_v21  ;;  %v736_v15 = vmax.f32 %v580_v10, 0.0  ;;  %v4329_v18 = vpop.f32.mrf.mxu1  ;;  %v3666_v12 = vld [vmem:[%s5130_s7 + $0x58] sm:$0xff]  }
  0xe8   : > { %v585_v16 = vpop.f32.mrf.mxu0 }
  0xe9   : > { %v737_v33 = vmax.f32 %v582_v13, 0.0  ;;  %v4331_v23 = vpop.f32.mrf.mxu1  ;;  %v798_v41 = vpack.c.bf16 %v736_v15, %v734_v19  ;;  %v586_v34 = vadd.f32 %v585_v16, %v4317_v5  ;;  %v3668_v13 = vld [vmem:[%s5130_s7 + $0xd8] sm:$0xff]  }
  0xea   : > { %v587_v20 = vpop.f32.mrf.mxu0 }
  0xeb   : > { %v799_v22 = vpack.c.bf16 %v737_v33, %v735_v17  ;;  %v588_v30 = vadd.f32 %v587_v20, %v4311_v21  ;;  %v4347_v32 = vpop.f32.mrf.mxu1  ;;  %v738_v46 = vmax.f32 %v586_v34, 0.0 }
  0xec   : > { %v589_v26 = vpop.f32.mrf.mxu0 }
  0xed   : > { %v590_v31 = vadd.f32 %v589_v26, %v4317_v5  ;;  %1706 = vmatprep.mubr.bf16.mxu0 %v799_v22  ;;  %1899 = vmatprep.mubr.bf16.mxu1 %v799_v22  ;;  %v4351_v36 = vpop.f32.mrf.mxu1  ;;  %v739_v43 = vmax.f32 %v588_v30, 0.0 }
  0xee   : > { %v591_v47 = vpop.f32.mrf.mxu0  ;;  %1707 = vmatmul.mubr.bf16.vlgmr.msra.gmra.mxu0 %v798_v41  ;;  %1900 = vmatmul.mubr.bf16.vlgmr.msra.gmra.mxu1 %v798_v41 }
  0xef   : > { %v592_v35 = vadd.f32 %v591_v47, %v4311_v21  ;;  %3278 = vmatpush3.bf16.msra.mxu0 %v3651_v24  ;;  %3390 = vmatpush3.bf16.msra.mxu1 %v3653_v25  ;;  %v740_v39 = vmax.f32 %v590_v31, 0.0  ;;  %v4365_v45 = vpop.f32.mrf.mxu1  ;;  %v3667_v24 = vld [vmem:[%s5130_s7 + $0x18] sm:$0xff]  }
  0xf0   : > { %v595_v40 = vpop.f32.mrf.mxu0  ;;  %3279 = vmatprep.subr.bf16.mxu0 %v3654_v28  ;;  %3391 = vmatprep.subr.bf16.mxu1 %v3656_v29  ;;  %v3669_v25 = vld [vmem:[%s5130_s7 + $0x98] sm:$0xff]  }
  0xf1   : > { %v741_v44 = vmax.f32 %v592_v35, 0.0  ;;  %v4367_v49 = vpop.f32.mrf.mxu1  ;;  %v800_v52 = vpack.c.bf16 %v740_v39, %v738_v46  ;;  %v596_v1 = vadd.f32 %v595_v40, %v4317_v5 }
  0xf2   : > { %v597_v48 = vpop.f32.mrf.mxu0 }
  0xf3   : > { %v801_v50 = vpack.c.bf16 %v741_v44, %v739_v43  ;;  %3280 = vmatpush3.bf16.msra.mxu0 %v3655_v37  ;;  %3392 = vmatpush3.bf16.msra.mxu1 %v3657_v38  ;;  %v598_v57 = vadd.f32 %v597_v48, %v4311_v21  ;;  %v4383_v60 = vpop.f32.mrf.mxu1  ;;  %v742_v33 = vmax.f32 %v596_v1, 0.0 }
  0xf4   : > { %v599_v2 = vpop.f32.mrf.mxu0  ;;  %3281 = vmatprep.subr.bf16.mxu0 %v3658_v42  ;;  %3393 = vmatprep.subr.bf16.mxu1 %v3660_v53 }
  0xf5   : > { %v600_v58 = vadd.f32 %v599_v2, %v4317_v5  ;;  %1716 = vmatprep.mubr.bf16.mxu0 %v801_v50  ;;  %1909 = vmatprep.mubr.bf16.mxu1 %v801_v50  ;;  %v4387_v6 = vpop.f32.mrf.mxu1  ;;  %v743_v15 = vmax.f32 %v598_v57, 0.0  ;;  %v3671_v57 = vld [vmem:[%s5130_s7 + $0x10] sm:$0xff]  }
  0xf6   : > { %v601_v63 = vpop.f32.mrf.mxu0  ;;  %1717 = vmatmul.mubr.bf16.gmra.mxu0 %v800_v52  ;;  %1910 = vmatmul.mubr.bf16.gmra.mxu1 %v800_v52 }
  0xf7   : > { %v602_v3 = vadd.f32 %v601_v63, %v4311_v21  ;;  %3282 = vmatpush3.bf16.msra.mxu0 %v3659_v59  ;;  %3394 = vmatpush3.bf16.msra.mxu1 %v3661_v51  ;;  %v744_v10 = vmax.f32 %v600_v58, 0.0  ;;  %v4401_v17 = vpop.f32.mrf.mxu1  ;;  %v3670_v59 = vld [vmem:[%s5130_s7 + $0x50] sm:$0xff]  }
  0xf8   : > { %v605_v11 = vpop.f32.mrf.mxu0  ;;  %3283 = vmatprep.subr.bf16.mxu0 %v3662_v54  ;;  %3395 = vmatprep.subr.bf16.mxu1 %v3664_v55  ;;  %v3672_v58 = vld [vmem:[%s5130_s7 + $0xd0] sm:$0xff]  }
  0xf9   : > { %v745_v16 = vmax.f32 %v602_v3, 0.0  ;;  %v4403_v22 = vpop.f32.mrf.mxu1  ;;  %v802_v41 = vpack.c.bf16 %v744_v10, %v742_v33  ;;  %v606_v31 = vadd.f32 %v605_v11, %v4317_v5 }
  0xfa   : > { %v607_v19 = vpop.f32.mrf.mxu0 }
  0xfb   : > { %v803_v20 = vpack.c.bf16 %v745_v16, %v743_v15  ;;  %3284 = vmatpush3.bf16.msra.mxu0 %v3663_v8  ;;  %3396 = vmatpush3.bf16.msra.mxu1 %v3665_v9  ;;  %v608_v28 = vadd.f32 %v607_v19, %v4311_v21  ;;  %v4413_v30 = vpop.f32.mrf.mxu1  ;;  %v746_v53 = vmax.f32 %v606_v31, 0.0  ;;  %v3673_v9 = vld [vmem:[%s5130_s7 + $0x90] sm:$0xff]  }
  0xfc   : > { %v609_v26 = vpop.f32.mrf.mxu0  ;;  %3285 = vmatprep.subr.bf16.mxu0 %v3666_v12  ;;  %3397 = vmatprep.subr.bf16.mxu1 %v3668_v13 }
  0xfd   : > { %v610_v29 = vadd.f32 %v609_v26, %v4317_v5  ;;  %1726 = vmatprep.mubr.bf16.mxu0 %v803_v20  ;;  %1919 = vmatprep.mubr.bf16.mxu1 %v803_v20  ;;  %v4417_v35 = vpop.f32.mrf.mxu1  ;;  %v747_v39 = vmax.f32 %v608_v28, 0.0 }
  0xfe   : > { %v611_v34 = vpop.f32.mrf.mxu0  ;;  %1727 = vmatmul.mubr.bf16.gmra.mxu0 %v802_v41  ;;  %1920 = vmatmul.mubr.bf16.gmra.mxu1 %v802_v41 }
  0xff   : > { %v612_v47 = vadd.f32 %v611_v34, %v4311_v21  ;;  %3286 = vmatpush3.bf16.msra.mxu0 %v3667_v24  ;;  %3398 = vmatpush3.bf16.msra.mxu1 %v3669_v25  ;;  %v748_v37 = vmax.f32 %v610_v29, 0.0  ;;  %v4419_v42 = vpop.f32.mrf.mxu1 }
 0x100   : > { %v615_v38 = vpop.f32.mrf.mxu0  ;;  %3287 = vmatprep.subr.bf16.mxu0 %v3670_v59  ;;  %3399 = vmatprep.subr.bf16.mxu1 %v3672_v58  ;;  %v3674_v59 = vld [vmem:[%s5130_s7 + $0x48] sm:$0xff]  }
 0x101   : > { %v749_v40 = vmax.f32 %v612_v47, 0.0  ;;  %v4421_v46 = vpop.f32.mrf.mxu1  ;;  %v804_v48 = vpack.c.bf16 %v748_v37, %v746_v53  ;;  %v616_v54 = vadd.f32 %v615_v38, %v4317_v5  ;;  %v3675_v58 = vld [vmem:[%s5130_s7 + $0x8] sm:$0xff]  }
 0x102   : > { %v617_v43 = vpop.f32.mrf.mxu0 }
 0x103   : > { %v805_v44 = vpack.c.bf16 %v749_v40, %v747_v39  ;;  %v618_v51 = vadd.f32 %v617_v43, %v4311_v21  ;;  %v4428_v2 = vpop.f32.mrf.mxu1  ;;  %3288 = vmatpush3.bf16.msra.mxu0 %v3671_v57  ;;  %v750_v13 = vmax.f32 %v616_v54, 0.0  ;;  %3400 = vmatpush3.bf16.msra.mxu1 %v3673_v9 }
 0x104   : > { %v619_v50 = vpop.f32.mrf.mxu0  ;;  %3289 = vmatprep.subr.bf16.mxu0 %v3674_v59 }
 0x105   : > { %v620_v52 = vadd.f32 %v619_v50, %v4317_v5  ;;  %1736 = vmatprep.mubr.bf16.mxu0 %v805_v44  ;;  %1929 = vmatprep.mubr.bf16.mxu1 %v805_v44  ;;  %v4438_v63 = vpop.f32.mrf.mxu1  ;;  %v751_v10 = vmax.f32 %v618_v51, 0.0 }
 0x106   : > { %v621_v55 = vpop.f32.mrf.mxu0  ;;  %1737 = vmatmul.mubr.bf16.gmra.mxu0 %v804_v48  ;;  %1930 = vmatmul.mubr.bf16.gmra.mxu1 %v804_v48 }
 0x107   : > { %v622_v1 = vadd.f32 %v621_v55, %v4311_v21  ;;  %v752_v3 = vmax.f32 %v620_v52, 0.0  ;;  %v4443_v12 = vpop.f32.mrf.mxu1  ;;  %3290 = vmatpush3.bf16.msra.mxu0 %v3675_v58 }
 0x108   : > { %v625_v8 = vpop.f32.mrf.mxu0 }
 0x109   : > { %v753_v11 = vmax.f32 %v622_v1, 0.0  ;;  %v4445_v33 = vpop.f32.mrf.mxu1  ;;  %v806_v19 = vpack.c.bf16 %v752_v3, %v750_v13  ;;  %v626_v26 = vadd.f32 %v625_v8, %v4317_v5  ;;  %v3676_v1 = vld [vmem:[%s5130_s7 + $0xc8] sm:$0xff]  }
 0x10a   : > { %v627_v15 = vpop.f32.mrf.mxu0  ;;  %5137 = vst [vmem:[#allocation5_spill] sm:$0xff] %v4445_v33  ;;  %3401 = vmatprep.subr.bf16.mxu1 %v3676_v1 }
 0x10b   : > { %v807_v16 = vpack.c.bf16 %v753_v11, %v751_v10  ;;  %v628_v24 = vadd.f32 %v627_v15, %v4311_v21  ;;  %v4449_v41 = vpop.f32.mrf.mxu1  ;;  %v754_v40 = vmax.f32 %v626_v26, 0.0  ;;  %v3677_v11 = vld [vmem:[%s5130_s7 + $0x88] sm:$0xff]  }
 0x10c   : > { %v629_v20 = vpop.f32.mrf.mxu0  ;;  %5138 = vst [vmem:[#allocation6_spill] sm:$0xff] %v4449_v41  ;;  %3402 = vmatpush3.bf16.msra.mxu1 %v3677_v11 }
 0x10d   : > { %v630_v25 = vadd.f32 %v629_v20, %v4317_v5  ;;  %1746 = vmatprep.mubr.bf16.mxu0 %v807_v16  ;;  %1939 = vmatprep.mubr.bf16.mxu1 %v807_v16  ;;  %v4453_v31 = vpop.f32.mrf.mxu1  ;;  %v755_v37 = vmax.f32 %v628_v24, 0.0 }
 0x10e   : > { %v631_v28 = vpop.f32.mrf.mxu0  ;;  %1747 = vmatmul.mubr.bf16.gmra.mxu0 %v806_v19  ;;  %1940 = vmatmul.mubr.bf16.gmra.mxu1 %v806_v19  ;;  %5139 = vst [vmem:[#allocation7_spill] sm:$0xff] %v4453_v31 }
 0x10f   : > { %v632_v29 = vadd.f32 %v631_v28, %v4311_v21  ;;  %v756_v34 = vmax.f32 %v630_v25, 0.0  ;;  %v4455_v39 = vpop.f32.mrf.mxu1 }
 0x110   : > { %v635_v47 = vpop.f32.mrf.mxu0  ;;  %5140 = vst [vmem:[#allocation8_spill] sm:$0xff] %v4455_v39 }
 0x111   : > { %v757_v38 = vmax.f32 %v632_v29, 0.0  ;;  %v4457_v44 = vpop.f32.mrf.mxu1  ;;  %v808_v48 = vpack.c.bf16 %v756_v34, %v754_v40  ;;  %v636_v55 = vadd.f32 %v635_v47, %v4317_v5  ;;  %v3678_v40 = vld [vmem:[%s5130_s7 + $0x40] sm:$0xff]  }
 0x112   : > { %v637_v53 = vpop.f32.mrf.mxu0  ;;  %5141 = vst [vmem:[#allocation9_spill] sm:$0xff] %v4457_v44  ;;  %3291 = vmatprep.subr.bf16.mxu0 %v3678_v40 }
 0x113   : > { %v809_v43 = vpack.c.bf16 %v757_v38, %v755_v37  ;;  %v638_v51 = vadd.f32 %v637_v53, %v4311_v21  ;;  %v4464_v54 = vpop.f32.mrf.mxu1  ;;  %v758_v19 = vmax.f32 %v636_v55, 0.0 }
 0x114   : > { %v639_v50 = vpop.f32.mrf.mxu0  ;;  %5142 = vst [vmem:[#allocation10_spill] sm:$0xff] %v4464_v54 }
 0x115   : > { %v640_v52 = vadd.f32 %v639_v50, %v4317_v5  ;;  %1756 = vmatprep.mubr.bf16.mxu0 %v809_v43  ;;  %1949 = vmatprep.mubr.bf16.mxu1 %v809_v43  ;;  %v4474_v8 = vpop.f32.mrf.mxu1  ;;  %v759_v13 = vmax.f32 %v638_v51, 0.0 }
 0x116   : > { %v641_v57 = vpop.f32.mrf.mxu0  ;;  %1757 = vmatmul.mubr.bf16.gmra.mxu0 %v808_v48  ;;  %1950 = vmatmul.mubr.bf16.gmra.mxu1 %v808_v48  ;;  %5143 = vst [vmem:[#allocation11_spill] sm:$0xff] %v4474_v8 }
 0x117   : > { %v642_v3 = vadd.f32 %v641_v57, %v4311_v21  ;;  %v760_v9 = vmax.f32 %v640_v52, 0.0  ;;  %v4479_v16 = vpop.f32.mrf.mxu1 }
 0x118   : > { %v645_v10 = vpop.f32.mrf.mxu0  ;;  %5144 = vst [vmem:[#allocation12_spill] sm:$0xff] %v4479_v16 }
 0x119   : > { %v761_v15 = vmax.f32 %v642_v3, 0.0  ;;  %v4481_v25 = vpop.f32.mrf.mxu1  ;;  %v810_v26 = vpack.c.bf16 %v760_v9, %v758_v19  ;;  %v646_v37 = vadd.f32 %v645_v10, %v4317_v5 }
 0x11a   : > { %v647_v20 = vpop.f32.mrf.mxu0  ;;  %5145 = vst [vmem:[#allocation13_spill] sm:$0xff] %v4481_v25 }
 0x11b   : > { %v811_v24 = vpack.c.bf16 %v761_v15, %v759_v13  ;;  %v648_v29 = vadd.f32 %v647_v20, %v4311_v21  ;;  %v4485_v47 = vpop.f32.mrf.mxu1  ;;  %v762_v55 = vmax.f32 %v646_v37, 0.0 }
 0x11c   : > { %v649_v28 = vpop.f32.mrf.mxu0  ;;  %5146 = vst [vmem:[#allocation14_spill] sm:$0xff] %v4485_v47 }
 0x11d   : > { %v650_v34 = vadd.f32 %v649_v28, %v4317_v5  ;;  %1766 = vmatprep.mubr.bf16.mxu0 %v811_v24  ;;  %1959 = vmatprep.mubr.bf16.mxu1 %v811_v24  ;;  %v4492_v43 = vpop.f32.mrf.mxu1  ;;  %v763_v59 = vmax.f32 %v648_v29, 0.0 }
 0x11e   : > { %v651_v38 = vpop.f32.mrf.mxu0  ;;  %1767 = vmatmul.mubr.bf16.gmra.mxu0 %v810_v26  ;;  %1960 = vmatmul.mubr.bf16.gmra.mxu1 %v810_v26  ;;  %5147 = vst [vmem:[#allocation15_spill] sm:$0xff] %v4492_v43 }
 0x11f   : > { %v652_v53 = vadd.f32 %v651_v38, %v4311_v21  ;;  %v764_v48 = vmax.f32 %v650_v34, 0.0  ;;  %v4494_v52 = vpop.f32.mrf.mxu1 }
 0x120   : > { %v655_v50 = vpop.f32.mrf.mxu0  ;;  %5148 = vst [vmem:[#allocation16_spill] sm:$0xff] %v4494_v52 }
 0x121   : > { %v765_v51 = vmax.f32 %v652_v53, 0.0  ;;  %v4496_v1 = vpop.f32.mrf.mxu1  ;;  %v812_v3 = vpack.c.bf16 %v764_v48, %v762_v55  ;;  %v656_v15 = vadd.f32 %v655_v50, %v4317_v5 }
 0x122   : > { %v657_v57 = vpop.f32.mrf.mxu0  ;;  %5149 = vst [vmem:[#allocation17_spill] sm:$0xff] %v4496_v1 }
 0x123   : > { %v813_v58 = vpack.c.bf16 %v765_v51, %v763_v59  ;;  %v658_v10 = vadd.f32 %v657_v57, %v4311_v21  ;;  %v4500_v13 = vpop.f32.mrf.mxu1  ;;  %v766_v38 = vmax.f32 %v656_v15, 0.0 }
 0x124   : > { %v659_v9 = vpop.f32.mrf.mxu0  ;;  %5150 = vst [vmem:[#allocation18_spill] sm:$0xff] %v4500_v13 }
 0x125   : > { %v660_v11 = vadd.f32 %v659_v9, %v4317_v5  ;;  %1776 = vmatprep.mubr.bf16.mxu0 %v813_v58  ;;  %1969 = vmatprep.mubr.bf16.mxu1 %v813_v58  ;;  %v4504_v24 = vpop.f32.mrf.mxu1  ;;  %v767_v29 = vmax.f32 %v658_v10, 0.0 }
 0x126   : > { %v661_v19 = vpop.f32.mrf.mxu0  ;;  %1777 = vmatmul.mubr.bf16.gmra.mxu0 %v812_v3  ;;  %1970 = vmatmul.mubr.bf16.gmra.mxu1 %v812_v3  ;;  %5151 = vst [vmem:[#allocation19_spill] sm:$0xff] %v4504_v24 }
 0x127   : > { %v662_v20 = vadd.f32 %v661_v19, %v4311_v21  ;;  %v768_v26 = vmax.f32 %v660_v11, 0.0  ;;  %v4506_v37 = vpop.f32.mrf.mxu1 }
 0x128   : > { %v665_v28 = vpop.f32.mrf.mxu0  ;;  %5152 = vst [vmem:[#allocation20_spill] sm:$0xff] %v4506_v37 }
 0x129   : > { %v769_v34 = vmax.f32 %v662_v20, 0.0  ;;  %v4508_v48 = vpop.f32.mrf.mxu1  ;;  %v814_v59 = vpack.c.bf16 %v768_v26, %v766_v38  ;;  %v666_v58 = vadd.f32 %v665_v28, %v4317_v5  ;;  %v3679_v28 = vld [vmem:[%s5130_s7] sm:$0xff]  }
 0x12a   : > { %v667_v40 = vpop.f32.mrf.mxu0  ;;  %5153 = vst [vmem:[#allocation21_spill] sm:$0xff] %v4508_v48  ;;  %3292 = vmatpush3.bf16.msra.mxu0 %v3679_v28 }
 0x12b   : > { %v815_v53 = vpack.c.bf16 %v769_v34, %v767_v29  ;;  %v668_v51 = vadd.f32 %v667_v40, %v4311_v21  ;;  %v4512_v57 = vpop.f32.mrf.mxu1  ;;  %v770_v29 = vmax.f32 %v666_v58, 0.0 }
 0x12c   : > { %v669_v50 = vpop.f32.mrf.mxu0  ;;  %5154 = vst [vmem:[#allocation22_spill] sm:$0xff] %v4512_v57 }
 0x12d   : > { %v670_v55 = vadd.f32 %v669_v50, %v4317_v5  ;;  %1786 = vmatprep.mubr.bf16.mxu0 %v815_v53  ;;  %1979 = vmatprep.mubr.bf16.mxu1 %v815_v53  ;;  %v4516_v10 = vpop.f32.mrf.mxu1  ;;  %v771_v19 = vmax.f32 %v668_v51, 0.0  ;;  %v3680_v53 = vld [vmem:[%s5130_s7 + $0xc0] sm:$0xff]  }
 0x12e   : > { %v671_v3 = vpop.f32.mrf.mxu0  ;;  %1787 = vmatmul.mubr.bf16.gmra.mxu0 %v814_v59  ;;  %1980 = vmatmul.mubr.bf16.gmra.mxu1 %v814_v59  ;;  %5155 = vst [vmem:[#allocation23_spill] sm:$0xff] %v4516_v10 }
 0x12f   : > { %v672_v9 = vadd.f32 %v671_v3, %v4311_v21  ;;  %v772_v11 = vmax.f32 %v670_v55, 0.0  ;;  %v4518_v26 = vpop.f32.mrf.mxu1  ;;  %v3681_v3 = vld [vmem:[%s5130_s7 + $0x80] sm:$0xff]   ;;  %3403 = vmatprep.subr.bf16.mxu1 %v3680_v53 }
 0x130   : > { %v675_v15 = vpop.f32.mrf.mxu0  ;;  %5156 = vst [vmem:[#allocation24_spill] sm:$0xff] %v4518_v26  ;;  %3404 = vmatpush3.bf16.msra.mxu1 %v3681_v3 }
 0x131   : > { %v773_v20 = vmax.f32 %v672_v9, 0.0  ;;  %v4520_v40 = vpop.f32.mrf.mxu1  ;;  %v816_v59 = vpack.c.bf16 %v772_v11, %v770_v29  ;;  %v676_v9 = vadd.f32 %v675_v15, %v4317_v5 }
 0x132   : > { %v677_v34 = vpop.f32.mrf.mxu0  ;;  %5157 = vst [vmem:[#allocation25_spill] sm:$0xff] %v4520_v40 }
 0x133   : > { %v817_v38 = vpack.c.bf16 %v773_v20, %v771_v19  ;;  %v678_v51 = vadd.f32 %v677_v34, %v4311_v21  ;;  %v4530_v58 = vpop.f32.mrf.mxu1  ;;  %v774_v62 = vmax.f32 %v676_v9, 0.0 }
 0x134   : > { %v679_v50 = vpop.f32.mrf.mxu0  ;;  %5158 = vst [vmem:[#allocation26_spill] sm:$0xff] %v4530_v58 }
 0x135   : > { %v680_v55 = vadd.f32 %v679_v50, %v4317_v5  ;;  %1796 = vmatprep.mubr.bf16.mxu0 %v817_v38  ;;  %1989 = vmatprep.mubr.bf16.mxu1 %v817_v38  ;;  %v4537_v20 = vpop.f32.mrf.mxu1  ;;  %v775_v38 = vmax.f32 %v678_v51, 0.0 }
 0x136   : > { %v681_v19 = vpop.f32.mrf.mxu0  ;;  %1797 = vmatmul.mubr.bf16.gmra.mxu0 %v816_v59  ;;  %1990 = vmatmul.mubr.bf16.gmra.mxu1 %v816_v59  ;;  %5159 = vst [vmem:[#allocation27_spill] sm:$0xff] %v4537_v20 }
 0x137   : > { %v682_v11 = vadd.f32 %v681_v19, %v4311_v21  ;;  %v776_v29 = vmax.f32 %v680_v55, 0.0  ;;  %v4539_v56 = vpop.f32.mrf.mxu1 }
 0x138   : > { %v685_v34 = vpop.f32.mrf.mxu0  ;;  %5160 = vst [vmem:[#allocation28_spill] sm:$0xff] %v4539_v56 }
 0x139   : > { %v777_v50 = vmax.f32 %v682_v11, 0.0  ;;  %v4541_v15 = vpop.f32.mrf.mxu1  ;;  %v818_v26 = vpack.c.bf16 %v776_v29, %v774_v62  ;;  %v686_v53 = vadd.f32 %v685_v34, %v4317_v5 }
 0x13a   : > { %v687_v58 = vpop.f32.mrf.mxu0  ;;  %5161 = vst [vmem:[#allocation29_spill] sm:$0xff] %v4541_v15 }
 0x13b   : > { %v819_v40 = vpack.c.bf16 %v777_v50, %v775_v38  ;;  %v688_v19 = vadd.f32 %v687_v58, %v4311_v21  ;;  %v4545_v28 = vpop.f32.mrf.mxu1  ;;  %v778_v38 = vmax.f32 %v686_v53, 0.0 }
 0x13c   : > { %v689_v59 = vpop.f32.mrf.mxu0  ;;  %5162 = vst [vmem:[#allocation30_spill] sm:$0xff] %v4545_v28 }
 0x13d   : > { %v690_v20 = vadd.f32 %v689_v59, %v4317_v5  ;;  %1806 = vmatprep.mubr.bf16.mxu0 %v819_v40  ;;  %1999 = vmatprep.mubr.bf16.mxu1 %v819_v40  ;;  %v4549_v3 = vpop.f32.mrf.mxu1  ;;  %v779_v11 = vmax.f32 %v688_v19, 0.0 }
 0x13e   : > { %v691_v51 = vpop.f32.mrf.mxu0  ;;  %1807 = vmatmul.mubr.bf16.gmra.mxu0 %v818_v26  ;;  %2000 = vmatmul.mubr.bf16.gmra.mxu1 %v818_v26  ;;  %5163 = vst [vmem:[#allocation31_spill] sm:$0xff] %v4549_v3 }
 0x13f   : > { %v692_v55 = vadd.f32 %v691_v51, %v4311_v21  ;;  %v780_v9 = vmax.f32 %v690_v20, 0.0  ;;  %v4551_v58 = vpop.f32.mrf.mxu1 }
 0x140   : > { %v695_v62 = vpop.f32.mrf.mxu0  ;;  %5164 = vst [vmem:[#allocation32_spill] sm:$0xff] %v4551_v58 }
 0x141   : > { %v781_v29 = vmax.f32 %v692_v55, 0.0  ;;  %v4553_v59 = vpop.f32.mrf.mxu1  ;;  %v820_v28 = vpack.c.bf16 %v780_v9, %v778_v38  ;;  %v696_v20 = vadd.f32 %v695_v62, %v4317_v5 }
 0x142   : > { %v697_v50 = vpop.f32.mrf.mxu0  ;;  %5165 = vst [vmem:[#allocation33_spill] sm:$0xff] %v4553_v59 }
 0x143   : > { %v821_v40 = vpack.c.bf16 %v781_v29, %v779_v11  ;;  %v698_v15 = vadd.f32 %v697_v50, %v4311_v21  ;;  %v4557_v51 = vpop.f32.mrf.mxu1 }
 0x144   : > { %v699_v34 = vpop.f32.mrf.mxu0  ;;  %5166 = vst [vmem:[#allocation34_spill] sm:$0xff] %v4557_v51 }
 0x145   : > { %v700_v26 = vadd.f32 %v699_v34, %v4317_v5  ;;  %1816 = vmatprep.mubr.bf16.mxu0 %v821_v40  ;;  %2009 = vmatprep.mubr.bf16.mxu1 %v821_v40  ;;  %v4561_v55 = vpop.f32.mrf.mxu1  ;;  %v783_v29 = vmax.f32 %v698_v15, 0.0  ;;  %v782_v34 = vmax.f32 %v696_v20, 0.0 }
 0x146   : > { %v701_v19 = vpop.f32.mrf.mxu0  ;;  %1817 = vmatmul.mubr.bf16.gmra.mxu0 %v820_v28  ;;  %2010 = vmatmul.mubr.bf16.gmra.mxu1 %v820_v28  ;;  %5167 = vst [vmem:[#allocation35_spill] sm:$0xff] %v4561_v55 }
 0x147   : > { %v702_v53 = vadd.f32 %v701_v19, %v4311_v21  ;;  %v784_v11 = vmax.f32 %v700_v26, 0.0  ;;  %v4563_v50 = vpop.f32.mrf.mxu1 }
 0x148   : > { %v705_v9 = vpop.f32.mrf.mxu0  ;;  %5168 = vst [vmem:[#allocation36_spill] sm:$0xff] %v4563_v50 }
 0x149   : > { %v785_v38 = vmax.f32 %v702_v53, 0.0  ;;  %v4565_v58 = vpop.f32.mrf.mxu1  ;;  %v822_v51 = vpack.c.bf16 %v784_v11, %v782_v34  ;;  %v706_v15 = vadd.f32 %v705_v9, %v4317_v5 }
 0x14a   : > { %v707_v59 = vpop.f32.mrf.mxu0  ;;  %5169 = vst [vmem:[#allocation37_spill] sm:$0xff] %v4565_v58 }
 0x14b   : > { %v823_v40 = vpack.c.bf16 %v785_v38, %v783_v29  ;;  %v708_v3 = vadd.f32 %v707_v59, %v4311_v21  ;;  %v4569_v19 = vpop.f32.mrf.mxu1 }
 0x14c   : > { %v709_v62 = vpop.f32.mrf.mxu0  ;;  %5170 = vst [vmem:[#allocation38_spill] sm:$0xff] %v4569_v19 }
 0x14d   : > { %v710_v28 = vadd.f32 %v709_v62, %v4317_v5  ;;  %1826 = vmatprep.mubr.bf16.mxu0 %v823_v40  ;;  %2019 = vmatprep.mubr.bf16.mxu1 %v823_v40  ;;  %v4573_v53 = vpop.f32.mrf.mxu1  ;;  %v787_v38 = vmax.f32 %v708_v3, 0.0  ;;  %v786_v62 = vmax.f32 %v706_v15, 0.0 }
 0x14e   : > { %v711_v26 = vpop.f32.mrf.mxu0  ;;  %1827 = vmatmul.mubr.bf16.gmra.mxu0 %v822_v51  ;;  %2020 = vmatmul.mubr.bf16.gmra.mxu1 %v822_v51  ;;  %5171 = vst [vmem:[#allocation39_spill] sm:$0xff] %v4573_v53 }
 0x14f   : > { %v712_v20 = vadd.f32 %v711_v26, %v4311_v21  ;;  %v788_v29 = vmax.f32 %v710_v28, 0.0  ;;  %v4575_v59 = vpop.f32.mrf.mxu1 }
 0x150   : > { %v715_v11 = vpop.f32.mrf.mxu0  ;;  %5172 = vst [vmem:[#allocation40_spill] sm:$0xff] %v4575_v59 }
 0x151   : > { %v789_v34 = vmax.f32 %v712_v20, 0.0  ;;  %v4577_v50 = vpop.f32.mrf.mxu1  ;;  %v824_v19 = vpack.c.bf16 %v788_v29, %v786_v62  ;;  %v716_v3 = vadd.f32 %v715_v11, %v4317_v5 }
 0x152   : > { %v717_v58 = vpop.f32.mrf.mxu0  ;;  %5173 = vst [vmem:[#allocation41_spill] sm:$0xff] %v4577_v50 }
 0x153   : > { %v825_v40 = vpack.c.bf16 %v789_v34, %v787_v38  ;;  %v718_v55 = vadd.f32 %v717_v58, %v4311_v21  ;;  %v4581_v26 = vpop.f32.mrf.mxu1 }
 0x154   : > { %v719_v9 = vpop.f32.mrf.mxu0  ;;  %5174 = vst [vmem:[#allocation42_spill] sm:$0xff] %v4581_v26 }
 0x155   : > { %v720_v51 = vadd.f32 %v719_v9, %v4317_v5  ;;  %1836 = vmatprep.mubr.bf16.mxu0 %v825_v40  ;;  %2029 = vmatprep.mubr.bf16.mxu1 %v825_v40  ;;  %v4585_v20 = vpop.f32.mrf.mxu1  ;;  %v791_v34 = vmax.f32 %v718_v55, 0.0  ;;  %v790_v9 = vmax.f32 %v716_v3, 0.0 }
 0x156   : > { %v721_v28 = vpop.f32.mrf.mxu0  ;;  %1837 = vmatmul.mubr.bf16.gmra.mxu0 %v824_v19  ;;  %2030 = vmatmul.mubr.bf16.gmra.mxu1 %v824_v19  ;;  %5175 = vst [vmem:[#allocation43_spill] sm:$0xff] %v4585_v20 }
 0x157   : > { %v722_v15 = vadd.f32 %v721_v28, %v4311_v21  ;;  %v792_v38 = vmax.f32 %v720_v51, 0.0  ;;  %v4587_v58 = vpop.f32.mrf.mxu1 }
 0x158   : > { %v725_v29 = vpop.f32.mrf.mxu0  ;;  %5176 = vst [vmem:[#allocation44_spill] sm:$0xff] %v4587_v58 }
 0x159   : > { %v793_v62 = vmax.f32 %v722_v15, 0.0  ;;  %v4589_v59 = vpop.f32.mrf.mxu1  ;;  %v826_v26 = vpack.c.bf16 %v792_v38, %v790_v9  ;;  %v726_v55 = vadd.f32 %v725_v29, %v4317_v5 }
 0x15a   : > { %v727_v50 = vpop.f32.mrf.mxu0  ;;  %5177 = vst [vmem:[#allocation45_spill] sm:$0xff] %v4589_v59 }
 0x15b   : > { %v827_v40 = vpack.c.bf16 %v793_v62, %v791_v34  ;;  %v728_v53 = vadd.f32 %v727_v50, %v4311_v21  ;;  %v4593_v28 = vpop.f32.mrf.mxu1 }
 0x15c   : > { %v729_v11 = vpop.f32.mrf.mxu0  ;;  %5178 = vst [vmem:[#allocation46_spill] sm:$0xff] %v4593_v28 }
 0x15d   : > { %v730_v19 = vadd.f32 %v729_v11, %v4317_v5  ;;  %1846 = vmatprep.mubr.bf16.mxu0 %v827_v40  ;;  %2039 = vmatprep.mubr.bf16.mxu1 %v827_v40  ;;  %v4597_v15 = vpop.f32.mrf.mxu1  ;;  %v795_v62 = vmax.f32 %v728_v53, 0.0  ;;  %v794_v11 = vmax.f32 %v726_v55, 0.0 }
 0x15e   : > { %v731_v51 = vpop.f32.mrf.mxu0  ;;  %1847 = vmatmul.mubr.bf16.gmra.mxu0 %v826_v26  ;;  %2040 = vmatmul.mubr.bf16.gmra.mxu1 %v826_v26  ;;  %5179 = vst [vmem:[#allocation47_spill] sm:$0xff] %v4597_v15 }
 0x15f   : > { %v732_v3 = vadd.f32 %v731_v51, %v4311_v21  ;;  %v796_v34 = vmax.f32 %v730_v19, 0.0  ;;  %v4601_v9 = vpop.f32.mrf.mxu1 }
 0x160   : > { %v4599_v38 = vpop.f32.mrf.mxu0  ;;  %5180 = vst [vmem:[#allocation48_spill] sm:$0xff] %v4601_v9 }
 0x161   : > { %v797_v50 = vmax.f32 %v732_v3, 0.0  ;;  %v4605_v59 = vpop.f32.mrf.mxu1  ;;  %v828_v5 = vpack.c.bf16 %v796_v34, %v794_v11 }
 0x162   : > { %v4603_v40 = vpop.f32.mrf.mxu0  ;;  %5181 = vst [vmem:[#allocation49_spill] sm:$0xff] %v4605_v59 }
 0x163   : > { %v829_v28 = vpack.c.bf16 %v797_v50, %v795_v62  ;;  %v4609_v21 = vpop.f32.mrf.mxu1 }
 0x164   : > { %v4607_v29 = vpop.f32.mrf.mxu0  ;;  %5182 = vst [vmem:[#allocation50_spill] sm:$0xff] %v4609_v21 }
 0x165   : > { %1856 = vmatprep.mubr.bf16.mxu0 %v829_v28  ;;  %2049 = vmatprep.mubr.bf16.mxu1 %v829_v28  ;;  %v4613_v53 = vpop.f32.mrf.mxu1 }
 0x166   : > { %1857 = vmatmul.mubr.bf16.gmra.mxu0 %v828_v5  ;;  %2050 = vmatmul.mubr.bf16.gmra.mxu1 %v828_v5  ;;  %v4611_v26 = vpop.f32.mrf.mxu0  ;;  %5183 = vst [vmem:[#allocation51_spill] sm:$0xff] %v4613_v53 }
 0x167   : > { %v4617_v55 = vpop.f32.mrf.mxu1 }
 0x168   : > { %v4615_v19 = vpop.f32.mrf.mxu0  ;;  %5184 = vst [vmem:[#allocation52_spill] sm:$0xff] %v4617_v55 }
 0x169   : > { %v4621_v3 = vpop.f32.mrf.mxu1 }
 0x16a   : > { %v4619_v51 = vpop.f32.mrf.mxu0  ;;  %5185 = vst [vmem:[#allocation53_spill] sm:$0xff] %v4621_v3 }
 0x16b   : > { %v4625_v62 = vpop.f32.mrf.mxu1 }
 0x16c   : > { %v4623_v34 = vpop.f32.mrf.mxu0  ;;  %5186 = vst [vmem:[#allocation54_spill] sm:$0xff] %v4625_v62 }
 0x16d   : > { %v4629_v50 = vpop.f32.mrf.mxu1 }
 0x16e   : > { %v4627_v28 = vpop.f32.mrf.mxu0  ;;  %5187 = vst [vmem:[#allocation55_spill] sm:$0xff] %v4629_v50 }
 0x16f   : > { %v4633_v5 = vpop.f32.mrf.mxu1 }
 0x170   : > { %v4631_v11 = vpop.f32.mrf.mxu0  ;;  %5188 = vst [vmem:[#allocation56_spill] sm:$0xff] %v4633_v5 }
 0x171   : > { %v4637_v20 = vpop.f32.mrf.mxu1 }
 0x172   : > { %v4635_v58 = vpop.f32.mrf.mxu0  ;;  %5189 = vst [vmem:[#allocation57_spill] sm:$0xff] %v4637_v20 }
 0x173   : > { %v4641_v10 = vpop.f32.mrf.mxu1 }
 0x174   : > { %v4639_v56 = vpop.f32.mrf.mxu0  ;;  %5190 = vst [vmem:[#allocation58_spill] sm:$0xff] %v4641_v10 }
 0x175   : > { %v4645_v3 = vpop.f32.mrf.mxu1 }
 0x176   : > { %v4643_v57 = vpop.f32.mrf.mxu0  ;;  %5191 = vst [vmem:[#allocation59_spill] sm:$0xff] %v4645_v3 }
 0x177   : > { %v4649_v48 = vpop.f32.mrf.mxu1 }
 0x178   : > { %v4647_v62 = vpop.f32.mrf.mxu0  ;;  %5192 = vst [vmem:[#allocation60_spill] sm:$0xff] %v4649_v48 }
 0x179   : > { %v4653_v55 = vpop.f32.mrf.mxu1 }
 0x17a   : > { %v4651_v50 = vpop.f32.mrf.mxu0  ;;  %5193 = vst [vmem:[#allocation61_spill] sm:$0xff] %v4653_v55 }
 0x17b   : > { %v4657_v37 = vpop.f32.mrf.mxu1 }
 0x17c   : > { %v4655_v5 = vpop.f32.mrf.mxu0  ;;  %5194 = vst [vmem:[#allocation62_spill] sm:$0xff] %v4657_v37 }
 0x17d   : > { %v4661_v53 = vpop.f32.mrf.mxu1 }
 0x17e   : > { %v4659_v20 = vpop.f32.mrf.mxu0  ;;  %5195 = vst [vmem:[#allocation63_spill] sm:$0xff] %v4661_v53 }
 0x17f   : > { %v4665_v24 = vpop.f32.mrf.mxu1 }
 0x180   : > { %v4663_v10 = vpop.f32.mrf.mxu0  ;;  %5196 = vst [vmem:[#allocation64_spill] sm:$0xff] %v4665_v24 }
 0x181   : > { %v4669_v21 = vpop.f32.mrf.mxu1 }
 0x182   : > { %v4667_v3 = vpop.f32.mrf.mxu0  ;;  %5197 = vst [vmem:[#allocation65_spill] sm:$0xff] %v4669_v21 }
 0x183   : > { %v4673_v13 = vpop.f32.mrf.mxu1 }
 0x184   : > { %v4671_v48 = vpop.f32.mrf.mxu0  ;;  %5198 = vst [vmem:[#allocation66_spill] sm:$0xff] %v4673_v13 }
 0x185   : > { %v4677_v59 = vpop.f32.mrf.mxu1 }
 0x186   : > { %v4675_v55 = vpop.f32.mrf.mxu0  ;;  %5199 = vst [vmem:[#allocation67_spill] sm:$0xff] %v4677_v59 }
 0x187   : > { %v4681_v1 = vpop.f32.mrf.mxu1 }
 0x188   : > { %v4679_v37 = vpop.f32.mrf.mxu0  ;;  %5200 = vst [vmem:[#allocation68_spill] sm:$0xff] %v4681_v1 }
 0x189   : > { %v4685_v9 = vpop.f32.mrf.mxu1 }
 0x18a   : > { %v4683_v53 = vpop.f32.mrf.mxu0  ;;  %5202 = vst [vmem:[#allocation70_spill] sm:$0xff] %v4685_v9 }
 0x18b   : > { %5201 = vst [vmem:[#allocation69_spill] sm:$0xff] %v4683_v53  ;;  %v4689_v52 = vpop.f32.mrf.mxu1 }
 0x18c   : > { %v4687_v24 = vpop.f32.mrf.mxu0  ;;  %5204 = vst [vmem:[#allocation72_spill] sm:$0xff] %v4689_v52 }
 0x18d   : > { %5203 = vst [vmem:[#allocation71_spill] sm:$0xff] %v4687_v24  ;;  %v4695_v13 = vpop.f32.mrf.mxu1 }
 0x18e   : > { %v4691_v21 = vpop.f32.mrf.mxu0  ;;  %5207 = vst [vmem:[#allocation75_spill] sm:$0xff] %v4695_v13 }
 0x18f   : > { %5205 = vst [vmem:[#allocation73_spill] sm:$0xff] %v4691_v21  ;;  %v4699_v59 = vpop.f32.mrf.mxu1 }
 0x190   : > { %v4693_v15 = vpop.f32.mrf.mxu0  ;;  %5209 = vst [vmem:[#allocation77_spill] sm:$0xff] %v4699_v59 }
 0x191   : > { %5206 = vst [vmem:[#allocation74_spill] sm:$0xff] %v4693_v15  ;;  %v4703_v1 = vpop.f32.mrf.mxu1  ;;  %v5223_v15 = vsub.s32 1, %v4297_v61 }
 0x192   : > { %v4697_v43 = vpop.f32.mrf.mxu0  ;;  %5211 = vst [vmem:[#allocation79_spill] sm:$0xff] %v4703_v1  ;;  %v2072_v1 = vsub.s32 2, %v4297_v61 }
 0x193   : > { %5208 = vst [vmem:[#allocation76_spill] sm:$0xff] %v4697_v43  ;;  %v4707_v9 = vpop.f32.mrf.mxu1 }
 0x194   : > { %v4701_v47 = vpop.f32.mrf.mxu0  ;;  %5213 = vst [vmem:[#allocation81_spill] sm:$0xff] %v4707_v9  ;;  %v2060_v9 = vld [vmem:[%s5129_s6] sm:$0xf] }
 0x195   : > { %5210 = vst [vmem:[#allocation78_spill] sm:$0xff] %v4701_v47  ;;  %v4711_v52 = vpop.f32.mrf.mxu1  ;;  %v4741_v31 = vrot.slane %v2060_v9, %v5223_v15 }
 0x196   : > { %v4705_v25 = vpop.f32.mrf.mxu0  ;;  %5215 = vst [vmem:[#allocation83_spill] sm:$0xff] %v4711_v52  ;;  %v2076_v52 = vsub.s32 3, %v4297_v61 }
 0x197   : > { %5212 = vst [vmem:[#allocation80_spill] sm:$0xff] %v4705_v25  ;;  %v4715_v54 = vpop.f32.mrf.mxu1 }
 0x198   : > { %v4709_v16 = vpop.f32.mrf.mxu0  ;;  %5217 = vst [vmem:[#allocation85_spill] sm:$0xff] %v4715_v54  ;;  %v4744_v41 = vrot.slane %v2060_v9, %v2076_v52 }
 0x199   : > { %5214 = vst [vmem:[#allocation82_spill] sm:$0xff] %v4709_v16  ;;  %v4719_v44 = vpop.f32.mrf.mxu1 }
 0x19a   : > { %v4713_v8 = vpop.f32.mrf.mxu0  ;;  %5219 = vst [vmem:[#allocation87_spill] sm:$0xff] %v4719_v44 }
 0x19b   : > { %5216 = vst [vmem:[#allocation84_spill] sm:$0xff] %v4713_v8  ;;  %v4723_v47 = vpop.f32.mrf.mxu1 }
 0x19c   : > { %v4717_v13 = vpop.f32.mrf.mxu0  ;;  %5221 = vst [vmem:[#allocation89_spill] sm:$0xff] %v4723_v47 }
 0x19d   : > { %5218 = vst [vmem:[#allocation86_spill] sm:$0xff] %v4717_v13  ;;  %v5222_v13 = vsub.s32 0, %v4297_v61 }
 0x19e   : > { %v4721_v59 = vpop.f32.mrf.mxu0 }
 0x19f   : > { %5220 = vst [vmem:[#allocation88_spill] sm:$0xff] %v4721_v59  ;;  %v4733_v25 = vrot.slane %v2060_v9, %v5222_v13  ;;  %v4736_v59 = vrot.slane %v2060_v9, %v2072_v1 }
 0x1ae   : > { %v1708_v16 = vpop.f32.mrf.mxu0  ;;  %v1901_v8 = vpop.f32.mrf.mxu1 }
 0x1af   : > { %v1709_v54 = vadd.f32 %v1708_v16, %v4307_v0  ;;  %v1902_v44 = vadd.f32 %v1901_v8, %v4599_v38 }
 0x1b0   : > { %v1710_v47 = vpop.f32.mrf.mxu0  ;;  %v1903_v43 = vpop.f32.mrf.mxu1 }
 0x1b1   : > { %v1711_v39 = vadd.f32 %v1710_v47, %v4313_v4  ;;  %v1904_v21 = vadd.f32 %v1903_v43, %v4603_v40  ;;  %v2082_v13 = vadd.f32 %v4733_v25, %v1709_v54  ;;  %v2084_v8 = vadd.f32 %v4736_v59, %v1902_v44 }
 0x1b2   : > { %v1712_v0 = vpop.f32.mrf.mxu0  ;;  %v1905_v16 = vpop.f32.mrf.mxu1 }
 0x1b3   : > { %v1713_v1 = vadd.f32 %v1712_v0, %v4319_v7  ;;  %v1906_v38 = vadd.f32 %v1905_v16, %v4607_v29  ;;  %v2083_v61 = vadd.f32 %v4741_v31, %v1711_v39  ;;  %v2085_v47 = vadd.f32 %v4744_v41, %v1904_v21 }
 0x1b4   : > { %v1714_v24 = vpop.f32.mrf.mxu0  ;;  %v1907_v4 = vpop.f32.mrf.mxu1  ;;  %v2210_v0 = vmax.f32 %v2082_v13, 0.0  ;;  %v2212_v21 = vmax.f32 %v2084_v8, 0.0 }
 0x1b5   : > { %v1715_v43 = vadd.f32 %v1714_v24, %v4323_v27  ;;  %v1908_v52 = vadd.f32 %v1907_v4, %v4611_v26  ;;  %v2086_v15 = vadd.f32 %v4733_v25, %v1713_v1  ;;  %v2088_v54 = vadd.f32 %v4736_v59, %v1906_v38 }
 0x1b6   : > { %v1718_v9 = vpop.f32.mrf.mxu0  ;;  %v1911_v44 = vpop.f32.mrf.mxu1  ;;  %v2211_v4 = vmax.f32 %v2083_v61, 0.0  ;;  %v2213_v1 = vmax.f32 %v2085_v47, 0.0 }
 0x1b7   : > { %v2087_v7 = vadd.f32 %v4741_v31, %v1715_v43  ;;  %v2089_v40 = vadd.f32 %v4744_v41, %v1908_v52  ;;  %v1719_v29 = vadd.f32 %v1718_v9, %v4327_v14  ;;  %v1912_v39 = vadd.f32 %v1911_v44, %v4615_v19 }
 0x1b8   : > { %v2214_v16 = vmax.f32 %v2086_v15, 0.0  ;;  %v2216_v27 = vmax.f32 %v2088_v54, 0.0  ;;  %v1720_v24 = vpop.f32.mrf.mxu0  ;;  %v1913_v26 = vpop.f32.mrf.mxu1 }
 0x1b9   : > { %v2215_v33 = vmax.f32 %v2087_v7, 0.0  ;;  %v2217_v38 = vmax.f32 %v2089_v40, 0.0  ;;  %v2090_v53 = vadd.f32 %v4733_v25, %v1719_v29  ;;  %v2092_v43 = vadd.f32 %v4736_v59, %v1912_v39 }
 0x1ba   : > { %v1721_v52 = vadd.f32 %v1720_v24, %v4329_v18  ;;  %v1914_v14 = vadd.f32 %v1913_v26, %v4619_v51  ;;  %v1722_v9 = vpop.f32.mrf.mxu0  ;;  %v1915_v19 = vpop.f32.mrf.mxu1  ;;  %v2338_v13 = vpack.c.bf16 %v2214_v16, %v2210_v0  ;;  %v2340_v8 = vpack.c.bf16 %v2216_v27, %v2212_v21 }
 0x1bb   : > { %v1723_v15 = vadd.f32 %v1722_v9, %v4331_v23  ;;  %v1916_v54 = vadd.f32 %v1915_v19, %v4623_v34  ;;  %v2339_v40 = vpack.c.bf16 %v2215_v33, %v2211_v4  ;;  %v2341_v29 = vpack.c.bf16 %v2217_v38, %v2213_v1 }
 0x1bc   : > { %v2091_v61 = vadd.f32 %v4741_v31, %v1721_v52  ;;  %v2093_v47 = vadd.f32 %v4744_v41, %v1914_v14  ;;  %v1724_v44 = vpop.f32.mrf.mxu0  ;;  %v1917_v7 = vpop.f32.mrf.mxu1  ;;  %v2218_v33 = vmax.f32 %v2090_v53, 0.0  ;;  %v2220_v26 = vmax.f32 %v2092_v43, 0.0 }
 0x1bd   : > { %v2094_v18 = vadd.f32 %v4733_v25, %v1723_v15  ;;  %v2096_v51 = vadd.f32 %v4736_v59, %v1916_v54  ;;  %v1725_v39 = vadd.f32 %v1724_v44, %v4347_v32  ;;  %v1918_v0 = vadd.f32 %v1917_v7, %v4627_v28  ;;  %2697 = vmatprep.mubr.bf16.mxu0 %v2339_v40 }
 0x1be   : > { %2858 = vmatprep.mubr.bf16.mxu1 %v2341_v29  ;;  %v1728_v23 = vpop.f32.mrf.mxu0  ;;  %v1921_v34 = vpop.f32.mrf.mxu1  ;;  %2698 = vmatmul.mubr.bf16.vlgmr.msra.gmra.mxu0 %v2338_v13  ;;  %v2219_v38 = vmax.f32 %v2091_v61, 0.0  ;;  %v2221_v52 = vmax.f32 %v2093_v47, 0.0 }
 0x1bf   : > { %v2222_v21 = vmax.f32 %v2094_v18, 0.0  ;;  %v2224_v16 = vmax.f32 %v2096_v51, 0.0  ;;  %v2095_v27 = vadd.f32 %v4741_v31, %v1725_v39  ;;  %v2097_v24 = vadd.f32 %v4744_v41, %v1918_v0  ;;  %2859 = vmatmul.mubr.bf16.vlgmr.msra.gmra.mxu1 %v2340_v8 }
 0x1c0   : > { %v1729_v4 = vadd.f32 %v1728_v23, %v4351_v36  ;;  %v1922_v32 = vadd.f32 %v1921_v34, %v4631_v11  ;;  %v1730_v1 = vpop.f32.mrf.mxu0  ;;  %v1923_v28 = vpop.f32.mrf.mxu1 }
 0x1c1   : > { %v2223_v14 = vmax.f32 %v2095_v27, 0.0  ;;  %v2225_v9 = vmax.f32 %v2097_v24, 0.0  ;;  %v2342_v19 = vpack.c.bf16 %v2222_v21, %v2218_v33  ;;  %v2344_v15 = vpack.c.bf16 %v2224_v16, %v2220_v26 }
 0x1c2   : > { %v1731_v54 = vadd.f32 %v1730_v1, %v4365_v45  ;;  %v1924_v44 = vadd.f32 %v1923_v28, %v4635_v58  ;;  %v1732_v13 = vpop.f32.mrf.mxu0  ;;  %v1925_v8 = vpop.f32.mrf.mxu1  ;;  %v2098_v7 = vadd.f32 %v4733_v25, %v1729_v4  ;;  %v2100_v61 = vadd.f32 %v4736_v59, %v1922_v32 }
 0x1c3   : > { %v1733_v53 = vadd.f32 %v1732_v13, %v4367_v49  ;;  %v1926_v36 = vadd.f32 %v1925_v8, %v4639_v56  ;;  %v2343_v43 = vpack.c.bf16 %v2223_v14, %v2219_v38  ;;  %v2345_v11 = vpack.c.bf16 %v2225_v9, %v2221_v52 }
 0x1c4   : > { %v2099_v47 = vadd.f32 %v4741_v31, %v1731_v54  ;;  %v2101_v40 = vadd.f32 %v4744_v41, %v1924_v44  ;;  %v1734_v29 = vpop.f32.mrf.mxu0  ;;  %v1927_v45 = vpop.f32.mrf.mxu1  ;;  %v2226_v16 = vmax.f32 %v2098_v7, 0.0  ;;  %v2228_v27 = vmax.f32 %v2100_v61, 0.0 }
 0x1c5   : > { %v2102_v58 = vadd.f32 %v4733_v25, %v1733_v53  ;;  %v2104_v18 = vadd.f32 %v4736_v59, %v1926_v36  ;;  %v1735_v49 = vadd.f32 %v1734_v29, %v4383_v60  ;;  %v1928_v56 = vadd.f32 %v1927_v45, %v4643_v57  ;;  %2705 = vmatprep.mubr.bf16.mxu0 %v2343_v43 }
 0x1c6   : > { %2866 = vmatprep.mubr.bf16.mxu1 %v2345_v11  ;;  %v1738_v51 = vpop.f32.mrf.mxu0  ;;  %v1931_v39 = vpop.f32.mrf.mxu1  ;;  %2706 = vmatmul.mubr.bf16.gmra.mxu0 %v2342_v19  ;;  %v2227_v26 = vmax.f32 %v2099_v47, 0.0  ;;  %v2229_v4 = vmax.f32 %v2101_v40, 0.0 }
 0x1c7   : > { %v2230_v0 = vmax.f32 %v2102_v58, 0.0  ;;  %v2232_v23 = vmax.f32 %v2104_v18, 0.0  ;;  %v2103_v34 = vadd.f32 %v4741_v31, %v1735_v49  ;;  %v2105_v21 = vadd.f32 %v4744_v41, %v1928_v56  ;;  %2867 = vmatmul.mubr.bf16.gmra.mxu1 %v2344_v15 }
 0x1c8   : > { %v1739_v24 = vadd.f32 %v1738_v51, %v4387_v6  ;;  %v1932_v60 = vadd.f32 %v1931_v39, %v4647_v62  ;;  %v1740_v33 = vpop.f32.mrf.mxu0  ;;  %v1933_v57 = vpop.f32.mrf.mxu1 }
 0x1c9   : > { %v2231_v32 = vmax.f32 %v2103_v34, 0.0  ;;  %v2233_v1 = vmax.f32 %v2105_v21, 0.0  ;;  %v2346_v28 = vpack.c.bf16 %v2230_v0, %v2226_v16  ;;  %v2348_v38 = vpack.c.bf16 %v2232_v23, %v2228_v27 }
 0x1ca   : > { %v1741_v52 = vadd.f32 %v1740_v33, %v4401_v17  ;;  %v1934_v14 = vadd.f32 %v1933_v57, %v4651_v50  ;;  %v1742_v9 = vpop.f32.mrf.mxu0  ;;  %v1935_v19 = vpop.f32.mrf.mxu1  ;;  %v2106_v44 = vadd.f32 %v4733_v25, %v1739_v24  ;;  %v2108_v13 = vadd.f32 %v4736_v59, %v1932_v60 }
 0x1cb   : > { %v1743_v15 = vadd.f32 %v1742_v9, %v4403_v22  ;;  %v1936_v6 = vadd.f32 %v1935_v19, %v4655_v5  ;;  %v2347_v54 = vpack.c.bf16 %v2231_v32, %v2227_v26  ;;  %v2349_v62 = vpack.c.bf16 %v2233_v1, %v2229_v4 }
 0x1cc   : > { %v2107_v8 = vadd.f32 %v4741_v31, %v1741_v52  ;;  %v2109_v53 = vadd.f32 %v4744_v41, %v1934_v14  ;;  %v1744_v36 = vpop.f32.mrf.mxu0  ;;  %v1937_v17 = vpop.f32.mrf.mxu1  ;;  %v2234_v45 = vmax.f32 %v2106_v44, 0.0  ;;  %v2236_v58 = vmax.f32 %v2108_v13, 0.0 }
 0x1cd   : > { %v2110_v50 = vadd.f32 %v4733_v25, %v1743_v15  ;;  %v2112_v43 = vadd.f32 %v4736_v59, %v1936_v6  ;;  %v1745_v22 = vadd.f32 %v1744_v36, %v4413_v30  ;;  %v1938_v5 = vadd.f32 %v1937_v17, %v4659_v20  ;;  %2713 = vmatprep.mubr.bf16.mxu0 %v2347_v54 }
 0x1ce   : > { %2874 = vmatprep.mubr.bf16.mxu1 %v2349_v62  ;;  %v1748_v11 = vpop.f32.mrf.mxu0  ;;  %v1941_v7 = vpop.f32.mrf.mxu1  ;;  %2714 = vmatmul.mubr.bf16.gmra.mxu0 %v2346_v28  ;;  %v2235_v56 = vmax.f32 %v2107_v8, 0.0  ;;  %v2237_v51 = vmax.f32 %v2109_v53, 0.0 }
 0x1cf   : > { %v2238_v61 = vmax.f32 %v2110_v50, 0.0  ;;  %v2240_v47 = vmax.f32 %v2112_v43, 0.0  ;;  %v2111_v40 = vadd.f32 %v4741_v31, %v1745_v22  ;;  %v2113_v29 = vadd.f32 %v4744_v41, %v1938_v5  ;;  %2875 = vmatmul.mubr.bf16.gmra.mxu1 %v2348_v38  ;;  %v5224_v22 = vld [vmem:[#allocation69_spill] sm:$0xff] }
 0x1d0   : > { %v1749_v18 = vadd.f32 %v1748_v11, %v4417_v35  ;;  %v1942_v30 = vadd.f32 %v1941_v7, %v4663_v10  ;;  %v1750_v49 = vpop.f32.mrf.mxu0  ;;  %v1943_v20 = vpop.f32.mrf.mxu1 }
 0x1d1   : > { %v2239_v39 = vmax.f32 %v2111_v40, 0.0  ;;  %v2241_v0 = vmax.f32 %v2113_v29, 0.0  ;;  %v2350_v23 = vpack.c.bf16 %v2238_v61, %v2234_v45  ;;  %v2352_v34 = vpack.c.bf16 %v2240_v47, %v2236_v58  ;;  %v5225_v61 = vld [vmem:[#allocation5_spill] sm:$0xff]  ;;  %v5226_v40 = vld [vmem:[#allocation71_spill] sm:$0xff] }
 0x1d2   : > { %v1751_v21 = vadd.f32 %v1750_v49, %v4419_v42  ;;  %v1944_v16 = vadd.f32 %v1943_v20, %v4667_v3  ;;  %v1752_v27 = vpop.f32.mrf.mxu0  ;;  %v1945_v24 = vpop.f32.mrf.mxu1  ;;  %v2114_v57 = vadd.f32 %v4733_v25, %v1749_v18  ;;  %v2116_v26 = vadd.f32 %v4736_v59, %v1942_v30 }
 0x1d3   : > { %v1753_v60 = vadd.f32 %v1752_v27, %v4421_v46  ;;  %v1946_v35 = vadd.f32 %v1945_v24, %v4671_v48  ;;  %v2351_v33 = vpack.c.bf16 %v2239_v39, %v2235_v56  ;;  %v2353_v10 = vpack.c.bf16 %v2241_v0, %v2237_v51  ;;  %v5227_v51 = vld [vmem:[#allocation6_spill] sm:$0xff]  ;;  %v5228_v0 = vld [vmem:[#allocation73_spill] sm:$0xff] }
 0x1d4   : > { %v2115_v4 = vadd.f32 %v4741_v31, %v1751_v21  ;;  %v2117_v32 = vadd.f32 %v4744_v41, %v1944_v16  ;;  %v1754_v1 = vpop.f32.mrf.mxu0  ;;  %v1947_v42 = vpop.f32.mrf.mxu1  ;;  %v2242_v6 = vmax.f32 %v2114_v57, 0.0  ;;  %v2244_v54 = vmax.f32 %v2116_v26, 0.0  ;;  %v5230_v26 = vld [vmem:[#allocation74_spill] sm:$0xff] }
 0x1d5   : > { %v2118_v3 = vadd.f32 %v4733_v25, %v1753_v60  ;;  %v2120_v28 = vadd.f32 %v4736_v59, %v1946_v35  ;;  %v1755_v46 = vadd.f32 %v1754_v1, %v4428_v2  ;;  %v1948_v48 = vadd.f32 %v1947_v42, %v4675_v55  ;;  %2721 = vmatprep.mubr.bf16.mxu0 %v2351_v33 }
 0x1d6   : > { %2882 = vmatprep.mubr.bf16.mxu1 %v2353_v10  ;;  %v1758_v38 = vpop.f32.mrf.mxu0  ;;  %v1951_v52 = vpop.f32.mrf.mxu1  ;;  %2722 = vmatmul.mubr.bf16.gmra.mxu0 %v2350_v23  ;;  %v2243_v13 = vmax.f32 %v2115_v4, 0.0  ;;  %v2245_v8 = vmax.f32 %v2117_v32, 0.0  ;;  %v5229_v10 = vld [vmem:[#allocation7_spill] sm:$0xff] }
 0x1d7   : > { %v2246_v14 = vmax.f32 %v2118_v3, 0.0  ;;  %v2248_v9 = vmax.f32 %v2120_v28, 0.0  ;;  %v2119_v19 = vadd.f32 %v4741_v31, %v1755_v46  ;;  %v2121_v15 = vadd.f32 %v4744_v41, %v1948_v48  ;;  %2883 = vmatmul.mubr.bf16.gmra.mxu1 %v2352_v34 }
 0x1d8   : > { %v1759_v62 = vadd.f32 %v1758_v38, %v4438_v63  ;;  %v1952_v2 = vadd.f32 %v1951_v52, %v4679_v37  ;;  %v1760_v44 = vpop.f32.mrf.mxu0  ;;  %v1953_v55 = vpop.f32.mrf.mxu1  ;;  %v5231_v52 = vld [vmem:[#allocation8_spill] sm:$0xff] }
 0x1d9   : > { %v2247_v53 = vmax.f32 %v2119_v19, 0.0  ;;  %v2249_v36 = vmax.f32 %v2121_v15, 0.0  ;;  %v2354_v17 = vpack.c.bf16 %v2246_v14, %v2242_v6  ;;  %v2356_v50 = vpack.c.bf16 %v2248_v9, %v2244_v54  ;;  %v5232_v9 = vld [vmem:[#allocation76_spill] sm:$0xff]  ;;  %v5233_v54 = vld [vmem:[#allocation9_spill] sm:$0xff] }
 0x1da   : > { %v1761_v43 = vadd.f32 %v1760_v44, %v4443_v12  ;;  %v1954_v5 = vadd.f32 %v1953_v55, %v5224_v22  ;;  %v1762_v11 = vpop.f32.mrf.mxu0  ;;  %v1955_v7 = vpop.f32.mrf.mxu1  ;;  %v2122_v45 = vadd.f32 %v4733_v25, %v1759_v62  ;;  %v2124_v58 = vadd.f32 %v4736_v59, %v1952_v2  ;;  %v5234_v2 = vld [vmem:[#allocation78_spill] sm:$0xff] }
 0x1db   : > { %v1763_v47 = vadd.f32 %v1762_v11, %v5225_v61  ;;  %v1956_v63 = vadd.f32 %v1955_v7, %v5226_v40  ;;  %v2355_v29 = vpack.c.bf16 %v2247_v53, %v2243_v13  ;;  %v2357_v37 = vpack.c.bf16 %v2249_v36, %v2245_v8  ;;  %v5235_v11 = vld [vmem:[#allocation10_spill] sm:$0xff]  ;;  %v5236_v61 = vld [vmem:[#allocation80_spill] sm:$0xff] }
 0x1dc   : > { %v2123_v18 = vadd.f32 %v4741_v31, %v1761_v43  ;;  %v2125_v30 = vadd.f32 %v4744_v41, %v1954_v5  ;;  %v1764_v49 = vpop.f32.mrf.mxu0  ;;  %v1957_v12 = vpop.f32.mrf.mxu1  ;;  %v2250_v35 = vmax.f32 %v2122_v45, 0.0  ;;  %v2252_v33 = vmax.f32 %v2124_v58, 0.0 }
 0x1dd   : > { %v2126_v20 = vadd.f32 %v4733_v25, %v1763_v47  ;;  %v2128_v56 = vadd.f32 %v4736_v59, %v1956_v63  ;;  %v1765_v39 = vadd.f32 %v1764_v49, %v5227_v51  ;;  %v1958_v23 = vadd.f32 %v1957_v12, %v5228_v0  ;;  %2729 = vmatprep.mubr.bf16.mxu0 %v2355_v29  ;;  %v5237_v49 = vld [vmem:[#allocation11_spill] sm:$0xff] }
 0x1de   : > { %2890 = vmatprep.mubr.bf16.mxu1 %v2357_v37  ;;  %v1768_v34 = vpop.f32.mrf.mxu0  ;;  %v1961_v21 = vpop.f32.mrf.mxu1  ;;  %2730 = vmatmul.mubr.bf16.gmra.mxu0 %v2354_v17  ;;  %v2251_v42 = vmax.f32 %v2123_v18, 0.0  ;;  %v2253_v3 = vmax.f32 %v2125_v30, 0.0 }
 0x1df   : > { %v2254_v16 = vmax.f32 %v2126_v20, 0.0  ;;  %v2256_v27 = vmax.f32 %v2128_v56, 0.0  ;;  %v2127_v24 = vadd.f32 %v4741_v31, %v1765_v39  ;;  %v2129_v60 = vadd.f32 %v4744_v41, %v1958_v23  ;;  %2891 = vmatmul.mubr.bf16.gmra.mxu1 %v2356_v50  ;;  %v5238_v20 = vld [vmem:[#allocation82_spill] sm:$0xff] }
 0x1e0   : > { %v1769_v57 = vadd.f32 %v1768_v34, %v5229_v10  ;;  %v1962_v4 = vadd.f32 %v1961_v21, %v5230_v26  ;;  %v1770_v32 = vpop.f32.mrf.mxu0  ;;  %v1963_v1 = vpop.f32.mrf.mxu1  ;;  %v5241_v26 = vld [vmem:[#allocation13_spill] sm:$0xff] }
 0x1e1   : > { %v2255_v28 = vmax.f32 %v2127_v24, 0.0  ;;  %v2257_v46 = vmax.f32 %v2129_v60, 0.0  ;;  %v2358_v48 = vpack.c.bf16 %v2254_v16, %v2250_v35  ;;  %v2360_v38 = vpack.c.bf16 %v2256_v27, %v2252_v33  ;;  %v5239_v24 = vld [vmem:[#allocation12_spill] sm:$0xff] }
 0x1e2   : > { %v1771_v14 = vadd.f32 %v1770_v32, %v5231_v52  ;;  %v1964_v19 = vadd.f32 %v1963_v1, %v5232_v9  ;;  %v1772_v15 = vpop.f32.mrf.mxu0  ;;  %v1965_v6 = vpop.f32.mrf.mxu1  ;;  %v2130_v8 = vadd.f32 %v4733_v25, %v1769_v57  ;;  %v2132_v53 = vadd.f32 %v4736_v59, %v1962_v4  ;;  %v5240_v35 = vld [vmem:[#allocation84_spill] sm:$0xff]  ;;  %v5242_v32 = vld [vmem:[#allocation86_spill] sm:$0xff] }
 0x1e3   : > { %v1773_v62 = vadd.f32 %v1772_v15, %v5233_v54  ;;  %v1966_v44 = vadd.f32 %v1965_v6, %v5234_v2  ;;  %v2359_v55 = vpack.c.bf16 %v2255_v28, %v2251_v42  ;;  %v2361_v13 = vpack.c.bf16 %v2257_v46, %v2253_v3  ;;  %v5243_v15 = vld [vmem:[#allocation14_spill] sm:$0xff]  ;;  %v5244_v54 = vld [vmem:[#allocation88_spill] sm:$0xff] }
 0x1e4   : > { %v2131_v36 = vadd.f32 %v4741_v31, %v1771_v14  ;;  %v2133_v17 = vadd.f32 %v4744_v41, %v1964_v19  ;;  %v1774_v50 = vpop.f32.mrf.mxu0  ;;  %v1967_v43 = vpop.f32.mrf.mxu1  ;;  %v2258_v18 = vmax.f32 %v2130_v8, 0.0  ;;  %v2260_v30 = vmax.f32 %v2132_v53, 0.0 }
 0x1e5   : > { %v2134_v22 = vadd.f32 %v4733_v25, %v1773_v62  ;;  %v2136_v5 = vadd.f32 %v4736_v59, %v1966_v44  ;;  %v1775_v7 = vadd.f32 %v1774_v50, %v5235_v11  ;;  %v1968_v47 = vadd.f32 %v1967_v43, %v5236_v61  ;;  %2737 = vmatprep.mubr.bf16.mxu0 %v2359_v55  ;;  %v5245_v50 = vld [vmem:[#allocation15_spill] sm:$0xff] }
 0x1e6   : > { %2898 = vmatprep.mubr.bf16.mxu1 %v2361_v13  ;;  %v1778_v40 = vpop.f32.mrf.mxu0  ;;  %v1971_v63 = vpop.f32.mrf.mxu1  ;;  %2738 = vmatmul.mubr.bf16.gmra.mxu0 %v2358_v48  ;;  %v2259_v0 = vmax.f32 %v2131_v36, 0.0  ;;  %v2261_v23 = vmax.f32 %v2133_v17, 0.0 }
 0x1e7   : > { %v2262_v29 = vmax.f32 %v2134_v22, 0.0  ;;  %v2264_v37 = vmax.f32 %v2136_v5, 0.0  ;;  %v2135_v45 = vadd.f32 %v4741_v31, %v1775_v7  ;;  %v2137_v58 = vadd.f32 %v4744_v41, %v1968_v47  ;;  %2899 = vmatmul.mubr.bf16.gmra.mxu1 %v2360_v38  ;;  %v5246_v22 = vld [vmem:[#allocation47_spill] sm:$0xff] }
 0x1e8   : > { %v1779_v12 = vadd.f32 %v1778_v40, %v5237_v49  ;;  %v1972_v56 = vadd.f32 %v1971_v63, %v5238_v20  ;;  %v1780_v51 = vpop.f32.mrf.mxu0  ;;  %v1973_v39 = vpop.f32.mrf.mxu1  ;;  %v5249_v20 = vld [vmem:[#allocation17_spill] sm:$0xff] }
 0x1e9   : > { %v2263_v34 = vmax.f32 %v2135_v45, 0.0  ;;  %v2265_v21 = vmax.f32 %v2137_v58, 0.0  ;;  %v2362_v16 = vpack.c.bf16 %v2262_v29, %v2258_v18  ;;  %v2364_v27 = vpack.c.bf16 %v2264_v37, %v2260_v30  ;;  %v5247_v45 = vld [vmem:[#allocation16_spill] sm:$0xff] }
 0x1ea   : > { %v1781_v60 = vadd.f32 %v1780_v51, %v5239_v24  ;;  %v1974_v33 = vadd.f32 %v1973_v39, %v5240_v35  ;;  %v1782_v10 = vpop.f32.mrf.mxu0  ;;  %v1975_v57 = vpop.f32.mrf.mxu1  ;;  %v2138_v28 = vadd.f32 %v4733_v25, %v1779_v12  ;;  %v2140_v46 = vadd.f32 %v4736_v59, %v1972_v56  ;;  %v5248_v18 = vld [vmem:[#allocation48_spill] sm:$0xff]  ;;  %v5250_v51 = vld [vmem:[#allocation49_spill] sm:$0xff] }
 0x1eb   : > { %v1783_v4 = vadd.f32 %v1782_v10, %v5241_v26  ;;  %v1976_v1 = vadd.f32 %v1975_v57, %v5242_v32  ;;  %v2363_v42 = vpack.c.bf16 %v2263_v34, %v2259_v0  ;;  %v2365_v3 = vpack.c.bf16 %v2265_v21, %v2261_v23  ;;  %v5251_v10 = vld [vmem:[#allocation18_spill] sm:$0xff] }
 0x1ec   : > { %v2139_v48 = vadd.f32 %v4741_v31, %v1781_v60  ;;  %v2141_v38 = vadd.f32 %v4744_v41, %v1974_v33  ;;  %v1784_v52 = vpop.f32.mrf.mxu0  ;;  %v1977_v14 = vpop.f32.mrf.mxu1  ;;  %v2266_v36 = vmax.f32 %v2138_v28, 0.0  ;;  %v2268_v17 = vmax.f32 %v2140_v46, 0.0  ;;  %v5252_v26 = vld [vmem:[#allocation50_spill] sm:$0xff] }
 0x1ed   : > { %v2142_v9 = vadd.f32 %v4733_v25, %v1783_v4  ;;  %v2144_v19 = vadd.f32 %v4736_v59, %v1976_v1  ;;  %v1785_v6 = vadd.f32 %v1784_v52, %v5243_v15  ;;  %v1978_v62 = vadd.f32 %v1977_v14, %v5244_v54  ;;  %2745 = vmatprep.mubr.bf16.mxu0 %v2363_v42  ;;  %v5253_v52 = vld [vmem:[#allocation19_spill] sm:$0xff] }
 0x1ee   : > { %2906 = vmatprep.mubr.bf16.mxu1 %v2365_v3  ;;  %v1788_v2 = vpop.f32.mrf.mxu0  ;;  %v1981_v44 = vpop.f32.mrf.mxu1  ;;  %2746 = vmatmul.mubr.bf16.gmra.mxu0 %v2362_v16  ;;  %v2267_v61 = vmax.f32 %v2139_v48, 0.0  ;;  %v2269_v47 = vmax.f32 %v2141_v38, 0.0 }
 0x1ef   : > { %v2270_v55 = vmax.f32 %v2142_v9, 0.0  ;;  %v2272_v13 = vmax.f32 %v2144_v19, 0.0  ;;  %v2143_v8 = vadd.f32 %v4741_v31, %v1785_v6  ;;  %v2145_v53 = vadd.f32 %v4744_v41, %v1978_v62  ;;  %2907 = vmatmul.mubr.bf16.gmra.mxu1 %v2364_v27  ;;  %v5254_v9 = vld [vmem:[#allocation51_spill] sm:$0xff] }
 0x1f0   : > { %v1789_v43 = vadd.f32 %v1788_v2, %v5245_v50  ;;  %v1982_v5 = vadd.f32 %v1981_v44, %v5246_v22  ;;  %v1790_v11 = vpop.f32.mrf.mxu0  ;;  %v1983_v7 = vpop.f32.mrf.mxu1  ;;  %v5257_v22 = vld [vmem:[#allocation21_spill] sm:$0xff] }
 0x1f1   : > { %v2271_v40 = vmax.f32 %v2143_v8, 0.0  ;;  %v2273_v63 = vmax.f32 %v2145_v53, 0.0  ;;  %v2366_v29 = vpack.c.bf16 %v2270_v55, %v2266_v36  ;;  %v2368_v37 = vpack.c.bf16 %v2272_v13, %v2268_v17  ;;  %v5255_v8 = vld [vmem:[#allocation20_spill] sm:$0xff] }
 0x1f2   : > { %v1791_v58 = vadd.f32 %v1790_v11, %v5247_v45  ;;  %v1984_v30 = vadd.f32 %v1983_v7, %v5248_v18  ;;  %v1792_v49 = vpop.f32.mrf.mxu0  ;;  %v1985_v12 = vpop.f32.mrf.mxu1  ;;  %v2146_v34 = vadd.f32 %v4733_v25, %v1789_v43  ;;  %v2148_v21 = vadd.f32 %v4736_v59, %v1982_v5  ;;  %v5256_v36 = vld [vmem:[#allocation52_spill] sm:$0xff]  ;;  %v5258_v11 = vld [vmem:[#allocation53_spill] sm:$0xff] }
 0x1f3   : > { %v1793_v56 = vadd.f32 %v1792_v49, %v5249_v20  ;;  %v1986_v39 = vadd.f32 %v1985_v12, %v5250_v51  ;;  %v2367_v0 = vpack.c.bf16 %v2271_v40, %v2267_v61  ;;  %v2369_v23 = vpack.c.bf16 %v2273_v63, %v2269_v47  ;;  %v5259_v49 = vld [vmem:[#allocation22_spill] sm:$0xff] }
 0x1f4   : > { %v2147_v16 = vadd.f32 %v4741_v31, %v1791_v58  ;;  %v2149_v27 = vadd.f32 %v4744_v41, %v1984_v30  ;;  %v1794_v24 = vpop.f32.mrf.mxu0  ;;  %v1987_v60 = vpop.f32.mrf.mxu1  ;;  %v2274_v48 = vmax.f32 %v2146_v34, 0.0  ;;  %v2276_v38 = vmax.f32 %v2148_v21, 0.0  ;;  %v5260_v20 = vld [vmem:[#allocation54_spill] sm:$0xff] }
 0x1f5   : > { %v2150_v35 = vadd.f32 %v4733_v25, %v1793_v56  ;;  %v2152_v33 = vadd.f32 %v4736_v59, %v1986_v39  ;;  %v1795_v57 = vadd.f32 %v1794_v24, %v5251_v10  ;;  %v1988_v4 = vadd.f32 %v1987_v60, %v5252_v26  ;;  %2753 = vmatprep.mubr.bf16.mxu0 %v2367_v0  ;;  %v5261_v24 = vld [vmem:[#allocation23_spill] sm:$0xff] }
 0x1f6   : > { %2914 = vmatprep.mubr.bf16.mxu1 %v2369_v23  ;;  %v1798_v32 = vpop.f32.mrf.mxu0  ;;  %v1991_v1 = vpop.f32.mrf.mxu1  ;;  %2754 = vmatmul.mubr.bf16.gmra.mxu0 %v2366_v29  ;;  %v2275_v54 = vmax.f32 %v2147_v16, 0.0  ;;  %v2277_v62 = vmax.f32 %v2149_v27, 0.0 }
 0x1f7   : > { %v2278_v42 = vmax.f32 %v2150_v35, 0.0  ;;  %v2280_v3 = vmax.f32 %v2152_v33, 0.0  ;;  %v2151_v28 = vadd.f32 %v4741_v31, %v1795_v57  ;;  %v2153_v46 = vadd.f32 %v4744_v41, %v1988_v4  ;;  %2915 = vmatmul.mubr.bf16.gmra.mxu1 %v2368_v37  ;;  %v5262_v35 = vld [vmem:[#allocation55_spill] sm:$0xff] }
 0x1f8   : > { %v1799_v14 = vadd.f32 %v1798_v32, %v5253_v52  ;;  %v1992_v19 = vadd.f32 %v1991_v1, %v5254_v9  ;;  %v1800_v15 = vpop.f32.mrf.mxu0  ;;  %v1993_v6 = vpop.f32.mrf.mxu1  ;;  %v5265_v9 = vld [vmem:[#allocation25_spill] sm:$0xff] }
 0x1f9   : > { %v2279_v2 = vmax.f32 %v2151_v28, 0.0  ;;  %v2281_v44 = vmax.f32 %v2153_v46, 0.0  ;;  %v2370_v55 = vpack.c.bf16 %v2278_v42, %v2274_v48  ;;  %v2372_v13 = vpack.c.bf16 %v2280_v3, %v2276_v38  ;;  %v5263_v28 = vld [vmem:[#allocation24_spill] sm:$0xff] }
 0x1fa   : > { %v1801_v53 = vadd.f32 %v1800_v15, %v5255_v8  ;;  %v1994_v17 = vadd.f32 %v1993_v6, %v5256_v36  ;;  %v1802_v50 = vpop.f32.mrf.mxu0  ;;  %v1995_v43 = vpop.f32.mrf.mxu1  ;;  %v2154_v40 = vadd.f32 %v4733_v25, %v1799_v14  ;;  %v2156_v63 = vadd.f32 %v4736_v59, %v1992_v19  ;;  %v5264_v48 = vld [vmem:[#allocation56_spill] sm:$0xff]  ;;  %v5266_v15 = vld [vmem:[#allocation57_spill] sm:$0xff] }
 0x1fb   : > { %v1803_v5 = vadd.f32 %v1802_v50, %v5257_v22  ;;  %v1996_v7 = vadd.f32 %v1995_v43, %v5258_v11  ;;  %v2371_v61 = vpack.c.bf16 %v2279_v2, %v2275_v54  ;;  %v2373_v47 = vpack.c.bf16 %v2281_v44, %v2277_v62  ;;  %v5267_v50 = vld [vmem:[#allocation26_spill] sm:$0xff] }
 0x1fc   : > { %v2155_v29 = vadd.f32 %v4741_v31, %v1801_v53  ;;  %v2157_v37 = vadd.f32 %v4744_v41, %v1994_v17  ;;  %v1804_v45 = vpop.f32.mrf.mxu0  ;;  %v1997_v58 = vpop.f32.mrf.mxu1  ;;  %v2282_v16 = vmax.f32 %v2154_v40, 0.0  ;;  %v2284_v27 = vmax.f32 %v2156_v63, 0.0  ;;  %v5268_v22 = vld [vmem:[#allocation58_spill] sm:$0xff] }
 0x1fd   : > { %v2158_v18 = vadd.f32 %v4733_v25, %v1803_v5  ;;  %v2160_v30 = vadd.f32 %v4736_v59, %v1996_v7  ;;  %v1805_v12 = vadd.f32 %v1804_v45, %v5259_v49  ;;  %v1998_v56 = vadd.f32 %v1997_v58, %v5260_v20  ;;  %2761 = vmatprep.mubr.bf16.mxu0 %v2371_v61  ;;  %v5269_v45 = vld [vmem:[#allocation27_spill] sm:$0xff] }
 0x1fe   : > { %2922 = vmatprep.mubr.bf16.mxu1 %v2373_v47  ;;  %v1808_v51 = vpop.f32.mrf.mxu0  ;;  %v2001_v39 = vpop.f32.mrf.mxu1  ;;  %2762 = vmatmul.mubr.bf16.gmra.mxu0 %v2370_v55  ;;  %v2283_v26 = vmax.f32 %v2155_v29, 0.0  ;;  %v2285_v4 = vmax.f32 %v2157_v37, 0.0 }
 0x1ff   : > { %v2286_v0 = vmax.f32 %v2158_v18, 0.0  ;;  %v2288_v23 = vmax.f32 %v2160_v30, 0.0  ;;  %v2159_v34 = vadd.f32 %v4741_v31, %v1805_v12  ;;  %v2161_v21 = vadd.f32 %v4744_v41, %v1998_v56  ;;  %2923 = vmatmul.mubr.bf16.gmra.mxu1 %v2372_v13  ;;  %v5270_v18 = vld [vmem:[#allocation59_spill] sm:$0xff] }
 0x200   : > { %v1809_v60 = vadd.f32 %v1808_v51, %v5261_v24  ;;  %v2002_v33 = vadd.f32 %v2001_v39, %v5262_v35  ;;  %v1810_v10 = vpop.f32.mrf.mxu0  ;;  %v2003_v57 = vpop.f32.mrf.mxu1  ;;  %v5273_v35 = vld [vmem:[#allocation29_spill] sm:$0xff] }
 0x201   : > { %v2287_v32 = vmax.f32 %v2159_v34, 0.0  ;;  %v2289_v1 = vmax.f32 %v2161_v21, 0.0  ;;  %v2374_v42 = vpack.c.bf16 %v2286_v0, %v2282_v16  ;;  %v2376_v3 = vpack.c.bf16 %v2288_v23, %v2284_v27  ;;  %v5271_v34 = vld [vmem:[#allocation28_spill] sm:$0xff] }
 0x202   : > { %v1811_v46 = vadd.f32 %v1810_v10, %v5263_v28  ;;  %v2004_v38 = vadd.f32 %v2003_v57, %v5264_v48  ;;  %v1812_v52 = vpop.f32.mrf.mxu0  ;;  %v2005_v14 = vpop.f32.mrf.mxu1  ;;  %v2162_v2 = vadd.f32 %v4733_v25, %v1809_v60  ;;  %v2164_v44 = vadd.f32 %v4736_v59, %v2002_v33  ;;  %v5272_v16 = vld [vmem:[#allocation60_spill] sm:$0xff]  ;;  %v5274_v10 = vld [vmem:[#allocation61_spill] sm:$0xff] }
 0x203   : > { %v1813_v19 = vadd.f32 %v1812_v52, %v5265_v9  ;;  %v2006_v6 = vadd.f32 %v2005_v14, %v5266_v15  ;;  %v2375_v54 = vpack.c.bf16 %v2287_v32, %v2283_v26  ;;  %v2377_v62 = vpack.c.bf16 %v2289_v1, %v2285_v4  ;;  %v5275_v52 = vld [vmem:[#allocation30_spill] sm:$0xff] }
 0x204   : > { %v2163_v55 = vadd.f32 %v4741_v31, %v1811_v46  ;;  %v2165_v13 = vadd.f32 %v4744_v41, %v2004_v38  ;;  %v1814_v8 = vpop.f32.mrf.mxu0  ;;  %v2007_v53 = vpop.f32.mrf.mxu1  ;;  %v2290_v29 = vmax.f32 %v2162_v2, 0.0  ;;  %v2292_v37 = vmax.f32 %v2164_v44, 0.0  ;;  %v5276_v9 = vld [vmem:[#allocation62_spill] sm:$0xff] }
 0x205   : > { %v2166_v36 = vadd.f32 %v4733_v25, %v1813_v19  ;;  %v2168_v17 = vadd.f32 %v4736_v59, %v2006_v6  ;;  %v1815_v43 = vadd.f32 %v1814_v8, %v5267_v50  ;;  %v2008_v5 = vadd.f32 %v2007_v53, %v5268_v22  ;;  %2769 = vmatprep.mubr.bf16.mxu0 %v2375_v54  ;;  %v5277_v8 = vld [vmem:[#allocation31_spill] sm:$0xff] }
 0x206   : > { %2930 = vmatprep.mubr.bf16.mxu1 %v2377_v62  ;;  %v1818_v11 = vpop.f32.mrf.mxu0  ;;  %v2011_v7 = vpop.f32.mrf.mxu1  ;;  %2770 = vmatmul.mubr.bf16.gmra.mxu0 %v2374_v42  ;;  %v2291_v20 = vmax.f32 %v2163_v55, 0.0  ;;  %v2293_v56 = vmax.f32 %v2165_v13, 0.0 }
 0x207   : > { %v2294_v61 = vmax.f32 %v2166_v36, 0.0  ;;  %v2296_v47 = vmax.f32 %v2168_v17, 0.0  ;;  %v2167_v40 = vadd.f32 %v4741_v31, %v1815_v43  ;;  %v2169_v63 = vadd.f32 %v4744_v41, %v2008_v5  ;;  %2931 = vmatmul.mubr.bf16.gmra.mxu1 %v2376_v3  ;;  %v5278_v36 = vld [vmem:[#allocation63_spill] sm:$0xff] }
 0x208   : > { %v1819_v58 = vadd.f32 %v1818_v11, %v5269_v45  ;;  %v2012_v30 = vadd.f32 %v2011_v7, %v5270_v18  ;;  %v1820_v49 = vpop.f32.mrf.mxu0  ;;  %v2013_v12 = vpop.f32.mrf.mxu1  ;;  %v5281_v18 = vld [vmem:[#allocation33_spill] sm:$0xff] }
 0x209   : > { %v2295_v51 = vmax.f32 %v2167_v40, 0.0  ;;  %v2297_v39 = vmax.f32 %v2169_v63, 0.0  ;;  %v2378_v0 = vpack.c.bf16 %v2294_v61, %v2290_v29  ;;  %v2380_v23 = vpack.c.bf16 %v2296_v47, %v2292_v37  ;;  %v5279_v40 = vld [vmem:[#allocation32_spill] sm:$0xff] }
 0x20a   : > { %v1821_v21 = vadd.f32 %v1820_v49, %v5271_v34  ;;  %v2014_v27 = vadd.f32 %v2013_v12, %v5272_v16  ;;  %v1822_v24 = vpop.f32.mrf.mxu0  ;;  %v2015_v60 = vpop.f32.mrf.mxu1  ;;  %v2170_v32 = vadd.f32 %v4733_v25, %v1819_v58  ;;  %v2172_v1 = vadd.f32 %v4736_v59, %v2012_v30  ;;  %v5280_v29 = vld [vmem:[#allocation64_spill] sm:$0xff]  ;;  %v5282_v49 = vld [vmem:[#allocation65_spill] sm:$0xff] }
 0x20b   : > { %v1823_v33 = vadd.f32 %v1822_v24, %v5273_v35  ;;  %v2016_v57 = vadd.f32 %v2015_v60, %v5274_v10  ;;  %v2379_v26 = vpack.c.bf16 %v2295_v51, %v2291_v20  ;;  %v2381_v4 = vpack.c.bf16 %v2297_v39, %v2293_v56  ;;  %v5283_v24 = vld [vmem:[#allocation34_spill] sm:$0xff] }
 0x20c   : > { %v2171_v42 = vadd.f32 %v4741_v31, %v1821_v21  ;;  %v2173_v3 = vadd.f32 %v4744_v41, %v2014_v27  ;;  %v1824_v28 = vpop.f32.mrf.mxu0  ;;  %v2017_v46 = vpop.f32.mrf.mxu1  ;;  %v2298_v55 = vmax.f32 %v2170_v32, 0.0  ;;  %v2300_v13 = vmax.f32 %v2172_v1, 0.0  ;;  %v5284_v35 = vld [vmem:[#allocation66_spill] sm:$0xff] }
 0x20d   : > { %v2174_v48 = vadd.f32 %v4733_v25, %v1823_v33  ;;  %v2176_v38 = vadd.f32 %v4736_v59, %v2016_v57  ;;  %v1825_v14 = vadd.f32 %v1824_v28, %v5275_v52  ;;  %v2018_v19 = vadd.f32 %v2017_v46, %v5276_v9  ;;  %2777 = vmatprep.mubr.bf16.mxu0 %v2379_v26  ;;  %v5285_v28 = vld [vmem:[#allocation35_spill] sm:$0xff] }
 0x20e   : > { %2938 = vmatprep.mubr.bf16.mxu1 %v2381_v4  ;;  %v1828_v15 = vpop.f32.mrf.mxu0  ;;  %v2021_v6 = vpop.f32.mrf.mxu1  ;;  %2778 = vmatmul.mubr.bf16.gmra.mxu0 %v2378_v0  ;;  %v2299_v22 = vmax.f32 %v2171_v42, 0.0  ;;  %v2301_v5 = vmax.f32 %v2173_v3, 0.0 }
 0x20f   : > { %v2302_v54 = vmax.f32 %v2174_v48, 0.0  ;;  %v2304_v62 = vmax.f32 %v2176_v38, 0.0  ;;  %v2175_v2 = vadd.f32 %v4741_v31, %v1825_v14  ;;  %v2177_v44 = vadd.f32 %v4744_v41, %v2018_v19  ;;  %2939 = vmatmul.mubr.bf16.gmra.mxu1 %v2380_v23  ;;  %v5286_v48 = vld [vmem:[#allocation67_spill] sm:$0xff] }
 0x210   : > { %v1829_v53 = vadd.f32 %v1828_v15, %v5277_v8  ;;  %v2022_v17 = vadd.f32 %v2021_v6, %v5278_v36  ;;  %v1830_v50 = vpop.f32.mrf.mxu0  ;;  %v2023_v43 = vpop.f32.mrf.mxu1  ;;  %v5289_v36 = vld [vmem:[#allocation37_spill] sm:$0xff] }
 0x211   : > { %v2303_v11 = vmax.f32 %v2175_v2, 0.0  ;;  %v2305_v7 = vmax.f32 %v2177_v44, 0.0  ;;  %v2382_v61 = vpack.c.bf16 %v2302_v54, %v2298_v55  ;;  %v2384_v47 = vpack.c.bf16 %v2304_v62, %v2300_v13  ;;  %v5287_v2 = vld [vmem:[#allocation36_spill] sm:$0xff] }
 0x212   : > { %v1831_v63 = vadd.f32 %v1830_v50, %v5279_v40  ;;  %v2024_v37 = vadd.f32 %v2023_v43, %v5280_v29  ;;  %v1832_v45 = vpop.f32.mrf.mxu0  ;;  %v2025_v58 = vpop.f32.mrf.mxu1  ;;  %v2178_v51 = vadd.f32 %v4733_v25, %v1829_v53  ;;  %v2180_v39 = vadd.f32 %v4736_v59, %v2022_v17  ;;  %v5288_v55 = vld [vmem:[#allocation68_spill] sm:$0xff]  ;;  %v5290_v50 = vld [vmem:[#allocation70_spill] sm:$0xff] }
 0x213   : > { %v1833_v30 = vadd.f32 %v1832_v45, %v5281_v18  ;;  %v2026_v12 = vadd.f32 %v2025_v58, %v5282_v49  ;;  %v2383_v20 = vpack.c.bf16 %v2303_v11, %v2299_v22  ;;  %v2385_v56 = vpack.c.bf16 %v2305_v7, %v2301_v5  ;;  %v5291_v45 = vld [vmem:[#allocation38_spill] sm:$0xff]  ;;  %v5292_v18 = vld [vmem:[#allocation72_spill] sm:$0xff] }
 0x214   : > { %v2179_v0 = vadd.f32 %v4741_v31, %v1831_v63  ;;  %v2181_v23 = vadd.f32 %v4744_v41, %v2024_v37  ;;  %v1834_v34 = vpop.f32.mrf.mxu0  ;;  %v2027_v21 = vpop.f32.mrf.mxu1  ;;  %v2306_v42 = vmax.f32 %v2178_v51, 0.0  ;;  %v2308_v3 = vmax.f32 %v2180_v39, 0.0 }
 0x215   : > { %v2182_v16 = vadd.f32 %v4733_v25, %v1833_v30  ;;  %v2184_v27 = vadd.f32 %v4736_v59, %v2026_v12  ;;  %v1835_v60 = vadd.f32 %v1834_v34, %v5283_v24  ;;  %v2028_v33 = vadd.f32 %v2027_v21, %v5284_v35  ;;  %2785 = vmatprep.mubr.bf16.mxu0 %v2383_v20  ;;  %v5293_v34 = vld [vmem:[#allocation39_spill] sm:$0xff] }
 0x216   : > { %2946 = vmatprep.mubr.bf16.mxu1 %v2385_v56  ;;  %v1838_v10 = vpop.f32.mrf.mxu0  ;;  %v2031_v57 = vpop.f32.mrf.mxu1  ;;  %2786 = vmatmul.mubr.bf16.gmra.mxu0 %v2382_v61  ;;  %v2307_v9 = vmax.f32 %v2179_v0, 0.0  ;;  %v2309_v19 = vmax.f32 %v2181_v23, 0.0 }
 0x217   : > { %v2310_v26 = vmax.f32 %v2182_v16, 0.0  ;;  %v2312_v4 = vmax.f32 %v2184_v27, 0.0  ;;  %v2183_v32 = vadd.f32 %v4741_v31, %v1835_v60  ;;  %v2185_v1 = vadd.f32 %v4744_v41, %v2028_v33  ;;  %2947 = vmatmul.mubr.bf16.gmra.mxu1 %v2384_v47  ;;  %v5294_v16 = vld [vmem:[#allocation75_spill] sm:$0xff] }
 0x218   : > { %v1839_v46 = vadd.f32 %v1838_v10, %v5285_v28  ;;  %v2032_v38 = vadd.f32 %v2031_v57, %v5286_v48  ;;  %v1840_v52 = vpop.f32.mrf.mxu0  ;;  %v2033_v14 = vpop.f32.mrf.mxu1  ;;  %v5297_v48 = vld [vmem:[#allocation41_spill] sm:$0xff] }
 0x219   : > { %v2311_v15 = vmax.f32 %v2183_v32, 0.0  ;;  %v2313_v6 = vmax.f32 %v2185_v1, 0.0  ;;  %v2386_v54 = vpack.c.bf16 %v2310_v26, %v2306_v42  ;;  %v2388_v62 = vpack.c.bf16 %v2312_v4, %v2308_v3  ;;  %v5295_v32 = vld [vmem:[#allocation40_spill] sm:$0xff]  ;;  %v5296_v42 = vld [vmem:[#allocation77_spill] sm:$0xff] }
 0x21a   : > { %v1841_v44 = vadd.f32 %v1840_v52, %v5287_v2  ;;  %v2034_v13 = vadd.f32 %v2033_v14, %v5288_v55  ;;  %v1842_v8 = vpop.f32.mrf.mxu0  ;;  %v2035_v53 = vpop.f32.mrf.mxu1  ;;  %v2186_v11 = vadd.f32 %v4733_v25, %v1839_v46  ;;  %v2188_v7 = vadd.f32 %v4736_v59, %v2032_v38  ;;  %v5298_v52 = vld [vmem:[#allocation79_spill] sm:$0xff] }
 0x21b   : > { %v1843_v17 = vadd.f32 %v1842_v8, %v5289_v36  ;;  %v2036_v43 = vadd.f32 %v2035_v53, %v5290_v50  ;;  %v2387_v22 = vpack.c.bf16 %v2311_v15, %v2307_v9  ;;  %v2389_v5 = vpack.c.bf16 %v2313_v6, %v2309_v19  ;;  %v5299_v8 = vld [vmem:[#allocation42_spill] sm:$0xff]  ;;  %v5300_v36 = vld [vmem:[#allocation81_spill] sm:$0xff] }
 0x21c   : > { %v2187_v61 = vadd.f32 %v4741_v31, %v1841_v44  ;;  %v2189_v47 = vadd.f32 %v4744_v41, %v2034_v13  ;;  %v1844_v40 = vpop.f32.mrf.mxu0  ;;  %v2037_v63 = vpop.f32.mrf.mxu1  ;;  %v2314_v0 = vmax.f32 %v2186_v11, 0.0  ;;  %v2316_v23 = vmax.f32 %v2188_v7, 0.0 }
 0x21d   : > { %v2190_v29 = vadd.f32 %v4733_v25, %v1843_v17  ;;  %v2192_v37 = vadd.f32 %v4736_v59, %v2036_v43  ;;  %v1845_v58 = vadd.f32 %v1844_v40, %v5291_v45  ;;  %v2038_v30 = vadd.f32 %v2037_v63, %v5292_v18  ;;  %2793 = vmatprep.mubr.bf16.mxu0 %v2387_v22  ;;  %v5301_v18 = vld [vmem:[#allocation43_spill] sm:$0xff] }
 0x21e   : > { %2954 = vmatprep.mubr.bf16.mxu1 %v2389_v5  ;;  %v1848_v49 = vpop.f32.mrf.mxu0  ;;  %v2041_v12 = vpop.f32.mrf.mxu1  ;;  %2794 = vmatmul.mubr.bf16.gmra.mxu0 %v2386_v54  ;;  %v2315_v35 = vmax.f32 %v2187_v61, 0.0  ;;  %v2317_v33 = vmax.f32 %v2189_v47, 0.0 }
 0x21f   : > { %v2318_v20 = vmax.f32 %v2190_v29, 0.0  ;;  %v2320_v56 = vmax.f32 %v2192_v37, 0.0  ;;  %v2191_v51 = vadd.f32 %v4741_v31, %v1845_v58  ;;  %v2193_v39 = vadd.f32 %v4744_v41, %v2038_v30  ;;  %2955 = vmatmul.mubr.bf16.gmra.mxu1 %v2388_v62 }
 0x220   : > { %v1849_v21 = vadd.f32 %v1848_v49, %v5293_v34  ;;  %v2042_v27 = vadd.f32 %v2041_v12, %v5294_v16  ;;  %v1850_v24 = vpop.f32.mrf.mxu0  ;;  %v2043_v60 = vpop.f32.mrf.mxu1  ;;  %v5302_v49 = vld [vmem:[#allocation83_spill] sm:$0xff]  ;;  %v5305_v34 = vld [vmem:[#allocation45_spill] sm:$0xff] }
 0x221   : > { %v2319_v10 = vmax.f32 %v2191_v51, 0.0  ;;  %v2321_v57 = vmax.f32 %v2193_v39, 0.0  ;;  %v2390_v26 = vpack.c.bf16 %v2318_v20, %v2314_v0  ;;  %v2392_v4 = vpack.c.bf16 %v2320_v56, %v2316_v23  ;;  %v5303_v20 = vld [vmem:[#allocation44_spill] sm:$0xff]  ;;  %v5304_v51 = vld [vmem:[#allocation85_spill] sm:$0xff]  ;;  %v5306_v16 = vld [vmem:[#allocation87_spill] sm:$0xff] }
 0x222   : > { %v1851_v1 = vadd.f32 %v1850_v24, %v5295_v32  ;;  %v2044_v3 = vadd.f32 %v2043_v60, %v5296_v42  ;;  %v1852_v28 = vpop.f32.mrf.mxu0  ;;  %v2045_v46 = vpop.f32.mrf.mxu1  ;;  %v2194_v15 = vadd.f32 %v4733_v25, %v1849_v21  ;;  %v2196_v6 = vadd.f32 %v4736_v59, %v2042_v27  ;;  %v5307_v42 = vld [vmem:[#allocation46_spill] sm:$0xff] }
 0x223   : > { %v1853_v38 = vadd.f32 %v1852_v28, %v5297_v48  ;;  %v2046_v14 = vadd.f32 %v2045_v46, %v5298_v52  ;;  %v2391_v9 = vpack.c.bf16 %v2319_v10, %v2315_v35  ;;  %v2393_v19 = vpack.c.bf16 %v2321_v57, %v2317_v33  ;;  %v5308_v28 = vld [vmem:[#allocation89_spill] sm:$0xff] }
 0x224   : > { %v2195_v54 = vadd.f32 %v4741_v31, %v1851_v1  ;;  %v2197_v62 = vadd.f32 %v4744_v41, %v2044_v3  ;;  %v1854_v2 = vpop.f32.mrf.mxu0  ;;  %v2047_v44 = vpop.f32.mrf.mxu1  ;;  %v2322_v11 = vmax.f32 %v2194_v15, 0.0  ;;  %v2324_v7 = vmax.f32 %v2196_v6, 0.0 }
 0x225   : > { %v2198_v55 = vadd.f32 %v4733_v25, %v1853_v38  ;;  %v2200_v13 = vadd.f32 %v4736_v59, %v2046_v14  ;;  %v1855_v53 = vadd.f32 %v1854_v2, %v5299_v8  ;;  %v2048_v17 = vadd.f32 %v2047_v44, %v5300_v36  ;;  %2801 = vmatprep.mubr.bf16.mxu0 %v2391_v9  ;;  %v5002_v8 = vld [vmem:[%s5131_s8] ss:$0 sm:$0xff] }
 0x226   : > { %2962 = vmatprep.mubr.bf16.mxu1 %v2393_v19  ;;  %v1858_v50 = vpop.f32.mrf.mxu0  ;;  %v2051_v43 = vpop.f32.mrf.mxu1  ;;  %2802 = vmatmul.mubr.bf16.gmra.mxu0 %v2390_v26  ;;  %v2323_v29 = vmax.f32 %v2195_v54, 0.0  ;;  %v2325_v37 = vmax.f32 %v2197_v62, 0.0 }
 0x227   : > { %v2199_v22 = vadd.f32 %v4741_v31, %v1855_v53  ;;  %v2201_v5 = vadd.f32 %v4744_v41, %v2048_v17  ;;  %2963 = vmatmul.mubr.bf16.gmra.mxu1 %v2392_v4  ;;  %v2326_v61 = vmax.f32 %v2198_v55, 0.0  ;;  %v2328_v47 = vmax.f32 %v2200_v13, 0.0 }
 0x228   : > { %v1860_v40 = vpop.f32.mrf.mxu0  ;;  %v2053_v63 = vpop.f32.mrf.mxu1  ;;  %v1859_v30 = vadd.f32 %v1858_v50, %v5301_v18  ;;  %v2052_v12 = vadd.f32 %v2051_v43, %v5302_v49 }
 0x229   : > { %v2327_v45 = vmax.f32 %v2199_v22, 0.0  ;;  %v2329_v58 = vmax.f32 %v2201_v5, 0.0  ;;  %v1861_v56 = vadd.f32 %v1860_v40, %v5303_v20  ;;  %v2054_v39 = vadd.f32 %v2053_v63, %v5304_v51 }
 0x22a   : > { %v1862_v0 = vpop.f32.mrf.mxu0  ;;  %v2055_v23 = vpop.f32.mrf.mxu1  ;;  %v2394_v35 = vpack.c.bf16 %v2326_v61, %v2322_v11  ;;  %v2396_v33 = vpack.c.bf16 %v2328_v47, %v2324_v7  ;;  %v2202_v48 = vadd.f32 %v4733_v25, %v1859_v30  ;;  %v2204_v38 = vadd.f32 %v4736_v59, %v2052_v12 }
 0x22b   : > { %v1863_v21 = vadd.f32 %v1862_v0, %v5305_v34  ;;  %v2056_v27 = vadd.f32 %v2055_v23, %v5306_v16  ;;  %v2395_v24 = vpack.c.bf16 %v2327_v45, %v2323_v29  ;;  %v2397_v60 = vpack.c.bf16 %v2329_v58, %v2325_v37 }
 0x22c   : > { %v2203_v10 = vadd.f32 %v4741_v31, %v1861_v56  ;;  %v2205_v57 = vadd.f32 %v4744_v41, %v2054_v39  ;;  %v1864_v26 = vpop.f32.mrf.mxu0  ;;  %v2057_v4 = vpop.f32.mrf.mxu1  ;;  %v2330_v2 = vmax.f32 %v2202_v48, 0.0  ;;  %v2332_v44 = vmax.f32 %v2204_v38, 0.0 }
 0x22d   : > { %v2206_v32 = vadd.f32 %v4733_v25, %v1863_v21  ;;  %v2208_v1 = vadd.f32 %v4736_v59, %v2056_v27  ;;  %v1865_v3 = vadd.f32 %v1864_v26, %v5307_v42  ;;  %v2058_v46 = vadd.f32 %v2057_v4, %v5308_v28  ;;  %2809 = vmatprep.mubr.bf16.mxu0 %v2395_v24 }
 0x22e   : > { %2970 = vmatprep.mubr.bf16.mxu1 %v2397_v60  ;;  %2810 = vmatmul.mubr.bf16.gmra.mxu0 %v2394_v35  ;;  %v2331_v9 = vmax.f32 %v2203_v10, 0.0  ;;  %v2333_v19 = vmax.f32 %v2205_v57, 0.0 }
 0x22f   : > { %v2207_v52 = vadd.f32 %v4741_v31, %v1865_v3  ;;  %v2209_v14 = vadd.f32 %v4744_v41, %v2058_v46  ;;  %2971 = vmatmul.mubr.bf16.gmra.mxu1 %v2396_v33  ;;  %v2334_v15 = vmax.f32 %v2206_v32, 0.0  ;;  %v2336_v6 = vmax.f32 %v2208_v1, 0.0 }
 0x231   : > { %v2335_v54 = vmax.f32 %v2207_v52, 0.0  ;;  %v2337_v62 = vmax.f32 %v2209_v14, 0.0  ;;  %v2398_v13 = vpack.c.bf16 %v2334_v15, %v2330_v2  ;;  %v2400_v59 = vpack.c.bf16 %v2336_v6, %v2332_v44 }
 0x233   : > { %v2399_v25 = vpack.c.bf16 %v2335_v54, %v2331_v9  ;;  %v2401_v55 = vpack.c.bf16 %v2337_v62, %v2333_v19 }
 0x235   : > { %2817 = vmatprep.mubr.bf16.mxu0 %v2399_v25  ;;  %2978 = vmatprep.mubr.bf16.mxu1 %v2401_v55 }
 0x236   : > { %2818 = vmatmul.mubr.bf16.gmra.mxu0 %v2398_v13 }
 0x237   : > { %2979 = vmatmul.mubr.bf16.gmra.mxu1 %v2400_v59 }
 0x27e   : > { %v3293_v41 = vpop.f32.mrf.mxu0 }
 0x27f   : > { %v3405_v31 = vpop.f32.mrf.mxu1 }
 0x280   : > { %v3294_v53 = vpop.f32.mrf.mxu0 }
 0x281   : > { %v3406_v36 = vpop.f32.mrf.mxu1  ;;  %v3295_v17 = vadd.f32 %v3294_v53, %v3293_v41 }
 0x282   : > { %v3296_v50 = vpop.f32.mrf.mxu0  ;;  %v3407_v5 = vadd.f32 %v3406_v36, %v3405_v31 }
 0x283   : > { %v3408_v43 = vpop.f32.mrf.mxu1  ;;  %v2700_v22 = vadd.f32 %v3295_v17, %v5002_v8 }
 0x284   : > { %v3297_v11 = vpop.f32.mrf.mxu0 }
 0x285   : > { %v3409_v7 = vpop.f32.mrf.mxu1  ;;  %v2861_v61 = vadd.f32 %v3407_v5, %v2700_v22  ;;  %v3298_v47 = vadd.f32 %v3297_v11, %v3296_v50 }
 0x286   : > { %v3299_v40 = vpop.f32.mrf.mxu0  ;;  %v3410_v37 = vadd.f32 %v3409_v7, %v3408_v43 }
 0x287   : > { %v3411_v63 = vpop.f32.mrf.mxu1  ;;  %2987 = vst [vmem:[%s5007_s24] sm:$0xff] %v2861_v61  ;;  %v2703_v29 = vadd.f32 %v3298_v47, %v5002_v8 }
 0x288   : > { %v3300_v45 = vpop.f32.mrf.mxu0 }
 0x289   : > { %v3412_v58 = vpop.f32.mrf.mxu1  ;;  %v2864_v18 = vadd.f32 %v3410_v37, %v2703_v29  ;;  %v3301_v30 = vadd.f32 %v3300_v45, %v3299_v40 }
 0x28a   : > { %v3302_v49 = vpop.f32.mrf.mxu0  ;;  %v3413_v56 = vadd.f32 %v3412_v58, %v3411_v63 }
 0x28b   : > { %v3414_v12 = vpop.f32.mrf.mxu1  ;;  %2988 = vst [vmem:[%s5007_s24 + $0x8] sm:$0xff] %v2864_v18  ;;  %v2708_v20 = vadd.f32 %v3301_v30, %v5002_v8 }
 0x28c   : > { %v3303_v51 = vpop.f32.mrf.mxu0 }
 0x28d   : > { %v3415_v39 = vpop.f32.mrf.mxu1  ;;  %v2869_v0 = vadd.f32 %v3413_v56, %v2708_v20  ;;  %v3304_v23 = vadd.f32 %v3303_v51, %v3302_v49 }
 0x28e   : > { %v3305_v34 = vpop.f32.mrf.mxu0  ;;  %v3416_v27 = vadd.f32 %v3415_v39, %v3414_v12 }
 0x28f   : > { %v3417_v21 = vpop.f32.mrf.mxu1  ;;  %2989 = vst [vmem:[%s5007_s24 + $0x10] sm:$0xff] %v2869_v0  ;;  %v2711_v16 = vadd.f32 %v3304_v23, %v5002_v8 }
 0x290   : > { %v3306_v24 = vpop.f32.mrf.mxu0 }
 0x291   : > { %v3418_v60 = vpop.f32.mrf.mxu1  ;;  %v2872_v35 = vadd.f32 %v3416_v27, %v2711_v16  ;;  %v3307_v33 = vadd.f32 %v3306_v24, %v3305_v34 }
 0x292   : > { %v3308_v10 = vpop.f32.mrf.mxu0  ;;  %v3419_v4 = vadd.f32 %v3418_v60, %v3417_v21 }
 0x293   : > { %v3420_v57 = vpop.f32.mrf.mxu1  ;;  %2990 = vst [vmem:[%s5007_s24 + $0x18] sm:$0xff] %v2872_v35  ;;  %v2716_v26 = vadd.f32 %v3307_v33, %v5002_v8 }
 0x294   : > { %v3309_v32 = vpop.f32.mrf.mxu0 }
 0x295   : > { %v3421_v1 = vpop.f32.mrf.mxu1  ;;  %v2877_v42 = vadd.f32 %v3419_v4, %v2716_v26  ;;  %v3310_v3 = vadd.f32 %v3309_v32, %v3308_v10 }
 0x296   : > { %v3311_v28 = vpop.f32.mrf.mxu0  ;;  %v3422_v38 = vadd.f32 %v3421_v1, %v3420_v57 }
 0x297   : > { %v3423_v46 = vpop.f32.mrf.mxu1  ;;  %2991 = vst [vmem:[%s5007_s24 + $0x20] sm:$0xff] %v2877_v42  ;;  %v2719_v48 = vadd.f32 %v3310_v3, %v5002_v8 }
 0x298   : > { %v3312_v52 = vpop.f32.mrf.mxu0 }
 0x299   : > { %v3424_v14 = vpop.f32.mrf.mxu1  ;;  %v2880_v9 = vadd.f32 %v3422_v38, %v2719_v48  ;;  %v3313_v19 = vadd.f32 %v3312_v52, %v3311_v28 }
 0x29a   : > { %v3314_v15 = vpop.f32.mrf.mxu0  ;;  %v3425_v62 = vadd.f32 %v3424_v14, %v3423_v46 }
 0x29b   : > { %v3426_v6 = vpop.f32.mrf.mxu1  ;;  %2992 = vst [vmem:[%s5007_s24 + $0x28] sm:$0xff] %v2880_v9  ;;  %v2724_v54 = vadd.f32 %v3313_v19, %v5002_v8 }
 0x29c   : > { %v3315_v2 = vpop.f32.mrf.mxu0 }
 0x29d   : > { %v3427_v44 = vpop.f32.mrf.mxu1  ;;  %v2885_v25 = vadd.f32 %v3425_v62, %v2724_v54  ;;  %v3316_v55 = vadd.f32 %v3315_v2, %v3314_v15 }
 0x29e   : > { %v3317_v13 = vpop.f32.mrf.mxu0  ;;  %v3428_v31 = vadd.f32 %v3427_v44, %v3426_v6 }
 0x29f   : > { %v3429_v59 = vpop.f32.mrf.mxu1  ;;  %2993 = vst [vmem:[%s5007_s24 + $0x30] sm:$0xff] %v2885_v25  ;;  %v2727_v41 = vadd.f32 %v3316_v55, %v5002_v8 }
 0x2a0   : > { %v3318_v53 = vpop.f32.mrf.mxu0 }
 0x2a1   : > { %v3430_v36 = vpop.f32.mrf.mxu1  ;;  %v2888_v17 = vadd.f32 %v3428_v31, %v2727_v41  ;;  %v3319_v50 = vadd.f32 %v3318_v53, %v3317_v13 }
 0x2a2   : > { %v3320_v43 = vpop.f32.mrf.mxu0  ;;  %v3431_v11 = vadd.f32 %v3430_v36, %v3429_v59 }
 0x2a3   : > { %v3432_v22 = vpop.f32.mrf.mxu1  ;;  %2994 = vst [vmem:[%s5007_s24 + $0x38] sm:$0xff] %v2888_v17  ;;  %v2732_v5 = vadd.f32 %v3319_v50, %v5002_v8 }
 0x2a4   : > { %v3321_v7 = vpop.f32.mrf.mxu0 }
 0x2a5   : > { %v3433_v61 = vpop.f32.mrf.mxu1  ;;  %v2893_v47 = vadd.f32 %v3431_v11, %v2732_v5  ;;  %v3322_v40 = vadd.f32 %v3321_v7, %v3320_v43 }
 0x2a6   : > { %v3323_v63 = vpop.f32.mrf.mxu0  ;;  %v3434_v45 = vadd.f32 %v3433_v61, %v3432_v22 }
 0x2a7   : > { %v3435_v29 = vpop.f32.mrf.mxu1  ;;  %2995 = vst [vmem:[%s5007_s24 + $0x40] sm:$0xff] %v2893_v47  ;;  %v2735_v37 = vadd.f32 %v3322_v40, %v5002_v8 }
 0x2a8   : > { %v3324_v58 = vpop.f32.mrf.mxu0 }
 0x2a9   : > { %v3436_v18 = vpop.f32.mrf.mxu1  ;;  %v2896_v30 = vadd.f32 %v3434_v45, %v2735_v37  ;;  %v3325_v49 = vadd.f32 %v3324_v58, %v3323_v63 }
 0x2aa   : > { %v3326_v12 = vpop.f32.mrf.mxu0  ;;  %v3437_v51 = vadd.f32 %v3436_v18, %v3435_v29 }
 0x2ab   : > { %v3438_v20 = vpop.f32.mrf.mxu1  ;;  %2996 = vst [vmem:[%s5007_s24 + $0x48] sm:$0xff] %v2896_v30  ;;  %v2740_v56 = vadd.f32 %v3325_v49, %v5002_v8 }
 0x2ac   : > { %v3327_v39 = vpop.f32.mrf.mxu0 }
 0x2ad   : > { %v3439_v0 = vpop.f32.mrf.mxu1  ;;  %v2901_v23 = vadd.f32 %v3437_v51, %v2740_v56  ;;  %v3328_v34 = vadd.f32 %v3327_v39, %v3326_v12 }
 0x2ae   : > { %v3329_v21 = vpop.f32.mrf.mxu0  ;;  %v3440_v24 = vadd.f32 %v3439_v0, %v3438_v20 }
 0x2af   : > { %v3441_v16 = vpop.f32.mrf.mxu1  ;;  %2997 = vst [vmem:[%s5007_s24 + $0x50] sm:$0xff] %v2901_v23  ;;  %v2743_v27 = vadd.f32 %v3328_v34, %v5002_v8 }
 0x2b0   : > { %v3330_v60 = vpop.f32.mrf.mxu0 }
 0x2b1   : > { %v3442_v35 = vpop.f32.mrf.mxu1  ;;  %v2904_v33 = vadd.f32 %v3440_v24, %v2743_v27  ;;  %v3331_v10 = vadd.f32 %v3330_v60, %v3329_v21 }
 0x2b2   : > { %v3332_v57 = vpop.f32.mrf.mxu0  ;;  %v3443_v32 = vadd.f32 %v3442_v35, %v3441_v16 }
 0x2b3   : > { %v3444_v26 = vpop.f32.mrf.mxu1  ;;  %2998 = vst [vmem:[%s5007_s24 + $0x58] sm:$0xff] %v2904_v33  ;;  %v2748_v4 = vadd.f32 %v3331_v10, %v5002_v8 }
 0x2b4   : > { %v3333_v1 = vpop.f32.mrf.mxu0 }
 0x2b5   : > { %v3445_v42 = vpop.f32.mrf.mxu1  ;;  %v2909_v3 = vadd.f32 %v3443_v32, %v2748_v4  ;;  %v3334_v28 = vadd.f32 %v3333_v1, %v3332_v57 }
 0x2b6   : > { %v3335_v46 = vpop.f32.mrf.mxu0  ;;  %v3446_v52 = vadd.f32 %v3445_v42, %v3444_v26 }
 0x2b7   : > { %v3447_v48 = vpop.f32.mrf.mxu1  ;;  %2999 = vst [vmem:[%s5007_s24 + $0x60] sm:$0xff] %v2909_v3  ;;  %v2751_v38 = vadd.f32 %v3334_v28, %v5002_v8 }
 0x2b8   : > { %v3336_v14 = vpop.f32.mrf.mxu0 }
 0x2b9   : > { %v3448_v9 = vpop.f32.mrf.mxu1  ;;  %v2912_v19 = vadd.f32 %v3446_v52, %v2751_v38  ;;  %v3337_v15 = vadd.f32 %v3336_v14, %v3335_v46 }
 0x2ba   : > { %v3338_v6 = vpop.f32.mrf.mxu0  ;;  %v3449_v2 = vadd.f32 %v3448_v9, %v3447_v48 }
 0x2bb   : > { %v3450_v54 = vpop.f32.mrf.mxu1  ;;  %3000 = vst [vmem:[%s5007_s24 + $0x68] sm:$0xff] %v2912_v19  ;;  %v2756_v62 = vadd.f32 %v3337_v15, %v5002_v8 }
 0x2bc   : > { %v3339_v44 = vpop.f32.mrf.mxu0 }
 0x2bd   : > { %v3451_v25 = vpop.f32.mrf.mxu1  ;;  %v2917_v55 = vadd.f32 %v3449_v2, %v2756_v62  ;;  %v3340_v13 = vadd.f32 %v3339_v44, %v3338_v6 }
 0x2be   : > { %v3341_v59 = vpop.f32.mrf.mxu0  ;;  %v3452_v53 = vadd.f32 %v3451_v25, %v3450_v54 }
 0x2bf   : > { %v3453_v41 = vpop.f32.mrf.mxu1  ;;  %3001 = vst [vmem:[%s5007_s24 + $0x70] sm:$0xff] %v2917_v55  ;;  %v2759_v31 = vadd.f32 %v3340_v13, %v5002_v8 }
 0x2c0   : > { %v3342_v36 = vpop.f32.mrf.mxu0 }
 0x2c1   : > { %v3454_v17 = vpop.f32.mrf.mxu1  ;;  %v2920_v50 = vadd.f32 %v3452_v53, %v2759_v31  ;;  %v3343_v43 = vadd.f32 %v3342_v36, %v3341_v59 }
 0x2c2   : > { %v3344_v22 = vpop.f32.mrf.mxu0  ;;  %v3455_v7 = vadd.f32 %v3454_v17, %v3453_v41 }
 0x2c3   : > { %v3456_v5 = vpop.f32.mrf.mxu1  ;;  %3002 = vst [vmem:[%s5007_s24 + $0x78] sm:$0xff] %v2920_v50  ;;  %v2764_v11 = vadd.f32 %v3343_v43, %v5002_v8 }
 0x2c4   : > { %v3345_v61 = vpop.f32.mrf.mxu0 }
 0x2c5   : > { %v3457_v47 = vpop.f32.mrf.mxu1  ;;  %v2925_v40 = vadd.f32 %v3455_v7, %v2764_v11  ;;  %v3346_v63 = vadd.f32 %v3345_v61, %v3344_v22 }
 0x2c6   : > { %v3347_v29 = vpop.f32.mrf.mxu0  ;;  %v3458_v58 = vadd.f32 %v3457_v47, %v3456_v5 }
 0x2c7   : > { %v3459_v37 = vpop.f32.mrf.mxu1  ;;  %3003 = vst [vmem:[%s5007_s24 + $0x80] sm:$0xff] %v2925_v40  ;;  %v2767_v45 = vadd.f32 %v3346_v63, %v5002_v8 }
 0x2c8   : > { %v3348_v18 = vpop.f32.mrf.mxu0 }
 0x2c9   : > { %v3460_v30 = vpop.f32.mrf.mxu1  ;;  %v2928_v49 = vadd.f32 %v3458_v58, %v2767_v45  ;;  %v3349_v12 = vadd.f32 %v3348_v18, %v3347_v29 }
 0x2ca   : > { %v3350_v20 = vpop.f32.mrf.mxu0  ;;  %v3461_v39 = vadd.f32 %v3460_v30, %v3459_v37 }
 0x2cb   : > { %v3462_v56 = vpop.f32.mrf.mxu1  ;;  %3004 = vst [vmem:[%s5007_s24 + $0x88] sm:$0xff] %v2928_v49  ;;  %v2772_v51 = vadd.f32 %v3349_v12, %v5002_v8 }
 0x2cc   : > { %v3351_v0 = vpop.f32.mrf.mxu0 }
 0x2cd   : > { %v3463_v23 = vpop.f32.mrf.mxu1  ;;  %v2933_v34 = vadd.f32 %v3461_v39, %v2772_v51  ;;  %v3352_v21 = vadd.f32 %v3351_v0, %v3350_v20 }
 0x2ce   : > { %v3353_v16 = vpop.f32.mrf.mxu0  ;;  %v3464_v60 = vadd.f32 %v3463_v23, %v3462_v56 }
 0x2cf   : > { %v3465_v27 = vpop.f32.mrf.mxu1  ;;  %3005 = vst [vmem:[%s5007_s24 + $0x90] sm:$0xff] %v2933_v34  ;;  %v2775_v24 = vadd.f32 %v3352_v21, %v5002_v8 }
 0x2d0   : > { %v3354_v35 = vpop.f32.mrf.mxu0 }
 0x2d1   : > { %v3466_v33 = vpop.f32.mrf.mxu1  ;;  %v2936_v10 = vadd.f32 %v3464_v60, %v2775_v24  ;;  %v3355_v57 = vadd.f32 %v3354_v35, %v3353_v16 }
 0x2d2   : > { %v3356_v26 = vpop.f32.mrf.mxu0  ;;  %v3467_v1 = vadd.f32 %v3466_v33, %v3465_v27 }
 0x2d3   : > { %v3468_v4 = vpop.f32.mrf.mxu1  ;;  %3006 = vst [vmem:[%s5007_s24 + $0x98] sm:$0xff] %v2936_v10  ;;  %v2780_v32 = vadd.f32 %v3355_v57, %v5002_v8 }
 0x2d4   : > { %v3357_v42 = vpop.f32.mrf.mxu0 }
 0x2d5   : > { %v3469_v3 = vpop.f32.mrf.mxu1  ;;  %v2941_v28 = vadd.f32 %v3467_v1, %v2780_v32  ;;  %v3358_v46 = vadd.f32 %v3357_v42, %v3356_v26 }
 0x2d6   : > { %v3359_v48 = vpop.f32.mrf.mxu0  ;;  %v3470_v14 = vadd.f32 %v3469_v3, %v3468_v4 }
 0x2d7   : > { %v3471_v38 = vpop.f32.mrf.mxu1  ;;  %3007 = vst [vmem:[%s5007_s24 + $0xa0] sm:$0xff] %v2941_v28  ;;  %v2783_v52 = vadd.f32 %v3358_v46, %v5002_v8 }
 0x2d8   : > { %v3360_v9 = vpop.f32.mrf.mxu0 }
 0x2d9   : > { %v3472_v19 = vpop.f32.mrf.mxu1  ;;  %v2944_v15 = vadd.f32 %v3470_v14, %v2783_v52  ;;  %v3361_v6 = vadd.f32 %v3360_v9, %v3359_v48 }
 0x2da   : > { %v3362_v54 = vpop.f32.mrf.mxu0  ;;  %v3473_v44 = vadd.f32 %v3472_v19, %v3471_v38 }
 0x2db   : > { %v3474_v62 = vpop.f32.mrf.mxu1  ;;  %3008 = vst [vmem:[%s5007_s24 + $0xa8] sm:$0xff] %v2944_v15  ;;  %v2788_v2 = vadd.f32 %v3361_v6, %v5002_v8 }
 0x2dc   : > { %v3363_v25 = vpop.f32.mrf.mxu0 }
 0x2dd   : > { %v3475_v55 = vpop.f32.mrf.mxu1  ;;  %v2949_v13 = vadd.f32 %v3473_v44, %v2788_v2  ;;  %v3364_v59 = vadd.f32 %v3363_v25, %v3362_v54 }
 0x2de   : > { %v3365_v41 = vpop.f32.mrf.mxu0  ;;  %v3476_v36 = vadd.f32 %v3475_v55, %v3474_v62 }
 0x2df   : > { %v3477_v31 = vpop.f32.mrf.mxu1  ;;  %3009 = vst [vmem:[%s5007_s24 + $0xb0] sm:$0xff] %v2949_v13  ;;  %v2791_v53 = vadd.f32 %v3364_v59, %v5002_v8 }
 0x2e0   : > { %v3366_v17 = vpop.f32.mrf.mxu0 }
 0x2e1   : > { %v3478_v50 = vpop.f32.mrf.mxu1  ;;  %v2952_v43 = vadd.f32 %v3476_v36, %v2791_v53  ;;  %v3367_v22 = vadd.f32 %v3366_v17, %v3365_v41 }
 0x2e2   : > { %v3368_v5 = vpop.f32.mrf.mxu0  ;;  %v3479_v61 = vadd.f32 %v3478_v50, %v3477_v31 }
 0x2e3   : > { %v3480_v11 = vpop.f32.mrf.mxu1  ;;  %3010 = vst [vmem:[%s5007_s24 + $0xb8] sm:$0xff] %v2952_v43  ;;  %v2796_v7 = vadd.f32 %v3367_v22, %v5002_v8 }
 0x2e4   : > { %v3369_v47 = vpop.f32.mrf.mxu0 }
 0x2e5   : > { %v3481_v40 = vpop.f32.mrf.mxu1  ;;  %v2957_v63 = vadd.f32 %v3479_v61, %v2796_v7  ;;  %v3370_v29 = vadd.f32 %v3369_v47, %v3368_v5 }
 0x2e6   : > { %v3371_v37 = vpop.f32.mrf.mxu0  ;;  %v3482_v18 = vadd.f32 %v3481_v40, %v3480_v11 }
 0x2e7   : > { %v3483_v45 = vpop.f32.mrf.mxu1  ;;  %3011 = vst [vmem:[%s5007_s24 + $0xc0] sm:$0xff] %v2957_v63  ;;  %v2799_v58 = vadd.f32 %v3370_v29, %v5002_v8 }
 0x2e8   : > { %v3372_v30 = vpop.f32.mrf.mxu0 }
 0x2e9   : > { %v3484_v49 = vpop.f32.mrf.mxu1  ;;  %v2960_v12 = vadd.f32 %v3482_v18, %v2799_v58  ;;  %v3373_v20 = vadd.f32 %v3372_v30, %v3371_v37 }
 0x2ea   : > { %v3374_v56 = vpop.f32.mrf.mxu0  ;;  %v3485_v0 = vadd.f32 %v3484_v49, %v3483_v45 }
 0x2eb   : > { %v3486_v51 = vpop.f32.mrf.mxu1  ;;  %3012 = vst [vmem:[%s5007_s24 + $0xc8] sm:$0xff] %v2960_v12  ;;  %v2804_v39 = vadd.f32 %v3373_v20, %v5002_v8 }
 0x2ec   : > { %v3375_v23 = vpop.f32.mrf.mxu0 }
 0x2ed   : > { %v3487_v34 = vpop.f32.mrf.mxu1  ;;  %v2965_v21 = vadd.f32 %v3485_v0, %v2804_v39  ;;  %v3376_v16 = vadd.f32 %v3375_v23, %v3374_v56 }
 0x2ee   : > { %v3377_v27 = vpop.f32.mrf.mxu0  ;;  %v3488_v35 = vadd.f32 %v3487_v34, %v3486_v51 }
 0x2ef   : > { %v3489_v24 = vpop.f32.mrf.mxu1  ;;  %3013 = vst [vmem:[%s5007_s24 + $0xd0] sm:$0xff] %v2965_v21  ;;  %v2807_v60 = vadd.f32 %v3376_v16, %v5002_v8 }
 0x2f0   : > { %v3378_v33 = vpop.f32.mrf.mxu0 }
 0x2f1   : > { %v3490_v10 = vpop.f32.mrf.mxu1  ;;  %v2968_v57 = vadd.f32 %v3488_v35, %v2807_v60  ;;  %v3379_v26 = vadd.f32 %v3378_v33, %v3377_v27 }
 0x2f2   : > { %v3380_v4 = vpop.f32.mrf.mxu0  ;;  %v3491_v42 = vadd.f32 %v3490_v10, %v3489_v24 }
 0x2f3   : > { %v3492_v32 = vpop.f32.mrf.mxu1  ;;  %3014 = vst [vmem:[%s5007_s24 + $0xd8] sm:$0xff] %v2968_v57  ;;  %v2812_v1 = vadd.f32 %v3379_v26, %v5002_v8 }
 0x2f4   : > { %v3381_v3 = vpop.f32.mrf.mxu0 }
 0x2f5   : > { %v3493_v28 = vpop.f32.mrf.mxu1  ;;  %v2973_v46 = vadd.f32 %v3491_v42, %v2812_v1  ;;  %v3382_v48 = vadd.f32 %v3381_v3, %v3380_v4 }
 0x2f6   : > { %v3383_v38 = vpop.f32.mrf.mxu0  ;;  %v3494_v9 = vadd.f32 %v3493_v28, %v3492_v32 }
 0x2f7   : > { %v3495_v52 = vpop.f32.mrf.mxu1  ;;  %3015 = vst [vmem:[%s5007_s24 + $0xe0] sm:$0xff] %v2973_v46  ;;  %v2815_v14 = vadd.f32 %v3382_v48, %v5002_v8 }
 0x2f8   : > { %v3384_v19 = vpop.f32.mrf.mxu0 }
 0x2f9   : > { %v3496_v15 = vpop.f32.mrf.mxu1  ;;  %v2976_v6 = vadd.f32 %v3494_v9, %v2815_v14  ;;  %v3385_v54 = vadd.f32 %v3384_v19, %v3383_v38 }
 0x2fa   : > { %v3386_v62 = vpop.f32.mrf.mxu0  ;;  %v3497_v25 = vadd.f32 %v3496_v15, %v3495_v52 }
 0x2fb   : > { %v3498_v2 = vpop.f32.mrf.mxu1  ;;  %3016 = vst [vmem:[%s5007_s24 + $0xe8] sm:$0xff] %v2976_v6  ;;  %v2820_v44 = vadd.f32 %v3385_v54, %v5002_v8 }
 0x2fc   : > { %v3387_v55 = vpop.f32.mrf.mxu0 }
 0x2fd   : > { %v3499_v13 = vpop.f32.mrf.mxu1  ;;  %v2981_v59 = vadd.f32 %v3497_v25, %v2820_v44  ;;  %v3388_v41 = vadd.f32 %v3387_v55, %v3386_v62 }
 0x2fe   : > { %v3500_v53 = vadd.f32 %v3499_v13, %v3498_v2 }
 0x2ff   : > { %3017 = vst [vmem:[%s5007_s24 + $0xf0] sm:$0xff] %v2981_v59  ;;  %v2823_v31 = vadd.f32 %v3388_v41, %v5002_v8 }
 0x301   : > { %v2984_v36 = vadd.f32 %v3500_v53, %v2823_v31 }
 0x303   : > { %3018 = vst [vmem:[%s5007_s24 + $0xf8] sm:$0xff] %v2984_v36 }
 0x304   : > { %3695 = shalt.err (!%p3692_p3)
}
 0x305   : > { %s3696_s16 = scalar_lea.hbm %s5076_s28, 4096  ;;  %s3700_s25 = scalar_lea.hbm %s5132_s9, 8192 }
 0x306   : > { %p3697_p4 = scmp.ne.s32.totalorder %s5076_s28, %s3696_s16  ;;  %p3701_p9 = scmp.lt.s32.totalorder %s5076_s28, %s5132_s9 }
 0x307   : > { %p3702_p10 = scmp.lt.s32.totalorder %s3700_s25, %s3696_s16 }
 0x308   : > { %p3698_p7 = pnand %p3697_p4, %p3836_p5 }
 0x309   : > { %p3703_p11 = por %p3702_p10, %p3701_p9 }
 0x30a   : > { %p3699_p8 = pneg %p3698_p7 }
 0x30c   : > { %p3704_p12 = pnand %p3703_p11, %p3699_p8 }
 0x30e   : > { %3707 = shalt.err (!%p3704_p12)
}
 0x30f   : > { %s3746_s13 = smov 128   ;;  %s3747_s14 = smov 8  }
 0x310   : > { %3503 = dma.vmem_to_hbm [thread:$0]  (%p3836_p5), %s5078_s26, 4096, %s5076_s28, %s5083_s29, %s3746_s13, %s3746_s13, %s3747_s14  }
 0x311 PF: > { %p3509_p13 = scmp.ge.s32.totalorder %s3742_s12, 2  ;;  %s3048_s17 = sand.u32 1, %s3730_s30  }
 0x312   : > { %s3049_s21 = scalar_lea.sflag [#allocation3], %s3048_s17 }
 0x313   : > { %p3506_p0 = pnand %p3509_p13, %p3840_p6 }
 0x315   : > { %p3507_p1 = pneg %p3506_p0 }
 0x317   : > { %3725 = dma.done.wait (%p3507_p1), %s3049_s21, 4096  }
 0x318   : > { %3727 = vsyncadd (%p3507_p1), %s3049_s21, 4294963200  ;;  %p19_p2 = scmp.ge.s32.totalorder %s3823_s15, 4   ;;  %s5309_s30 = smov %s3734_s10 }
 0x319   : > { %s5310_s10 = smov %s3738_s11  ;;  %s5311_s11 = smov %s3834_s18 }
 0x31a   : > { %s5312_s12 = smov %s3823_s15  ;;  %21 = sbr.rel (!%p19_p2) target bundleno = 3 (0x3), region = 94 }
 0x31f   :  { %3054 = vsyncpa [#allocation3], 1 }
 0x320   :  { %3056 = vsyncpa [#allocation3 + $0x1], 1 }

</bundles_post_ra>
